<compile_context>
chip_gen: v6e
topology: v6e:2x2x1
jax: 0.10.0
libtpu: 0.0.40
codegen_flags: <defaults>
</compile_context>

<pallas_src>
import functools
import math

import jax
import jax.numpy as jnp
from jax.experimental import pallas as pl
from jax.experimental.pallas import tpu as pltpu


def _round_up(x, m):
    return ((x + m - 1) // m) * m


# ---------------------------------------------------------------------------
# Fused router kernel
# ---------------------------------------------------------------------------
def _router_kernel(f_ref, w_ref, b_ref, lora_ref, o_ref, *, k, num_classes):
    """One batch tile of LoRAAttentionRouter.

    f_ref:    (TB, D)  features tile
    w_ref:    (D, C)   attention weight, pre-transposed
    b_ref:    (1, C)   attention bias
    lora_ref: (C, D)   lora_ranks
    o_ref:    (TB, D)  adapted features tile (lane-dense, D % 128 == 0)
    """
    f = f_ref[...].astype(jnp.float32)                                     # (TB, D)

    # attention scores on the MXU, f32 accumulate
    scores = jnp.dot(f, w_ref[...], preferred_element_type=jnp.float32)    # (TB, C)
    scores = scores + b_ref[...]

    col = jax.lax.broadcasted_iota(jnp.int32, scores.shape, 1)
    neg_inf = jnp.float32(-jnp.inf)

    # Iterative top-k: k rounds of (argmax, mask-out).  Ties resolve to the
    # lowest index, matching jax.lax.top_k / torch argmax behavior.
    work = scores
    sel_mask = jnp.zeros_like(scores)                                      # (TB, C) in {0,1}
    for _ in range(k):
        vmax = jnp.max(work, axis=1, keepdims=True)                        # (TB, 1)
        idx = jnp.min(jnp.where(work >= vmax, col, num_classes),
                      axis=1, keepdims=True)                               # (TB, 1) first argmax
        onehot = (col == idx).astype(jnp.float32)                          # (TB, C)
        sel_mask = sel_mask + onehot
        work = jnp.where(onehot > 0.0, neg_inf, work)

    # softmax over the k selected scores, expressed directly in class space:
    # the max of the selected scores is the global row max.
    m = jnp.max(scores, axis=1, keepdims=True)                             # (TB, 1)
    e = jnp.exp(scores - m) * sel_mask                                     # (TB, C)
    class_w = e / jnp.sum(e, axis=1, keepdims=True)                        # (TB, C) routing weights

    # combined_lora = class_w @ lora_ranks, done on the VPU: C is tiny (e.g. 10),
    # so C broadcast-FMAs beat a K=C MXU matmul padded to 128 lanes.
    out = f
    for c in range(num_classes):
        out = out + class_w[:, c:c + 1] * lora_ref[c:c + 1, :]

    o_ref[...] = out.astype(o_ref.dtype)


def lora_attention_router(features, attn_weight, attn_bias, lora_ranks, *,
                          k=1, block_rows=128):
    """LoRAAttentionRouter.forward as one tiled Pallas call.

    features:    (B, D) float
    attn_weight: (C, D)  -- nn.Linear(in_features=D, out_features=C).weight
    attn_bias:   (C,)    -- nn.Linear bias
    lora_ranks:  (C, D)
    returns adapted features (B, D) float32
    """
    features = features.astype(jnp.float32)
    B, D = features.shape
    C, D2 = lora_ranks.shape
    assert D == D2, (D, D2)
    assert attn_weight.shape == (C, D), attn_weight.shape
    assert attn_bias.shape == (C,), attn_bias.shape
    assert 1 <= k <= C, k

    # Batch tiling: TB multiple of 8 (sublane) unless it covers the whole batch.
    TB = min(block_rows, _round_up(B, 8))
    Bp = _round_up(B, TB)
    f = features if Bp == B else jnp.pad(features, ((0, Bp - B), (0, 0)))

    w_t = jnp.transpose(attn_weight).astype(jnp.float32)        # (D, C)
    b = attn_bias.reshape(1, C).astype(jnp.float32)             # (1, C)
    lora = lora_ranks.astype(jnp.float32)                       # (C, D)

    grid = (Bp // TB,)
    out = pl.pallas_call(
        functools.partial(_router_kernel, k=k, num_classes=C),
        out_shape=jax.ShapeDtypeStruct((Bp, D), jnp.float32),
        grid_spec=pltpu.PrefetchScalarGridSpec(
            num_scalar_prefetch=0,
            grid=grid,
            in_specs=[
                pl.BlockSpec((TB, D), lambda i: (i, 0)),   # features tile
                pl.BlockSpec((D, C), lambda i: (0, 0)),    # attention weight (resident)
                pl.BlockSpec((1, C), lambda i: (0, 0)),    # attention bias   (resident)
                pl.BlockSpec((C, D), lambda i: (0, 0)),    # lora_ranks       (resident)
            ],
            out_specs=pl.BlockSpec((TB, D), lambda i: (i, 0)),
        ),
        # Batch rows are independent: let v7x's two TensorCores split the grid.
        # No vmem_limit override: per-step working set is far below the default
        # scoped VMEM on v5e/v6e/v7x.
        compiler_params=pltpu.CompilerParams(dimension_semantics=("parallel",)),
    )(f, w_t, b, lora)
    return out[:B]


# ---------------------------------------------------------------------------
# Pure-JAX reference (mirrors the PyTorch module) for validation
# ---------------------------------------------------------------------------
def _reference(features, attn_weight, attn_bias, lora_ranks, k):
    hi = jax.lax.Precision.HIGHEST
    scores = jnp.dot(features, attn_weight.T, precision=hi) + attn_bias
    C = scores.shape[1]
    vals, idx = jax.lax.top_k(scores, k)
    w = jax.nn.softmax(vals, axis=1)
    sel = lora_ranks[idx]                                         # (B, k, D)
    out = features + jnp.einsum("bk,bkd->bd", w, sel, precision=hi)
    # top-k stability margin: gap between k-th and (k+1)-th score per row,
    # used to skip rows where tiny fp differences could legitimately flip topk.
    kk = min(k + 1, C)
    v2, _ = jax.lax.top_k(scores, kk)
    if kk > k:
        gap = v2[:, k - 1] - v2[:, kk - 1]
    else:
        gap = jnp.full((scores.shape[0],), jnp.inf, jnp.float32)
    return out, gap


# ---------------------------------------------------------------------------
if __name__ == "__main__":
    key = jax.random.PRNGKey(0)
    kf, kw, kb, kl = jax.random.split(key, 4)

    # Small shapes consistent with the module: features (batch, in_features).
    B, D, C = 256, 512, 10
    features = jax.random.normal(kf, (B, D), jnp.float32)
    bound = 1.0 / math.sqrt(D)                                    # nn.Linear init
    attn_weight = jax.random.uniform(kw, (C, D), jnp.float32, minval=-bound, maxval=bound)
    attn_bias = jax.random.uniform(kb, (C,), jnp.float32, minval=-bound, maxval=bound)
    lora_ranks = jax.random.normal(kl, (C, D), jnp.float32)

    for k in (1, 2):   # k=1 is the module default; k=2 exercises general top-k
        fwd = jax.jit(functools.partial(lora_attention_router, k=k, block_rows=128))
        out = jax.block_until_ready(fwd(features, attn_weight, attn_bias, lora_ranks))

        assert out.shape == (B, D), out.shape
        assert out.dtype == jnp.float32, out.dtype
        assert bool(jnp.all(jnp.isfinite(out)))

        ref, gap = _reference(features, attn_weight, attn_bias, lora_ranks, k)
        stable = gap > 1e-3                 # rows with a clear top-k margin
        row_err = jnp.max(jnp.abs(out - ref), axis=1)
        assert bool(jnp.all(jnp.where(stable, row_err < 1e-3, True))), (
            float(jnp.max(jnp.where(stable, row_err, 0.0))))

    print("KERNEL_OK")
</pallas_src>

<mosaic_0001>
module attributes {stable_mosaic.version = 11 : i64} {
  func.func @_router_kernel(%arg0: i32, %arg1: memref<128x512xf32, #tpu.memory_space<vmem>>, %arg2: memref<512x10xf32, #tpu.memory_space<vmem>>, %arg3: memref<1x10xf32, #tpu.memory_space<vmem>>, %arg4: memref<10x512xf32, #tpu.memory_space<vmem>>, %arg5: memref<128x512xf32, #tpu.memory_space<vmem>>) attributes {dimension_semantics = [#tpu.dimension_semantics<parallel>], iteration_bounds = array<i64: 2>, scalar_prefetch = 0 : i64, scratch_operands = 0 : i64, tpu.core_type = #tpu.core_type<tc>, window_params = [{transform_indices = @transform_0, window_bounds = array<i64: 128, 512>}, {pipeline_mode = #tpu.pipeline_mode<synchronous>, transform_indices = @transform_1, window_bounds = array<i64: 512, 10>}, {pipeline_mode = #tpu.pipeline_mode<synchronous>, transform_indices = @transform_2, window_bounds = array<i64: 1, 10>}, {pipeline_mode = #tpu.pipeline_mode<synchronous>, transform_indices = @transform_3, window_bounds = array<i64: 10, 512>}, {transform_indices = @transform_4, window_bounds = array<i64: 128, 512>}]} {
    %c0 = arith.constant 0 : index
    %c0_0 = arith.constant 0 : index
    %0 = vector.load %arg1[%c0, %c0_0] : memref<128x512xf32, #tpu.memory_space<vmem>>, vector<128x512xf32>
    %c0_1 = arith.constant 0 : index
    %c0_2 = arith.constant 0 : index
    %1 = vector.load %arg2[%c0_1, %c0_2] : memref<512x10xf32, #tpu.memory_space<vmem>>, vector<512x10xf32>
    %cst = arith.constant dense<0.000000e+00> : vector<128x10xf32>
    %2 = tpu.matmul %0, %1, %cst {dimension_numbers = #tpu.dot_dimension_numbers<[1], [0], [0], [1], [0, 0, 1, 1], [], []>} : vector<128x512xf32>, vector<512x10xf32>, vector<128x10xf32> -> vector<128x10xf32>
    %c0_3 = arith.constant 0 : index
    %c0_4 = arith.constant 0 : index
    %3 = vector.load %arg3[%c0_3, %c0_4] : memref<1x10xf32, #tpu.memory_space<vmem>>, vector<1x10xf32>
    %4 = vector.broadcast %3 : vector<1x10xf32> to vector<128x10xf32>
    %5 = arith.addf %2, %4 : vector<128x10xf32>
    %6 = tpu.iota {dimensions = array<i32: 1>} : vector<128x10xi32>
    %cst_5 = arith.constant 0.000000e+00 : f32
    %7 = vector.broadcast %cst_5 : f32 to vector<128x10xf32>
    %cst_6 = arith.constant dense<0xFF800000> : vector<128xf32>
    %8 = vector.multi_reduction <maximumf>, %5, %cst_6 [1] : vector<128x10xf32> to vector<128xf32>
    %9 = vector.shape_cast %8 : vector<128xf32> to vector<128x1xf32>
    %10 = vector.broadcast %9 : vector<128x1xf32> to vector<128x10xf32>
    %11 = arith.cmpf oge, %5, %10 : vector<128x10xf32>
    %c10_i32 = arith.constant 10 : i32
    %12 = vector.broadcast %c10_i32 : i32 to vector<128x10xi32>
    %13 = arith.select %11, %6, %12 : vector<128x10xi1>, vector<128x10xi32>
    %cst_7 = arith.constant dense<2147483647> : vector<128xi32>
    %14 = vector.multi_reduction <minsi>, %13, %cst_7 [1] : vector<128x10xi32> to vector<128xi32>
    %15 = vector.shape_cast %14 : vector<128xi32> to vector<128x1xi32>
    %16 = vector.broadcast %15 : vector<128x1xi32> to vector<128x10xi32>
    %17 = arith.cmpi eq, %6, %16 : vector<128x10xi32>
    %18 = arith.extui %17 : vector<128x10xi1> to vector<128x10xi32>
    %19 = arith.sitofp %18 : vector<128x10xi32> to vector<128x10xf32>
    %20 = arith.addf %7, %19 : vector<128x10xf32>
    %cst_8 = arith.constant dense<0xFF800000> : vector<128xf32>
    %21 = vector.multi_reduction <maximumf>, %5, %cst_8 [1] : vector<128x10xf32> to vector<128xf32>
    %22 = vector.shape_cast %21 : vector<128xf32> to vector<128x1xf32>
    %23 = vector.broadcast %22 : vector<128x1xf32> to vector<128x10xf32>
    %24 = arith.subf %5, %23 : vector<128x10xf32>
    %25 = math.exp %24 : vector<128x10xf32>
    %26 = arith.mulf %25, %20 : vector<128x10xf32>
    %cst_9 = arith.constant dense<0.000000e+00> : vector<128xf32>
    %27 = vector.multi_reduction <add>, %26, %cst_9 [1] : vector<128x10xf32> to vector<128xf32>
    %28 = vector.shape_cast %27 : vector<128xf32> to vector<128x1xf32>
    %29 = vector.broadcast %28 : vector<128x1xf32> to vector<128x10xf32>
    %30 = arith.divf %26, %29 : vector<128x10xf32>
    %31 = vector.extract_strided_slice %30 {offsets = [0, 0], sizes = [128, 1], strides = [1, 1]} : vector<128x10xf32> to vector<128x1xf32>
    %c0_10 = arith.constant 0 : index
    %c0_11 = arith.constant 0 : index
    %32 = vector.load %arg4[%c0_10, %c0_11] : memref<10x512xf32, #tpu.memory_space<vmem>>, vector<1x512xf32>
    %33 = vector.broadcast %31 : vector<128x1xf32> to vector<128x512xf32>
    %34 = vector.broadcast %32 : vector<1x512xf32> to vector<128x512xf32>
    %35 = arith.mulf %33, %34 : vector<128x512xf32>
    %36 = arith.addf %0, %35 : vector<128x512xf32>
    %37 = vector.extract_strided_slice %30 {offsets = [0, 1], sizes = [128, 1], strides = [1, 1]} : vector<128x10xf32> to vector<128x1xf32>
    %c1 = arith.constant 1 : index
    %c0_12 = arith.constant 0 : index
    %38 = vector.load %arg4[%c1, %c0_12] : memref<10x512xf32, #tpu.memory_space<vmem>>, vector<1x512xf32>
    %39 = vector.broadcast %37 : vector<128x1xf32> to vector<128x512xf32>
    %40 = vector.broadcast %38 : vector<1x512xf32> to vector<128x512xf32>
    %41 = arith.mulf %39, %40 : vector<128x512xf32>
    %42 = arith.addf %36, %41 : vector<128x512xf32>
    %43 = vector.extract_strided_slice %30 {offsets = [0, 2], sizes = [128, 1], strides = [1, 1]} : vector<128x10xf32> to vector<128x1xf32>
    %c2 = arith.constant 2 : index
    %c0_13 = arith.constant 0 : index
    %44 = vector.load %arg4[%c2, %c0_13] : memref<10x512xf32, #tpu.memory_space<vmem>>, vector<1x512xf32>
    %45 = vector.broadcast %43 : vector<128x1xf32> to vector<128x512xf32>
    %46 = vector.broadcast %44 : vector<1x512xf32> to vector<128x512xf32>
    %47 = arith.mulf %45, %46 : vector<128x512xf32>
    %48 = arith.addf %42, %47 : vector<128x512xf32>
    %49 = vector.extract_strided_slice %30 {offsets = [0, 3], sizes = [128, 1], strides = [1, 1]} : vector<128x10xf32> to vector<128x1xf32>
    %c3 = arith.constant 3 : index
    %c0_14 = arith.constant 0 : index
    %50 = vector.load %arg4[%c3, %c0_14] : memref<10x512xf32, #tpu.memory_space<vmem>>, vector<1x512xf32>
    %51 = vector.broadcast %49 : vector<128x1xf32> to vector<128x512xf32>
    %52 = vector.broadcast %50 : vector<1x512xf32> to vector<128x512xf32>
    %53 = arith.mulf %51, %52 : vector<128x512xf32>
    %54 = arith.addf %48, %53 : vector<128x512xf32>
    %55 = vector.extract_strided_slice %30 {offsets = [0, 4], sizes = [128, 1], strides = [1, 1]} : vector<128x10xf32> to vector<128x1xf32>
    %c4 = arith.constant 4 : index
    %c0_15 = arith.constant 0 : index
    %56 = vector.load %arg4[%c4, %c0_15] : memref<10x512xf32, #tpu.memory_space<vmem>>, vector<1x512xf32>
    %57 = vector.broadcast %55 : vector<128x1xf32> to vector<128x512xf32>
    %58 = vector.broadcast %56 : vector<1x512xf32> to vector<128x512xf32>
    %59 = arith.mulf %57, %58 : vector<128x512xf32>
    %60 = arith.addf %54, %59 : vector<128x512xf32>
    %61 = vector.extract_strided_slice %30 {offsets = [0, 5], sizes = [128, 1], strides = [1, 1]} : vector<128x10xf32> to vector<128x1xf32>
    %c5 = arith.constant 5 : index
    %c0_16 = arith.constant 0 : index
    %62 = vector.load %arg4[%c5, %c0_16] : memref<10x512xf32, #tpu.memory_space<vmem>>, vector<1x512xf32>
    %63 = vector.broadcast %61 : vector<128x1xf32> to vector<128x512xf32>
    %64 = vector.broadcast %62 : vector<1x512xf32> to vector<128x512xf32>
    %65 = arith.mulf %63, %64 : vector<128x512xf32>
    %66 = arith.addf %60, %65 : vector<128x512xf32>
    %67 = vector.extract_strided_slice %30 {offsets = [0, 6], sizes = [128, 1], strides = [1, 1]} : vector<128x10xf32> to vector<128x1xf32>
    %c6 = arith.constant 6 : index
    %c0_17 = arith.constant 0 : index
    %68 = vector.load %arg4[%c6, %c0_17] : memref<10x512xf32, #tpu.memory_space<vmem>>, vector<1x512xf32>
    %69 = vector.broadcast %67 : vector<128x1xf32> to vector<128x512xf32>
    %70 = vector.broadcast %68 : vector<1x512xf32> to vector<128x512xf32>
    %71 = arith.mulf %69, %70 : vector<128x512xf32>
    %72 = arith.addf %66, %71 : vector<128x512xf32>
    %73 = vector.extract_strided_slice %30 {offsets = [0, 7], sizes = [128, 1], strides = [1, 1]} : vector<128x10xf32> to vector<128x1xf32>
    %c7 = arith.constant 7 : index
    %c0_18 = arith.constant 0 : index
    %74 = vector.load %arg4[%c7, %c0_18] : memref<10x512xf32, #tpu.memory_space<vmem>>, vector<1x512xf32>
    %75 = vector.broadcast %73 : vector<128x1xf32> to vector<128x512xf32>
    %76 = vector.broadcast %74 : vector<1x512xf32> to vector<128x512xf32>
    %77 = arith.mulf %75, %76 : vector<128x512xf32>
    %78 = arith.addf %72, %77 : vector<128x512xf32>
    %79 = vector.extract_strided_slice %30 {offsets = [0, 8], sizes = [128, 1], strides = [1, 1]} : vector<128x10xf32> to vector<128x1xf32>
    %c8 = arith.constant 8 : index
    %c0_19 = arith.constant 0 : index
    %80 = vector.load %arg4[%c8, %c0_19] : memref<10x512xf32, #tpu.memory_space<vmem>>, vector<1x512xf32>
    %81 = vector.broadcast %79 : vector<128x1xf32> to vector<128x512xf32>
    %82 = vector.broadcast %80 : vector<1x512xf32> to vector<128x512xf32>
    %83 = arith.mulf %81, %82 : vector<128x512xf32>
    %84 = arith.addf %78, %83 : vector<128x512xf32>
    %85 = vector.extract_strided_slice %30 {offsets = [0, 9], sizes = [128, 1], strides = [1, 1]} : vector<128x10xf32> to vector<128x1xf32>
    %c9 = arith.constant 9 : index
    %c0_20 = arith.constant 0 : index
    %86 = vector.load %arg4[%c9, %c0_20] : memref<10x512xf32, #tpu.memory_space<vmem>>, vector<1x512xf32>
    %87 = vector.broadcast %85 : vector<128x1xf32> to vector<128x512xf32>
    %88 = vector.broadcast %86 : vector<1x512xf32> to vector<128x512xf32>
    %89 = arith.mulf %87, %88 : vector<128x512xf32>
    %90 = arith.addf %84, %89 : vector<128x512xf32>
    %c0_21 = arith.constant 0 : index
    %c0_22 = arith.constant 0 : index
    %91 = vector.load %arg5[%c0_21, %c0_22] : memref<128x512xf32, #tpu.memory_space<vmem>>, vector<128x512xf32>
    tpu.vector_store %arg5[%c0_21, %c0_22], %90 {strides = array<i32>} : memref<128x512xf32, #tpu.memory_space<vmem>>, vector<128x512xf32>,
    return
  }
  func.func @transform_0(%arg0: i32) -> (i32, i32) {
    %c0_i32 = arith.constant 0 : i32
    %c0_i32_0 = arith.constant 0 : i32
    return %arg0, %c0_i32 : i32, i32
  }
  func.func @transform_1(%arg0: i32) -> (i32, i32) {
    %c0_i32 = arith.constant 0 : i32
    %c0_i32_0 = arith.constant 0 : i32
    %c0_i32_1 = arith.constant 0 : i32
    return %c0_i32, %c0_i32_0 : i32, i32
  }
  func.func @transform_2(%arg0: i32) -> (i32, i32) {
    %c0_i32 = arith.constant 0 : i32
    %c0_i32_0 = arith.constant 0 : i32
    %c0_i32_1 = arith.constant 0 : i32
    return %c0_i32, %c0_i32_0 : i32, i32
  }
  func.func @transform_3(%arg0: i32) -> (i32, i32) {
    %c0_i32 = arith.constant 0 : i32
    %c0_i32_0 = arith.constant 0 : i32
    %c0_i32_1 = arith.constant 0 : i32
    return %c0_i32, %c0_i32_0 : i32, i32
  }
  func.func @transform_4(%arg0: i32) -> (i32, i32) {
    %c0_i32 = arith.constant 0 : i32
    %c0_i32_0 = arith.constant 0 : i32
    return %arg0, %c0_i32 : i32, i32
  }
}

</mosaic_0001>

<bundles_post_ra>
// kernel: lora_attention_router.1
= control target key start
LH: loop header
LB: loop body
LE: loop exit
PB: predicated region body
PF: predicated region fallthrough
CT: control target
= control target key end

     0   :  { %9 = vsyncpa [#allocation3], 0  ;;  %s6755_s0 = inlined_call_operand.hbm [shape: f32[256,512], index: 0, kind: input, shape index: {}]   ;;  %s6756_s1 = inlined_call_operand.vmem [shape: f32[512,10], index: 1, kind: input, shape index: {}]   ;;  %s6757_s2 = inlined_call_operand.vmem [shape: f32[1,10], index: 2, kind: input, shape index: {}]   ;;  %s6758_s3 = inlined_call_operand.vmem [shape: f32[10,512], index: 3, kind: input, shape index: {}]   ;;  %s6759_s4 = inlined_call_operand.hbm [shape: f32[256,512], index: 4, kind: output, shape index: {}]  }
   0x1   :  { %11 = vsyncpa [#allocation3 + $0x1], 0 }
   0x2   :  { %12 = vsyncpa [#allocation4], 0 }
   0x3   :  { %14 = vsyncpa [#allocation4 + $0x1], 0  ;;  %s4183_s15 = smov 0   ;;  %s4185_s16 = smov 0  }
   0x4   :  { %s4187_s17 = smov 0   ;;  %s4189_s18 = smov 0  }
   0x5 LB: > { %s4204_s19 = sadd.s32 4294967295, %s4139_s18   ;;  %s3492_s20 = sadd.s32 4294967294, %s4139_s18   ;;  %s4139_s18 = sphi %s4189_s18, %s7342_s18   ;;  %s4135_s17 = sphi %s4187_s17, %s7341_s17   ;;  %s4131_s16 = sphi %s4185_s16, %s7340_s16   ;;  %s4127_s15 = sphi %s4183_s15, %s7339_s15  }
   0x6   : > { %s4208_s21 = sadd.s32 1, %s4139_s18   ;;  %s27_s22 = sadd.s32 1, %s4135_s17 }
   0x7   : > { %s24_s23 = ssub.s32 %s4139_s18, %s4208_s21  ;;  %p34_p0 = scmp.ne.s32.totalorder %s4135_s17, %s4131_s16 }
   0x8   : > { %p25_p1 = scmp.eq.s32.totalorder %s24_s23, 0  ;;  %p35_p2 = scmp.eq.s32.totalorder %s4139_s18, 0 }
   0x9   : > { %p40_p3 = scmp.ne.s32.totalorder %s4131_s16, %s4127_s15  ;;  %p41_p4 = scmp.eq.s32.totalorder %s4204_s19, 0 }
   0xa   : > { %s4220_s24 = scalar_select %p25_p1, %s4135_s17, %s27_s22  }
   0xb   : > { %p4222_p5 = por %p35_p2, %p34_p0  ;;  %p4226_p6 = por %p41_p4, %p40_p3 }
   0xc   : > { %p127_p7 = scmp.eq.s32.totalorder %s4204_s19, 1  ;;  %p133_p8 = scmp.eq.s32.totalorder %s3492_s20, 1 }
   0xd   : > { %s7000_s26 = scalar_select %p4226_p6, 1, 0 }
   0xe   : > { %p3710_p10 = scmp.lt.s32.totalorder %s4139_s18, 2  ;;  %p4233_p11 = por %p127_p7, %p34_p0 }
   0xf   : > { %p4237_p12 = por %p133_p8, %p40_p3  ;;  %s162_s29 = sand.u32 1, %s4135_s17  }
  0x10   : > { %s7001_s27 = scalar_select %p4233_p11, 1, 0 }
  0x11   : > { %s7002_s28 = scalar_select %p4237_p12, 1, 0 }
  0x12   : > { %s3535_s30 = sshll.u32 %s4139_s18, 13  ;;  %s3495_s5 = sshll.u32 %s162_s29, 9 }
  0x13   : > { %s4246_s8 = scalar_lea.hbm %s6755_s0, %s3535_s30  ;;  %s166_s9 = scalar_lea.vmem [#allocation2], %s3495_s5 }
  0x14   : > { %s174_s10 = sshll.u32 %s166_s9, 4  ;;  %p4250_p13 = pnand %p3710_p10, %p4222_p5  ;;  %s4254_s10 = int_to_ptr.vmem [resolvable:$true] %s174_s10 }
  0x15   : > { %s4256_s12 = scalar_lea.sflag [#allocation3], %s162_s29  ;;  %s4047_s13 = scalar_lea.hbm %s4246_s8, 8192 }
  0x16   : > { %p4048_p0 = scmp.ne.s32.totalorder %s4246_s8, %s4047_s13  ;;  %p4049_p1 = pneg %p4250_p13 }
  0x17   : > { %s4052_s22 = scalar_lea.hbm %s6755_s0, 16384  ;;  %p4053_p4 = scmp.lt.s32.totalorder %s4246_s8, %s6755_s0 }
  0x18   : > { %p4050_p2 = pnand %p4049_p1, %p4048_p0  ;;  %p4054_p5 = scmp.lt.s32.totalorder %s4052_s22, %s4047_s13 }
  0x1a   : > { %p4051_p3 = pneg %p4050_p2  ;;  %p4055_p7 = por %p4054_p5, %p4053_p4 }
  0x1c   : > { %p4056_p8 = pnand %p4055_p7, %p4051_p3 }
  0x1e   : > { %4059 = shalt.err (!%p4056_p8)
}
  0x1f   : > { %s4060_s29 = scalar_lea.vmem %s4254_s10, 8192  ;;  %s4141_s30 = smov [#allocation2]  }
  0x20   : > { %p4061_p10 = scmp.ne.s32.totalorder %s4254_s10, %s4060_s29  ;;  %s4065_s5 = sshll.u32 %s4141_s30, 4  ;;  %s4066_s5 = int_to_ptr.vmem [resolvable:$false] %s4065_s5 }
  0x21   : > { %s4067_s6 = scalar_lea.vmem %s4066_s5, 16384  ;;  %p4068_p2 = scmp.lt.s32.totalorder %s4254_s10, %s4066_s5 }
  0x22   : > { %p4063_p9 = pnand %p4061_p10, %p4049_p1  ;;  %p4069_p12 = scmp.lt.s32.totalorder %s4067_s6, %s4060_s29 }
  0x24   : > { %p4064_p0 = pneg %p4063_p9  ;;  %p4070_p11 = por %p4069_p12, %p4068_p2 }
  0x26   : > { %p4071_p6 = pnand %p4070_p11, %p4064_p0 }
  0x28   : > { %4074 = shalt.err (!%p4071_p6)
}
  0x29   : > { %s4142_s7 = smov 512   ;;  %s4143_s9 = smov 32  }
  0x2a   : > { %3705 = dma.hbm_to_vmem [thread:$0]  (!%p4250_p13), %s4246_s8, 8192, %s4254_s10, %s4256_s12, %s4142_s7, %s4142_s7, %s4143_s9  }
  0x2b   : > { %p3499_p9 = scmp.ge.s32.totalorder %s4139_s18, 1  ;;  %p182_p1 = scmp.lt.s32.totalorder %s4139_s18, 3 }
  0x2d   : > { %p183_p3 = pnand %p3499_p9, %p182_p1 }
  0x2f   : > { %186 = sbr.rel (%p183_p3) target bundleno = 1466 (0x5ba), region = 36 }
  0x34   : > { %s4280_s13 = sand.u32 1, %s4131_s16   ;;  %p7004_p6 = scmp.ne.s32.totalorder %s7000_s26, 0 }
  0x35   : > { %s3500_s14 = sshll.u32 %s4280_s13, 9  ;;  %s189_s20 = scalar_lea.sflag [#allocation3], %s4280_s13 }
  0x36   : > { %s4286_s22 = scalar_lea.vmem [#allocation2], %s3500_s14 }
  0x37   : > { %4118 = dma.done.wait (%p7004_p6), %s189_s20, 8192  }
  0x38   : > { %4120 = vsyncadd (%p7004_p6), %s189_s20, 4294959104  ;;  %v314_v0 = vld [vmem:[%s6756_s1 + $0xf8] sm:$0xff]  ;;  %v313_v4 = vld [vmem:[%s6756_s1 + $0xf0] sm:$0xff]  ;;  %vm646_vm0 = vcmask 80896   ;;  %s5391_s6 = scalar_lea.vmem [#allocation5], %s3500_s14  ;;  %s3537_s14 = sshll.u32 %s4204_s19, 13 }
  0x39   : > { %v346_v1 = vld [vmem:[%s6756_s1 + $0x1f8] sm:$0xff]  ;;  %3538 = vmatprep.subr.mxu0 %v314_v0  ;;  %v345_v5 = vld [vmem:[%s6756_s1 + $0x1f0] sm:$0xff]  ;;  %v312_v8 = vld [vmem:[%s6756_s1 + $0xe8] sm:$0xff]  ;;  %s6706_s9 = scalar_lea.hbm %s6759_s4, %s3537_s14  ;;  %s3405_s20 = scalar_lea.sflag [#allocation4], %s4280_s13 }
  0x3a   : > { %v298_v2 = vld [vmem:[%s6756_s1 + $0x78] sm:$0xff]  ;;  %3618 = vmatprep.subr.mxu1 %v346_v1  ;;  %v297_v6 = vld [vmem:[%s6756_s1 + $0x70] sm:$0xff]  ;;  %v344_v9 = vld [vmem:[%s6756_s1 + $0x1e8] sm:$0xff]  ;;  %p7336_p12 = scmp.ne.s32.totalorder %s7001_s27, 0  ;;  %s4155_s10 = smov [#allocation5]  }
  0x3b   : > { %v330_v3 = vld [vmem:[%s6756_s1 + $0x178] sm:$0xff]  ;;  %3539 = vmatpush3.msra.mxu0 %v298_v2  ;;  %v329_v7 = vld [vmem:[%s6756_s1 + $0x170] sm:$0xff]  ;;  %v296_v10 = vld [vmem:[%s6756_s1 + $0x68] sm:$0xff]  ;;  %s4079_s11 = sshll.u32 %s4155_s10, 4  ;;  %s4080_s11 = int_to_ptr.vmem [resolvable:$false] %s4079_s11 }
  0x3c   : > { %3619 = vmatpush3.msra.mxu1 %v330_v3  ;;  %3540 = vmatprep.subr.mxu0 %v313_v4  ;;  %v328_v11 = vld [vmem:[%s6756_s1 + $0x168] sm:$0xff]  ;;  %v311_v12 = vld [vmem:[%s6756_s1 + $0xe0] sm:$0xff]  ;;  %v310_v16 = vld [vmem:[%s6756_s1 + $0xd8] sm:$0xff]  ;;  %s4081_s12 = scalar_lea.vmem %s4080_s11, 16384 }
  0x3d   : > { %3620 = vmatprep.subr.mxu1 %v345_v5  ;;  %3541 = vmatpush3.msra.mxu0 %v297_v6  ;;  %v343_v13 = vld [vmem:[%s6756_s1 + $0x1e0] sm:$0xff]  ;;  %v342_v17 = vld [vmem:[%s6756_s1 + $0x1d8] sm:$0xff]  ;;  %v309_v20 = vld [vmem:[%s6756_s1 + $0xd0] sm:$0xff] }
  0x3e   : > { %3621 = vmatpush3.msra.mxu1 %v329_v7  ;;  %3542 = vmatprep.subr.mxu0 %v312_v8  ;;  %v295_v14 = vld [vmem:[%s6756_s1 + $0x60] sm:$0xff]  ;;  %v294_v18 = vld [vmem:[%s6756_s1 + $0x58] sm:$0xff]  ;;  %v341_v21 = vld [vmem:[%s6756_s1 + $0x1d0] sm:$0xff] }
  0x3f   : > { %3622 = vmatprep.subr.mxu1 %v344_v9  ;;  %v327_v15 = vld [vmem:[%s6756_s1 + $0x160] sm:$0xff]  ;;  %3543 = vmatpush3.msra.mxu0 %v296_v10  ;;  %v326_v19 = vld [vmem:[%s6756_s1 + $0x158] sm:$0xff]  ;;  %v293_v22 = vld [vmem:[%s6756_s1 + $0x50] sm:$0xff] }
  0x40   : > { %3623 = vmatpush3.msra.mxu1 %v328_v11  ;;  %3544 = vmatprep.subr.mxu0 %v311_v12  ;;  %v325_v23 = vld [vmem:[%s6756_s1 + $0x150] sm:$0xff]  ;;  %v308_v24 = vld [vmem:[%s6756_s1 + $0xc8] sm:$0xff]  ;;  %v307_v28 = vld [vmem:[%s6756_s1 + $0xc0] sm:$0xff] }
  0x41   : > { %3624 = vmatprep.subr.mxu1 %v343_v13  ;;  %3545 = vmatpush3.msra.mxu0 %v295_v14  ;;  %v340_v25 = vld [vmem:[%s6756_s1 + $0x1c8] sm:$0xff]  ;;  %v339_v29 = vld [vmem:[%s6756_s1 + $0x1c0] sm:$0xff]  ;;  %v306_v32 = vld [vmem:[%s6756_s1 + $0xb8] sm:$0xff] }
  0x42   : > { %3625 = vmatpush3.msra.mxu1 %v327_v15  ;;  %3546 = vmatprep.subr.mxu0 %v310_v16  ;;  %v292_v26 = vld [vmem:[%s6756_s1 + $0x48] sm:$0xff]  ;;  %v291_v30 = vld [vmem:[%s6756_s1 + $0x40] sm:$0xff]  ;;  %v338_v33 = vld [vmem:[%s6756_s1 + $0x1b8] sm:$0xff] }
  0x43   : > { %3626 = vmatprep.subr.mxu1 %v342_v17  ;;  %3547 = vmatpush3.msra.mxu0 %v294_v18  ;;  %v324_v27 = vld [vmem:[%s6756_s1 + $0x148] sm:$0xff]  ;;  %v323_v31 = vld [vmem:[%s6756_s1 + $0x140] sm:$0xff]  ;;  %v290_v34 = vld [vmem:[%s6756_s1 + $0x38] sm:$0xff] }
  0x44   : > { %3627 = vmatpush3.msra.mxu1 %v326_v19  ;;  %3548 = vmatprep.subr.mxu0 %v309_v20  ;;  %v322_v35 = vld [vmem:[%s6756_s1 + $0x138] sm:$0xff]  ;;  %v305_v36 = vld [vmem:[%s6756_s1 + $0xb0] sm:$0xff]  ;;  %v304_v40 = vld [vmem:[%s6756_s1 + $0xa8] sm:$0xff] }
  0x45   : > { %3628 = vmatprep.subr.mxu1 %v341_v21  ;;  %3549 = vmatpush3.msra.mxu0 %v293_v22  ;;  %v337_v37 = vld [vmem:[%s6756_s1 + $0x1b0] sm:$0xff]  ;;  %v336_v41 = vld [vmem:[%s6756_s1 + $0x1a8] sm:$0xff]  ;;  %v303_v44 = vld [vmem:[%s6756_s1 + $0xa0] sm:$0xff] }
  0x46   : > { %3629 = vmatpush3.msra.mxu1 %v325_v23  ;;  %3550 = vmatprep.subr.mxu0 %v308_v24  ;;  %v289_v38 = vld [vmem:[%s6756_s1 + $0x30] sm:$0xff]  ;;  %v288_v42 = vld [vmem:[%s6756_s1 + $0x28] sm:$0xff]  ;;  %v335_v45 = vld [vmem:[%s6756_s1 + $0x1a0] sm:$0xff] }
  0x47   : > { %3630 = vmatprep.subr.mxu1 %v340_v25  ;;  %3551 = vmatpush3.msra.mxu0 %v292_v26  ;;  %v321_v39 = vld [vmem:[%s6756_s1 + $0x130] sm:$0xff]  ;;  %v320_v43 = vld [vmem:[%s6756_s1 + $0x128] sm:$0xff]  ;;  %v287_v46 = vld [vmem:[%s6756_s1 + $0x20] sm:$0xff] }
  0x48   : > { %3631 = vmatpush3.msra.mxu1 %v324_v27  ;;  %3552 = vmatprep.subr.mxu0 %v307_v28  ;;  %v319_v47 = vld [vmem:[%s6756_s1 + $0x120] sm:$0xff]  ;;  %v302_v48 = vld [vmem:[%s6756_s1 + $0x98] sm:$0xff]  ;;  %v301_v52 = vld [vmem:[%s6756_s1 + $0x90] sm:$0xff] }
  0x49   : > { %3632 = vmatprep.subr.mxu1 %v339_v29  ;;  %3553 = vmatpush3.msra.mxu0 %v291_v30  ;;  %v334_v49 = vld [vmem:[%s6756_s1 + $0x198] sm:$0xff]  ;;  %v333_v53 = vld [vmem:[%s6756_s1 + $0x190] sm:$0xff]  ;;  %v300_v56 = vld [vmem:[%s6756_s1 + $0x88] sm:$0xff] }
  0x4a   : > { %3633 = vmatpush3.msra.mxu1 %v323_v31  ;;  %3554 = vmatprep.subr.mxu0 %v306_v32  ;;  %v286_v50 = vld [vmem:[%s6756_s1 + $0x18] sm:$0xff]  ;;  %v285_v54 = vld [vmem:[%s6756_s1 + $0x10] sm:$0xff]  ;;  %v332_v57 = vld [vmem:[%s6756_s1 + $0x188] sm:$0xff] }
  0x4b   : > { %3634 = vmatprep.subr.mxu1 %v338_v33  ;;  %3555 = vmatpush3.msra.mxu0 %v290_v34  ;;  %v318_v51 = vld [vmem:[%s6756_s1 + $0x118] sm:$0xff]  ;;  %v317_v55 = vld [vmem:[%s6756_s1 + $0x110] sm:$0xff]  ;;  %v284_v58 = vld [vmem:[%s6756_s1 + $0x8] sm:$0xff] }
  0x4c   : > { %3635 = vmatpush3.msra.mxu1 %v322_v35  ;;  %3556 = vmatprep.subr.mxu0 %v305_v36  ;;  %v316_v59 = vld [vmem:[%s6756_s1 + $0x108] sm:$0xff]  ;;  %v299_v60 = vld [vmem:[%s6756_s1 + $0x80] sm:$0xff]  ;;  %v222_v1 = vld [vmem:[%s4286_s22 + $0x18] sm:$0xff] }
  0x4d   : > { %3636 = vmatprep.subr.mxu1 %v337_v37  ;;  %3557 = vmatpush3.msra.mxu0 %v289_v38  ;;  %v331_v61 = vld [vmem:[%s6756_s1 + $0x180] sm:$0xff]  ;;  %v220_v63 = vld [vmem:[%s4286_s22 + $0x8] sm:$0xff]  ;;  %v221_v3 = vld [vmem:[%s4286_s22 + $0x10] sm:$0xff] }
  0x4e   : > { %3637 = vmatpush3.msra.mxu1 %v321_v39  ;;  %3558 = vmatprep.subr.mxu0 %v304_v40  ;;  %v283_v62 = vld [vmem:[%s6756_s1] sm:$0xff]  ;;  %v224_v4 = vld [vmem:[%s4286_s22 + $0x28] sm:$0xff]  ;;  %v226_v5 = vld [vmem:[%s4286_s22 + $0x38] sm:$0xff] }
  0x4f   : > { %3638 = vmatprep.subr.mxu1 %v336_v41  ;;  %3559 = vmatpush3.msra.mxu0 %v288_v42  ;;  %v315_v0 = vld [vmem:[%s6756_s1 + $0x100] sm:$0xff]  ;;  %v225_v7 = vld [vmem:[%s4286_s22 + $0x30] sm:$0xff]  ;;  %v228_v8 = vld [vmem:[%s4286_s22 + $0x48] sm:$0xff] }
  0x50   : > { %3639 = vmatpush3.msra.mxu1 %v320_v43  ;;  %3560 = vmatprep.subr.mxu0 %v303_v44  ;;  %v219_v2 = vld [vmem:[%s4286_s22] sm:$0xff]  ;;  %v230_v9 = vld [vmem:[%s4286_s22 + $0x58] sm:$0xff]  ;;  %v229_v11 = vld [vmem:[%s4286_s22 + $0x50] sm:$0xff] }
  0x51   : > { %3640 = vmatprep.subr.mxu1 %v335_v45  ;;  %3561 = vmatpush3.msra.mxu0 %v287_v46  ;;  %v223_v6 = vld [vmem:[%s4286_s22 + $0x20] sm:$0xff]  ;;  %v232_v12 = vld [vmem:[%s4286_s22 + $0x68] sm:$0xff]  ;;  %v234_v13 = vld [vmem:[%s4286_s22 + $0x78] sm:$0xff] }
  0x52   : > { %3641 = vmatpush3.msra.mxu1 %v319_v47  ;;  %3562 = vmatprep.subr.mxu0 %v302_v48  ;;  %v227_v10 = vld [vmem:[%s4286_s22 + $0x40] sm:$0xff]  ;;  %v233_v15 = vld [vmem:[%s4286_s22 + $0x70] sm:$0xff]  ;;  %v236_v16 = vld [vmem:[%s4286_s22 + $0x88] sm:$0xff] }
  0x53   : > { %3642 = vmatprep.subr.mxu1 %v334_v49  ;;  %3563 = vmatpush3.msra.mxu0 %v286_v50  ;;  %v231_v14 = vld [vmem:[%s4286_s22 + $0x60] sm:$0xff]  ;;  %v238_v17 = vld [vmem:[%s4286_s22 + $0x98] sm:$0xff]  ;;  %v237_v19 = vld [vmem:[%s4286_s22 + $0x90] sm:$0xff] }
  0x54   : > { %3643 = vmatpush3.msra.mxu1 %v318_v51  ;;  %3564 = vmatprep.subr.mxu0 %v301_v52  ;;  %v235_v18 = vld [vmem:[%s4286_s22 + $0x80] sm:$0xff]  ;;  %v240_v20 = vld [vmem:[%s4286_s22 + $0xa8] sm:$0xff]  ;;  %v242_v21 = vld [vmem:[%s4286_s22 + $0xb8] sm:$0xff] }
  0x55   : > { %3644 = vmatprep.subr.mxu1 %v333_v53  ;;  %3565 = vmatpush3.msra.mxu0 %v285_v54  ;;  %v239_v22 = vld [vmem:[%s4286_s22 + $0xa0] sm:$0xff]  ;;  %v241_v23 = vld [vmem:[%s4286_s22 + $0xb0] sm:$0xff]  ;;  %v244_v24 = vld [vmem:[%s4286_s22 + $0xc8] sm:$0xff] }
  0x56   : > { %3645 = vmatpush3.msra.mxu1 %v317_v55  ;;  %3566 = vmatprep.subr.mxu0 %v300_v56  ;;  %v246_v25 = vld [vmem:[%s4286_s22 + $0xd8] sm:$0xff]  ;;  %v243_v26 = vld [vmem:[%s4286_s22 + $0xc0] sm:$0xff]  ;;  %v245_v27 = vld [vmem:[%s4286_s22 + $0xd0] sm:$0xff] }
  0x57   : > { %3646 = vmatprep.subr.mxu1 %v332_v57  ;;  %3567 = vmatpush3.msra.mxu0 %v284_v58  ;;  %v248_v28 = vld [vmem:[%s4286_s22 + $0xe8] sm:$0xff]  ;;  %v250_v29 = vld [vmem:[%s4286_s22 + $0xf8] sm:$0xff]  ;;  %v247_v30 = vld [vmem:[%s4286_s22 + $0xe0] sm:$0xff] }
  0x58   : > { %3647 = vmatpush3.msra.mxu1 %v316_v59  ;;  %3568 = vmatprep.subr.mxu0 %v299_v60  ;;  %v249_v31 = vld [vmem:[%s4286_s22 + $0xf0] sm:$0xff]  ;;  %v252_v32 = vld [vmem:[%s4286_s22 + $0x108] sm:$0xff]  ;;  %v254_v33 = vld [vmem:[%s4286_s22 + $0x118] sm:$0xff] }
  0x59   : > { %3648 = vmatprep.subr.mxu1 %v331_v61  ;;  %3569 = vmatpush3.msra.mxu0 %v283_v62  ;;  %v251_v34 = vld [vmem:[%s4286_s22 + $0x100] sm:$0xff]  ;;  %v253_v35 = vld [vmem:[%s4286_s22 + $0x110] sm:$0xff]  ;;  %v256_v36 = vld [vmem:[%s4286_s22 + $0x128] sm:$0xff] }
  0x5a   : > { %418 = vmatprep.mubr.f32.mxu0 %v220_v63  ;;  %3649 = vmatpush3.msra.mxu1 %v315_v0  ;;  %v258_v37 = vld [vmem:[%s4286_s22 + $0x138] sm:$0xff]  ;;  %v255_v38 = vld [vmem:[%s4286_s22 + $0x120] sm:$0xff]  ;;  %v257_v39 = vld [vmem:[%s4286_s22 + $0x130] sm:$0xff] }
  0x5b   : > { %563 = vmatprep.mubr.f32.mxu1 %v222_v1  ;;  %419 = vmatmul.mubr.f32.vlgmr.msra.gmra.mxu0 %v219_v2  ;;  %v260_v40 = vld [vmem:[%s4286_s22 + $0x148] sm:$0xff]  ;;  %v262_v41 = vld [vmem:[%s4286_s22 + $0x158] sm:$0xff]  ;;  %v259_v42 = vld [vmem:[%s4286_s22 + $0x140] sm:$0xff] }
  0x5c   : > { %564 = vmatmul.mubr.f32.vlgmr.msra.gmra.mxu1 %v221_v3  ;;  %423 = vmatprep.mubr.f32.mxu0 %v224_v4  ;;  %v261_v43 = vld [vmem:[%s4286_s22 + $0x150] sm:$0xff]  ;;  %v264_v44 = vld [vmem:[%s4286_s22 + $0x168] sm:$0xff]  ;;  %v266_v45 = vld [vmem:[%s4286_s22 + $0x178] sm:$0xff] }
  0x5d   : > { %568 = vmatprep.mubr.f32.mxu1 %v226_v5  ;;  %v263_v46 = vld [vmem:[%s4286_s22 + $0x160] sm:$0xff]  ;;  %v265_v47 = vld [vmem:[%s4286_s22 + $0x170] sm:$0xff]  ;;  %v268_v48 = vld [vmem:[%s4286_s22 + $0x188] sm:$0xff] }
  0x5e   : > { %v270_v49 = vld [vmem:[%s4286_s22 + $0x198] sm:$0xff]  ;;  %v267_v50 = vld [vmem:[%s4286_s22 + $0x180] sm:$0xff]  ;;  %v269_v51 = vld [vmem:[%s4286_s22 + $0x190] sm:$0xff] }
  0x5f   : > { %424 = vmatmul.mubr.f32.gmra.mxu0 %v223_v6  ;;  %v272_v52 = vld [vmem:[%s4286_s22 + $0x1a8] sm:$0xff]  ;;  %v274_v53 = vld [vmem:[%s4286_s22 + $0x1b8] sm:$0xff]  ;;  %v271_v54 = vld [vmem:[%s4286_s22 + $0x1a0] sm:$0xff] }
  0x60   : > { %569 = vmatmul.mubr.f32.gmra.mxu1 %v225_v7  ;;  %428 = vmatprep.mubr.f32.mxu0 %v228_v8  ;;  %v273_v55 = vld [vmem:[%s4286_s22 + $0x1b0] sm:$0xff]  ;;  %v276_v56 = vld [vmem:[%s4286_s22 + $0x1c8] sm:$0xff]  ;;  %v278_v57 = vld [vmem:[%s4286_s22 + $0x1d8] sm:$0xff] }
  0x61   : > { %573 = vmatprep.mubr.f32.mxu1 %v230_v9  ;;  %v275_v58 = vld [vmem:[%s4286_s22 + $0x1c0] sm:$0xff]  ;;  %v277_v59 = vld [vmem:[%s4286_s22 + $0x1d0] sm:$0xff]  ;;  %v280_v60 = vld [vmem:[%s4286_s22 + $0x1e8] sm:$0xff] }
  0x62   : > { %v282_v61 = vld [vmem:[%s4286_s22 + $0x1f8] sm:$0xff]  ;;  %v279_v62 = vld [vmem:[%s4286_s22 + $0x1e0] sm:$0xff]  ;;  %v281_v63 = vld [vmem:[%s4286_s22 + $0x1f0] sm:$0xff] }
  0x63   : > { %429 = vmatmul.mubr.f32.gmra.mxu0 %v227_v10  ;;  %v4551_v2 = vld [vmem:[%s6757_s2] ss:$0 sm:$0xff] }
  0x64   : > { %574 = vmatmul.mubr.f32.gmra.mxu1 %v229_v11  ;;  %433 = vmatprep.mubr.f32.mxu0 %v232_v12 }
  0x65   : > { %578 = vmatprep.mubr.f32.mxu1 %v234_v13 }
  0x67   : > { %434 = vmatmul.mubr.f32.gmra.mxu0 %v231_v14 }
  0x68   : > { %579 = vmatmul.mubr.f32.gmra.mxu1 %v233_v15  ;;  %438 = vmatprep.mubr.f32.mxu0 %v236_v16 }
  0x69   : > { %583 = vmatprep.mubr.f32.mxu1 %v238_v17 }
  0x6b   : > { %439 = vmatmul.mubr.f32.gmra.mxu0 %v235_v18 }
  0x6c   : > { %584 = vmatmul.mubr.f32.gmra.mxu1 %v237_v19  ;;  %443 = vmatprep.mubr.f32.mxu0 %v240_v20 }
  0x6d   : > { %588 = vmatprep.mubr.f32.mxu1 %v242_v21 }
  0x6f   : > { %444 = vmatmul.mubr.f32.gmra.mxu0 %v239_v22 }
  0x70   : > { %589 = vmatmul.mubr.f32.gmra.mxu1 %v241_v23  ;;  %448 = vmatprep.mubr.f32.mxu0 %v244_v24 }
  0x71   : > { %593 = vmatprep.mubr.f32.mxu1 %v246_v25 }
  0x73   : > { %449 = vmatmul.mubr.f32.gmra.mxu0 %v243_v26 }
  0x74   : > { %594 = vmatmul.mubr.f32.gmra.mxu1 %v245_v27  ;;  %453 = vmatprep.mubr.f32.mxu0 %v248_v28 }
  0x75   : > { %598 = vmatprep.mubr.f32.mxu1 %v250_v29 }
  0x77   : > { %454 = vmatmul.mubr.f32.gmra.mxu0 %v247_v30 }
  0x78   : > { %599 = vmatmul.mubr.f32.gmra.mxu1 %v249_v31  ;;  %458 = vmatprep.mubr.f32.mxu0 %v252_v32 }
  0x79   : > { %603 = vmatprep.mubr.f32.mxu1 %v254_v33 }
  0x7b   : > { %459 = vmatmul.mubr.f32.gmra.mxu0 %v251_v34 }
  0x7c   : > { %604 = vmatmul.mubr.f32.gmra.mxu1 %v253_v35  ;;  %463 = vmatprep.mubr.f32.mxu0 %v256_v36 }
  0x7d   : > { %608 = vmatprep.mubr.f32.mxu1 %v258_v37 }
  0x7f   : > { %464 = vmatmul.mubr.f32.gmra.mxu0 %v255_v38 }
  0x80   : > { %609 = vmatmul.mubr.f32.gmra.mxu1 %v257_v39  ;;  %468 = vmatprep.mubr.f32.mxu0 %v260_v40 }
  0x81   : > { %613 = vmatprep.mubr.f32.mxu1 %v262_v41 }
  0x83   : > { %469 = vmatmul.mubr.f32.gmra.mxu0 %v259_v42 }
  0x84   : > { %614 = vmatmul.mubr.f32.gmra.mxu1 %v261_v43  ;;  %473 = vmatprep.mubr.f32.mxu0 %v264_v44 }
  0x85   : > { %618 = vmatprep.mubr.f32.mxu1 %v266_v45 }
  0x87   : > { %474 = vmatmul.mubr.f32.gmra.mxu0 %v263_v46 }
  0x88   : > { %619 = vmatmul.mubr.f32.gmra.mxu1 %v265_v47  ;;  %478 = vmatprep.mubr.f32.mxu0 %v268_v48 }
  0x89   : > { %623 = vmatprep.mubr.f32.mxu1 %v270_v49 }
  0x8b   : > { %479 = vmatmul.mubr.f32.gmra.mxu0 %v267_v50 }
  0x8c   : > { %624 = vmatmul.mubr.f32.gmra.mxu1 %v269_v51  ;;  %483 = vmatprep.mubr.f32.mxu0 %v272_v52 }
  0x8d   : > { %628 = vmatprep.mubr.f32.mxu1 %v274_v53 }
  0x8f   : > { %484 = vmatmul.mubr.f32.gmra.mxu0 %v271_v54 }
  0x90   : > { %629 = vmatmul.mubr.f32.gmra.mxu1 %v273_v55  ;;  %488 = vmatprep.mubr.f32.mxu0 %v276_v56 }
  0x91   : > { %633 = vmatprep.mubr.f32.mxu1 %v278_v57 }
  0x93   : > { %489 = vmatmul.mubr.f32.gmra.mxu0 %v275_v58 }
  0x94   : > { %634 = vmatmul.mubr.f32.gmra.mxu1 %v277_v59  ;;  %493 = vmatprep.mubr.f32.mxu0 %v280_v60 }
  0x95   : > { %638 = vmatprep.mubr.f32.mxu1 %v282_v61 }
  0x97   : > { %494 = vmatmul.mubr.f32.gmra.mxu0 %v279_v62 }
  0x98   : > { %639 = vmatmul.mubr.f32.gmra.mxu1 %v281_v63 }
 0x11b   : > { %v3570_v0 = vpop.f32.mrf.mxu0 }
 0x11c   : > { %v3650_v1 = vpop.f32.mrf.mxu1 }
 0x11d   : > { %v3571_v3 = vpop.f32.mrf.mxu0 }
 0x11e   : > { %v3651_v4 = vpop.f32.mrf.mxu1  ;;  %v3572_v5 = vadd.f32 %v3571_v3, %v3570_v0 }
 0x11f   : > { %v3573_v6 = vpop.f32.mrf.mxu0  ;;  %v3652_v9 = vadd.f32 %v3651_v4, %v3650_v1 }
 0x120   : > { %v3653_v7 = vpop.f32.mrf.mxu1  ;;  %v421_v8 = vadd.f32 %v3572_v5, %v4551_v2 }
 0x121   : > { %v3574_v10 = vpop.f32.mrf.mxu0 }
 0x122   : > { %v3654_v11 = vpop.f32.mrf.mxu1  ;;  %v4554_v12 = vadd.f32 %v3652_v9, %v421_v8  ;;  %v3575_v13 = vadd.f32 %v3574_v10, %v3573_v6 }
 0x123   : > { %v3655_v14 = vadd.f32 %v3654_v11, %v3653_v7  ;;  %v3576_v15 = vpop.f32.mrf.mxu0 }
 0x124   : > { %v3656_v16 = vpop.f32.mrf.mxu1  ;;  %v426_v17 = vadd.f32 %v3575_v13, %v4551_v2  ;;  %v647_v18 = vsel %vm646_vm0, %v4554_v12, -inf }
 0x125   : > { %v3577_v19 = vpop.f32.mrf.mxu0  ;;  %648 = vmax.xlane.f32.xlu0 %v647_v18 }
 0x126   : > { %v3657_v20 = vpop.f32.mrf.mxu1  ;;  %v4559_v21 = vadd.f32 %v3655_v14, %v426_v17  ;;  %v3578_v22 = vadd.f32 %v3577_v19, %v3576_v15 }
 0x127   : > { %v3658_v23 = vadd.f32 %v3657_v20, %v3656_v16  ;;  %v3579_v24 = vpop.f32.mrf.mxu0 }
 0x128   : > { %v3659_v25 = vpop.f32.mrf.mxu1  ;;  %v431_v26 = vadd.f32 %v3578_v22, %v4551_v2  ;;  %v650_v27 = vsel %vm646_vm0, %v4559_v21, -inf }
 0x129   : > { %v3580_v28 = vpop.f32.mrf.mxu0  ;;  %651 = vmax.xlane.f32.xlu0 %v650_v27 }
 0x12a   : > { %v3660_v29 = vpop.f32.mrf.mxu1  ;;  %v4564_v30 = vadd.f32 %v3658_v23, %v431_v26  ;;  %v3581_v31 = vadd.f32 %v3580_v28, %v3579_v24 }
 0x12b   : > { %v3661_v32 = vadd.f32 %v3660_v29, %v3659_v25  ;;  %v3582_v33 = vpop.f32.mrf.mxu0 }
 0x12c   : > { %v3662_v34 = vpop.f32.mrf.mxu1  ;;  %v436_v35 = vadd.f32 %v3581_v31, %v4551_v2  ;;  %v653_v36 = vsel %vm646_vm0, %v4564_v30, -inf }
 0x12d   : > { %v3583_v37 = vpop.f32.mrf.mxu0  ;;  %654 = vmax.xlane.f32.xlu1 %v653_v36 }
 0x12e   : > { %v3663_v38 = vpop.f32.mrf.mxu1  ;;  %v4569_v39 = vadd.f32 %v3661_v32, %v436_v35  ;;  %v3584_v40 = vadd.f32 %v3583_v37, %v3582_v33 }
 0x12f   : > { %v3664_v41 = vadd.f32 %v3663_v38, %v3662_v34  ;;  %v3585_v42 = vpop.f32.mrf.mxu0 }
 0x130   : > { %v3665_v43 = vpop.f32.mrf.mxu1  ;;  %v441_v44 = vadd.f32 %v3584_v40, %v4551_v2  ;;  %v656_v45 = vsel %vm646_vm0, %v4569_v39, -inf }
 0x131   : > { %v3586_v46 = vpop.f32.mrf.mxu0  ;;  %657 = vmax.xlane.f32.xlu1 %v656_v45 }
 0x132   : > { %v3666_v47 = vpop.f32.mrf.mxu1  ;;  %v4574_v48 = vadd.f32 %v3664_v41, %v441_v44  ;;  %v3587_v49 = vadd.f32 %v3586_v46, %v3585_v42 }
 0x133   : > { %v3667_v50 = vadd.f32 %v3666_v47, %v3665_v43  ;;  %v3588_v51 = vpop.f32.mrf.mxu0 }
 0x134   : > { %v3668_v52 = vpop.f32.mrf.mxu1  ;;  %v446_v53 = vadd.f32 %v3587_v49, %v4551_v2  ;;  %v659_v54 = vsel %vm646_vm0, %v4574_v48, -inf }
 0x135   : > { %v3589_v55 = vpop.f32.mrf.mxu0  ;;  %660 = vmax.xlane.f32.xlu0 %v659_v54 }
 0x136   : > { %v3669_v56 = vpop.f32.mrf.mxu1  ;;  %v4579_v57 = vadd.f32 %v3667_v50, %v446_v53  ;;  %v3590_v58 = vadd.f32 %v3589_v55, %v3588_v51 }
 0x137   : > { %v3670_v59 = vadd.f32 %v3669_v56, %v3668_v52  ;;  %v3591_v60 = vpop.f32.mrf.mxu0 }
 0x138   : > { %v3671_v61 = vpop.f32.mrf.mxu1  ;;  %v451_v62 = vadd.f32 %v3590_v58, %v4551_v2  ;;  %v662_v63 = vsel %vm646_vm0, %v4579_v57, -inf }
 0x139   : > { %v3592_v0 = vpop.f32.mrf.mxu0  ;;  %663 = vmax.xlane.f32.xlu1 %v662_v63 }
 0x13a   : > { %v3672_v1 = vpop.f32.mrf.mxu1  ;;  %v4584_v3 = vadd.f32 %v3670_v59, %v451_v62  ;;  %v3593_v4 = vadd.f32 %v3592_v0, %v3591_v60 }
 0x13b   : > { %v3673_v5 = vadd.f32 %v3672_v1, %v3671_v61  ;;  %v3594_v6 = vpop.f32.mrf.mxu0 }
 0x13c   : > { %v3674_v7 = vpop.f32.mrf.mxu1  ;;  %v456_v8 = vadd.f32 %v3593_v4, %v4551_v2  ;;  %v665_v9 = vsel %vm646_vm0, %v4584_v3, -inf }
 0x13d   : > { %v3595_v10 = vpop.f32.mrf.mxu0  ;;  %666 = vmax.xlane.f32.xlu0 %v665_v9 }
 0x13e   : > { %v3675_v11 = vpop.f32.mrf.mxu1  ;;  %v4589_v13 = vadd.f32 %v3673_v5, %v456_v8  ;;  %v3596_v14 = vadd.f32 %v3595_v10, %v3594_v6 }
 0x13f   : > { %v3676_v15 = vadd.f32 %v3675_v11, %v3674_v7  ;;  %v3597_v16 = vpop.f32.mrf.mxu0 }
 0x140   : > { %v3677_v17 = vpop.f32.mrf.mxu1  ;;  %v461_v18 = vadd.f32 %v3596_v14, %v4551_v2  ;;  %v668_v19 = vsel %vm646_vm0, %v4589_v13, -inf }
 0x141   : > { %v3598_v20 = vpop.f32.mrf.mxu0  ;;  %669 = vmax.xlane.f32.xlu1 %v668_v19 }
 0x142   : > { %v3678_v22 = vpop.f32.mrf.mxu1  ;;  %v4594_v23 = vadd.f32 %v3676_v15, %v461_v18  ;;  %v3599_v24 = vadd.f32 %v3598_v20, %v3597_v16 }
 0x143   : > { %v3679_v25 = vadd.f32 %v3678_v22, %v3677_v17  ;;  %v3600_v26 = vpop.f32.mrf.mxu0 }
 0x144   : > { %v3680_v27 = vpop.f32.mrf.mxu1  ;;  %v466_v28 = vadd.f32 %v3599_v24, %v4551_v2  ;;  %v671_v29 = vsel %vm646_vm0, %v4594_v23, -inf }
 0x145   : > { %v3601_v31 = vpop.f32.mrf.mxu0  ;;  %672 = vmax.xlane.f32.xlu0 %v671_v29 }
 0x146   : > { %v3681_v32 = vpop.f32.mrf.mxu1  ;;  %v4599_v33 = vadd.f32 %v3679_v25, %v466_v28  ;;  %v3602_v34 = vadd.f32 %v3601_v31, %v3600_v26  ;;  %v6762_v31 = vlaneseq }
 0x147   : > { %v3682_v35 = vadd.f32 %v3681_v32, %v3680_v27  ;;  %v3603_v36 = vpop.f32.mrf.mxu0 }
 0x148   : > { %v3683_v37 = vpop.f32.mrf.mxu1  ;;  %v471_v38 = vadd.f32 %v3602_v34, %v4551_v2  ;;  %v674_v40 = vsel %vm646_vm0, %v4599_v33, -inf  ;;  %v4634_v32 = vand.u32 127, %v6762_v31 }
 0x149   : > { %v3604_v41 = vpop.f32.mrf.mxu0  ;;  %675 = vmax.xlane.f32.xlu1 %v674_v40 }
 0x14a   : > { %v3684_v42 = vpop.f32.mrf.mxu1  ;;  %v4604_v43 = vadd.f32 %v3682_v35, %v471_v38  ;;  %v3605_v44 = vadd.f32 %v3604_v41, %v3603_v36 }
 0x14b   : > { %v3685_v45 = vadd.f32 %v3684_v42, %v3683_v37  ;;  %v3606_v46 = vpop.f32.mrf.mxu0 }
 0x14c   : > { %v3686_v47 = vpop.f32.mrf.mxu1  ;;  %v476_v49 = vadd.f32 %v3605_v44, %v4551_v2  ;;  %v677_v50 = vsel %vm646_vm0, %v4604_v43, -inf }
 0x14d   : > { %v3607_v51 = vpop.f32.mrf.mxu0  ;;  %678 = vmax.xlane.f32.xlu0 %v677_v50 }
 0x14e   : > { %v3687_v52 = vpop.f32.mrf.mxu1  ;;  %v4609_v53 = vadd.f32 %v3685_v45, %v476_v49  ;;  %v3608_v54 = vadd.f32 %v3607_v51, %v3606_v46 }
 0x14f   : > { %v3688_v55 = vadd.f32 %v3687_v52, %v3686_v47  ;;  %v3609_v56 = vpop.f32.mrf.mxu0 }
 0x150   : > { %7005 = vst [vmem:[#allocation8_spill] sm:$0xff] %v4609_v53  ;;  %v3689_v58 = vpop.f32.mrf.mxu1  ;;  %v481_v59 = vadd.f32 %v3608_v54, %v4551_v2  ;;  %v680_v60 = vsel %vm646_vm0, %v4609_v53, -inf }
 0x151   : > { %v3610_v61 = vpop.f32.mrf.mxu0  ;;  %681 = vmax.xlane.f32.xlu1 %v680_v60 }
 0x152   : > { %v3690_v62 = vpop.f32.mrf.mxu1  ;;  %v4614_v63 = vadd.f32 %v3688_v55, %v481_v59  ;;  %v3611_v0 = vadd.f32 %v3610_v61, %v3609_v56 }
 0x153   : > { %v3691_v1 = vadd.f32 %v3690_v62, %v3689_v58  ;;  %v3612_v4 = vpop.f32.mrf.mxu0 }
 0x154   : > { %7006 = vst [vmem:[#allocation9_spill] sm:$0xff] %v4614_v63  ;;  %v3692_v5 = vpop.f32.mrf.mxu1  ;;  %v486_v6 = vadd.f32 %v3611_v0, %v4551_v2  ;;  %v683_v7 = vsel %vm646_vm0, %v4614_v63, -inf }
 0x155   : > { %v3613_v8 = vpop.f32.mrf.mxu0  ;;  %684 = vmax.xlane.f32.xlu0 %v683_v7 }
 0x156   : > { %v3693_v9 = vpop.f32.mrf.mxu1  ;;  %v4619_v10 = vadd.f32 %v3691_v1, %v486_v6  ;;  %v3614_v11 = vadd.f32 %v3613_v8, %v3612_v4 }
 0x157   : > { %v3694_v14 = vadd.f32 %v3693_v9, %v3692_v5  ;;  %v3615_v15 = vpop.f32.mrf.mxu0 }
 0x158   : > { %7007 = vst [vmem:[#allocation10_spill] sm:$0xff] %v4619_v10  ;;  %v3695_v16 = vpop.f32.mrf.mxu1  ;;  %v491_v17 = vadd.f32 %v3614_v11, %v4551_v2  ;;  %v686_v18 = vsel %vm646_vm0, %v4619_v10, -inf }
 0x159   : > { %v3616_v19 = vpop.f32.mrf.mxu0  ;;  %687 = vmax.xlane.f32.xlu1 %v686_v18 }
 0x15a   : > { %v3696_v20 = vpop.f32.mrf.mxu1  ;;  %v4624_v22 = vadd.f32 %v3694_v14, %v491_v17  ;;  %v3617_v24 = vadd.f32 %v3616_v19, %v3615_v15 }
 0x15b   : > { %v3697_v25 = vadd.f32 %v3696_v20, %v3695_v16 }
 0x15c   : > { %7008 = vst [vmem:[#allocation11_spill] sm:$0xff] %v4624_v22  ;;  %v496_v26 = vadd.f32 %v3617_v24, %v4551_v2  ;;  %v689_v27 = vsel %vm646_vm0, %v4624_v22, -inf }
 0x15d   : > { %690 = vmax.xlane.f32.xlu0 %v689_v27 }
 0x15e   : > { %v4629_v28 = vadd.f32 %v3697_v25, %v496_v26 }
 0x160   : > { %7009 = vst [vmem:[#allocation12_spill] sm:$0xff] %v4629_v28  ;;  %v692_v29 = vsel %vm646_vm0, %v4629_v28, -inf }
 0x161   : > { %693 = vmax.xlane.f32.xlu1 %v692_v29 }
 0x1ae   : > { %v4636_v34 = vpop.xlane.xlu0 %648 }
 0x1af   : > { %vm695_vm1 = vcmp.ge.f32.partialorder %v4554_v12, %v4636_v34 }
 0x1b0   : > { %v711_v2 = vsel %vm695_vm1, %v4634_v32, 10 }
 0x1b1   : > { %v4642_v35 = vsel %vm646_vm0, %v711_v2, 2147483647 }
 0x1b2   : > { %v4644_v36 = vpop.xlane.xlu0 %651  ;;  %v729_v37 = vshra.s32 %v4642_v35, 16 }
 0x1b3   : > { %vm696_vm2 = vcmp.ge.f32.partialorder %v4559_v21, %v4644_v36 }
 0x1b4   : > { %v4649_v38 = vcvt.s32.f32 %v729_v37  ;;  %v712_v40 = vsel %vm696_vm2, %v4634_v32, 10 }
 0x1b5   : > { %v4653_v41 = vsel %vm646_vm0, %v712_v40, 2147483647 }
 0x1b6   : > { %v4655_v42 = vpop.xlane.xlu1 %654  ;;  %732 = vmin.xlane.f32.xlu0 %v4649_v38  ;;  %v744_v44 = vshra.s32 %v4653_v41, 16 }
 0x1b7   : > { %vm697_vm3 = vcmp.ge.f32.partialorder %v4564_v30, %v4655_v42 }
 0x1b8   : > { %v4661_v45 = vcvt.s32.f32 %v744_v44  ;;  %v713_v46 = vsel %vm697_vm3, %v4634_v32, 10 }
 0x1b9   : > { %v4665_v47 = vsel %vm646_vm0, %v713_v46, 2147483647 }
 0x1ba   : > { %v4667_v49 = vpop.xlane.xlu1 %657  ;;  %747 = vmin.xlane.f32.xlu0 %v4661_v45  ;;  %v759_v50 = vshra.s32 %v4665_v47, 16 }
 0x1bb   : > { %vm698_vm4 = vcmp.ge.f32.partialorder %v4569_v39, %v4667_v49 }
 0x1bc   : > { %v4673_v51 = vcvt.s32.f32 %v759_v50  ;;  %v714_v52 = vsel %vm698_vm4, %v4634_v32, 10 }
 0x1bd   : > { %v4677_v54 = vsel %vm646_vm0, %v714_v52, 2147483647 }
 0x1be   : > { %762 = vmin.xlane.f32.xlu0 %v4673_v51  ;;  %v4680_v55 = vpop.xlane.xlu0 %660  ;;  %v774_v56 = vshra.s32 %v4677_v54, 16 }
 0x1bf   : > { %vm699_vm5 = vcmp.ge.f32.partialorder %v4574_v48, %v4680_v55 }
 0x1c0   : > { %v4685_v58 = vcvt.s32.f32 %v774_v56  ;;  %v715_v59 = vsel %vm699_vm5, %v4634_v32, 10 }
 0x1c1   : > { %v4689_v60 = vsel %vm646_vm0, %v715_v59, 2147483647 }
 0x1c2   : > { %v4691_v61 = vpop.xlane.xlu1 %663  ;;  %777 = vmin.xlane.f32.xlu0 %v4685_v58  ;;  %v789_v62 = vshra.s32 %v4689_v60, 16 }
 0x1c3   : > { %vm700_vm6 = vcmp.ge.f32.partialorder %v4579_v57, %v4691_v61 }
 0x1c4   : > { %v4697_v0 = vcvt.s32.f32 %v789_v62  ;;  %v716_v1 = vsel %vm700_vm6, %v4634_v32, 10 }
 0x1c5   : > { %v4701_v4 = vsel %vm646_vm0, %v716_v1, 2147483647 }
 0x1c6   : > { %792 = vmin.xlane.f32.xlu0 %v4697_v0  ;;  %v4704_v5 = vpop.xlane.xlu0 %666  ;;  %v804_v6 = vshra.s32 %v4701_v4, 16 }
 0x1c7   : > { %vm701_vm7 = vcmp.ge.f32.partialorder %v4584_v3, %v4704_v5 }
 0x1c8   : > { %v4709_v7 = vcvt.s32.f32 %v804_v6  ;;  %v717_v8 = vsel %vm701_vm7, %v4634_v32, 10 }
 0x1c9   : > { %v4713_v9 = vsel %vm646_vm0, %v717_v8, 2147483647 }
 0x1ca   : > { %v4715_v11 = vpop.xlane.xlu1 %669  ;;  %807 = vmin.xlane.f32.xlu0 %v4709_v7  ;;  %v819_v14 = vshra.s32 %v4713_v9, 16 }
 0x1cb   : > { %vm702_vm8 = vcmp.ge.f32.partialorder %v4589_v13, %v4715_v11 }
 0x1cc   : > { %v4721_v15 = vcvt.s32.f32 %v819_v14  ;;  %v718_v16 = vsel %vm702_vm8, %v4634_v32, 10 }
 0x1cd   : > { %v4725_v17 = vsel %vm646_vm0, %v718_v16, 2147483647 }
 0x1ce   : > { %822 = vmin.xlane.f32.xlu0 %v4721_v15  ;;  %v4728_v18 = vpop.xlane.xlu0 %672  ;;  %v834_v19 = vshra.s32 %v4725_v17, 16 }
 0x1cf   : > { %vm703_vm9 = vcmp.ge.f32.partialorder %v4594_v23, %v4728_v18 }
 0x1d0   : > { %v4733_v20 = vcvt.s32.f32 %v834_v19  ;;  %v719_v24 = vsel %vm703_vm9, %v4634_v32, 10 }
 0x1d1   : > { %v4737_v25 = vsel %vm646_vm0, %v719_v24, 2147483647 }
 0x1d2   : > { %v4739_v26 = vpop.xlane.xlu1 %675  ;;  %837 = vmin.xlane.f32.xlu0 %v4733_v20  ;;  %v849_v27 = vshra.s32 %v4737_v25, 16 }
 0x1d3   : > { %vm704_vm10 = vcmp.ge.f32.partialorder %v4599_v33, %v4739_v26 }
 0x1d4   : > { %v4745_v29 = vcvt.s32.f32 %v849_v27  ;;  %v720_v2 = vsel %vm704_vm10, %v4634_v32, 10 }
 0x1d5   : > { %v4749_v37 = vsel %vm646_vm0, %v720_v2, 2147483647 }
 0x1d6   : > { %852 = vmin.xlane.f32.xlu0 %v4745_v29  ;;  %v4752_v40 = vpop.xlane.xlu0 %678  ;;  %v864_v44 = vshra.s32 %v4749_v37, 16 }
 0x1d7   : > { %vm705_vm11 = vcmp.ge.f32.partialorder %v4604_v43, %v4752_v40 }
 0x1d8   : > { %v4757_v46 = vcvt.s32.f32 %v864_v44  ;;  %v721_v50 = vsel %vm705_vm11, %v4634_v32, 10 }
 0x1d9   : > { %v4761_v52 = vsel %vm646_vm0, %v721_v50, 2147483647 }
 0x1da   : > { %v4763_v56 = vpop.xlane.xlu1 %681  ;;  %867 = vmin.xlane.f32.xlu0 %v4757_v46  ;;  %v879_v59 = vshra.s32 %v4761_v52, 16 }
 0x1db   : > { %7010 = vst [vmem:[#allocation13_spill] sm:$0xff] %v4763_v56  ;;  %vm706_vm12 = vcmp.ge.f32.partialorder %v4609_v53, %v4763_v56 }
 0x1dc   : > { %v4769_v62 = vcvt.s32.f32 %v879_v59  ;;  %v722_v1 = vsel %vm706_vm12, %v4634_v32, 10 }
 0x1dd   : > { %v4773_v6 = vsel %vm646_vm0, %v722_v1, 2147483647 }
 0x1de   : > { %882 = vmin.xlane.f32.xlu0 %v4769_v62  ;;  %v4776_v8 = vpop.xlane.xlu0 %684  ;;  %v894_v14 = vshra.s32 %v4773_v6, 16 }
 0x1df   : > { %7011 = vst [vmem:[#allocation14_spill] sm:$0xff] %v4776_v8  ;;  %vm707_vm13 = vcmp.ge.f32.partialorder %v4614_v63, %v4776_v8  ;;  %v728_v63 = vand.u32 65535, %v4642_v35 }
 0x1e0   : > { %v4781_v16 = vcvt.s32.f32 %v894_v14  ;;  %v723_v19 = vsel %vm707_vm13, %v4634_v32, 10 }
 0x1e1   : > { %v4785_v24 = vsel %vm646_vm0, %v723_v19, 2147483647 }
 0x1e2   : > { %v4787_v27 = vpop.xlane.xlu1 %687  ;;  %897 = vmin.xlane.f32.xlu0 %v4781_v16  ;;  %v909_v2 = vshra.s32 %v4785_v24, 16 }
 0x1e3   : > { %7012 = vst [vmem:[#allocation15_spill] sm:$0xff] %v4787_v27  ;;  %vm708_vm14 = vcmp.ge.f32.partialorder %v4619_v10, %v4787_v27 }
 0x1e4   : > { %v4793_v44 = vcvt.s32.f32 %v909_v2  ;;  %v724_v50 = vsel %vm708_vm14, %v4634_v32, 10 }
 0x1e5   : > { %v4797_v59 = vsel %vm646_vm0, %v724_v50, 2147483647 }
 0x1e6   : > { %912 = vmin.xlane.f32.xlu0 %v4793_v44  ;;  %v4800_v1 = vpop.xlane.xlu0 %690  ;;  %v924_v14 = vshra.s32 %v4797_v59, 16 }
 0x1e7   : > { %7013 = vst [vmem:[#allocation16_spill] sm:$0xff] %v4800_v1  ;;  %vm709_vm15 = vcmp.ge.f32.partialorder %v4624_v22, %v4800_v1 }
 0x1e8   : > { %v4805_v19 = vcvt.s32.f32 %v924_v14  ;;  %v725_v31 = vsel %vm709_vm15, %v4634_v32, 10 }
 0x1e9   : > { %v4809_v2 = vsel %vm646_vm0, %v725_v31, 2147483647 }
 0x1ea   : > { %v4811_v10 = vpop.xlane.xlu1 %693  ;;  %927 = vmin.xlane.f32.xlu0 %v4805_v19  ;;  %v939_v50 = vshra.s32 %v4809_v2, 16 }
 0x1eb   : > { %7014 = vst [vmem:[#allocation17_spill] sm:$0xff] %v4811_v10  ;;  %vm710_vm1 = vcmp.ge.f32.partialorder %v4629_v28, %v4811_v10  ;;  %v730_v28 = vcvt.s32.f32 %v728_v63 }
 0x1ec   : > { %v4817_v27 = vcvt.s32.f32 %v939_v50  ;;  %v726_v22 = vsel %vm710_vm1, %v4634_v32, 10  ;;  %v743_v50 = vand.u32 65535, %v4653_v41  ;;  %v773_v41 = vand.u32 65535, %v4677_v54 }
 0x1ed   : > { %v4821_v14 = vsel %vm646_vm0, %v726_v22, 2147483647  ;;  %v803_v54 = vand.u32 65535, %v4701_v4  ;;  %v833_v4 = vand.u32 65535, %v4725_v17  ;;  %v863_v17 = vand.u32 65535, %v4749_v37 }
 0x1ee   : > { %942 = vmin.xlane.f32.xlu0 %v4817_v27  ;;  %v954_v31 = vshra.s32 %v4821_v14, 16  ;;  %v745_v53 = vcvt.s32.f32 %v743_v50  ;;  %v775_v50 = vcvt.s32.f32 %v773_v41  ;;  %v893_v37 = vand.u32 65535, %v4773_v6 }
 0x1ef   : > { %v923_v6 = vand.u32 65535, %v4797_v59  ;;  %v953_v59 = vand.u32 65535, %v4821_v14  ;;  %v1032_v14 = vsub.f32 %v4559_v21, %v4644_v36 }
 0x1f0   : > { %v4825_v1 = vcvt.s32.f32 %v954_v31  ;;  %v758_v31 = vand.u32 65535, %v4665_v47  ;;  %v788_v47 = vand.u32 65535, %v4689_v60  ;;  %v818_v60 = vand.u32 65535, %v4713_v9 }
 0x1f1   : > { %v848_v9 = vand.u32 65535, %v4737_v25  ;;  %v878_v25 = vand.u32 65535, %v4761_v52  ;;  %v908_v52 = vand.u32 65535, %v4785_v24  ;;  %v938_v24 = vand.u32 65535, %v4809_v2 }
 0x1f2   : > { %957 = vmin.xlane.f32.xlu0 %v4825_v1  ;;  %v760_v63 = vcvt.s32.f32 %v758_v31  ;;  %v805_v31 = vcvt.s32.f32 %v803_v54  ;;  %v820_v41 = vcvt.s32.f32 %v818_v60  ;;  %v865_v54 = vcvt.s32.f32 %v863_v17 }
 0x1f3   : > { %v955_v17 = vcvt.s32.f32 %v953_v59 }
 0x23f   : > { %v4829_v8 = vpop.xlane.xlu0 %732 }
 0x240   : > { %vm734_vm2 = vcmp.eq.f32.partialorder %v4649_v38, %v4829_v8 }
 0x241   : > { %v735_v22 = vsel %vm734_vm2, %v730_v28, inf }
 0x242   : > { %736 = vmin.xlane.f32.xlu1 %v735_v22 }
 0x243   : > { %v4834_v10 = vpop.xlane.xlu0 %747 }
 0x244   : > { %vm749_vm3 = vcmp.eq.f32.partialorder %v4661_v45, %v4834_v10  ;;  %v754_v21 = vcvt.f32.s32 %v4834_v10 }
 0x245   : > { %v750_v56 = vsel %vm749_vm3, %v745_v53, inf }
 0x246   : > { %751 = vmin.xlane.f32.xlu1 %v750_v56  ;;  %v790_v56 = vcvt.s32.f32 %v788_v47 }
 0x247   : > { %v4839_v35 = vpop.xlane.xlu0 %762 }
 0x248   : > { %vm764_vm4 = vcmp.eq.f32.partialorder %v4673_v51, %v4839_v35 }
 0x249   : > { %v765_v28 = vsel %vm764_vm4, %v760_v63, inf }
 0x24a   : > { %766 = vmin.xlane.f32.xlu1 %v765_v28 }
 0x24b   : > { %v4844_v38 = vpop.xlane.xlu0 %777 }
 0x24c   : > { %vm779_vm5 = vcmp.eq.f32.partialorder %v4685_v58, %v4844_v38 }
 0x24d   : > { %v780_v53 = vsel %vm779_vm5, %v775_v50, inf  ;;  %v835_v50 = vcvt.s32.f32 %v833_v4  ;;  %v910_v4 = vcvt.s32.f32 %v908_v52 }
 0x24e   : > { %781 = vmin.xlane.f32.xlu1 %v780_v53  ;;  %v850_v53 = vcvt.s32.f32 %v848_v9 }
 0x24f   : > { %v4849_v45 = vpop.xlane.xlu0 %792 }
 0x250   : > { %vm794_vm6 = vcmp.eq.f32.partialorder %v4697_v0, %v4849_v45 }
 0x251   : > { %v795_v51 = vsel %vm794_vm6, %v790_v56, inf }
 0x252   : > { %796 = vmin.xlane.f32.xlu1 %v795_v51 }
 0x253   : > { %v4854_v22 = vpop.xlane.xlu0 %807 }
 0x254   : > { %vm809_vm7 = vcmp.eq.f32.partialorder %v4709_v7, %v4854_v22 }
 0x255   : > { %v810_v58 = vsel %vm809_vm7, %v805_v31, inf  ;;  %v880_v31 = vcvt.s32.f32 %v878_v25 }
 0x256   : > { %811 = vmin.xlane.f32.xlu1 %v810_v58  ;;  %v895_v58 = vcvt.s32.f32 %v893_v37 }
 0x257   : > { %v4859_v63 = vpop.xlane.xlu0 %822 }
 0x258   : > { %vm824_vm8 = vcmp.eq.f32.partialorder %v4721_v15, %v4859_v63 }
 0x259   : > { %v825_v0 = vsel %vm824_vm8, %v820_v41, inf }
 0x25a   : > { %826 = vmin.xlane.f32.xlu1 %v825_v0 }
 0x25b   : > { %v4864_v28 = vpop.xlane.xlu0 %837 }
 0x25c   : > { %vm839_vm9 = vcmp.eq.f32.partialorder %v4733_v20, %v4864_v28 }
 0x25d   : > { %v840_v7 = vsel %vm839_vm9, %v835_v50, inf  ;;  %v925_v50 = vcvt.s32.f32 %v923_v6  ;;  %v784_v6 = vcvt.f32.s32 %v4844_v38 }
 0x25e   : > { %841 = vmin.xlane.f32.xlu1 %v840_v7  ;;  %v940_v7 = vcvt.s32.f32 %v938_v24 }
 0x25f   : > { %v4869_v47 = vpop.xlane.xlu0 %852 }
 0x260   : > { %vm854_vm10 = vcmp.eq.f32.partialorder %v4745_v29, %v4869_v47 }
 0x261   : > { %v855_v15 = vsel %vm854_vm10, %v850_v53, inf }
 0x262   : > { %856 = vmin.xlane.f32.xlu1 %v855_v15 }
 0x263   : > { %v4874_v56 = vpop.xlane.xlu0 %867 }
 0x264   : > { %vm869_vm11 = vcmp.eq.f32.partialorder %v4757_v46, %v4874_v56 }
 0x265   : > { %v870_v20 = vsel %vm869_vm11, %v865_v54, inf  ;;  %v1049_v54 = vmul.f32 1.442695, %v1032_v14 }
 0x266   : > { %871 = vmin.xlane.f32.xlu1 %v870_v20  ;;  %v1034_v20 = vsub.f32 %v4569_v39, %v4667_v49  ;;  %v755_v49 = vshll.u32 %v754_v21, 16 }
 0x267   : > { %v4879_v51 = vpop.xlane.xlu0 %882 }
 0x268   : > { %vm884_vm12 = vcmp.eq.f32.partialorder %v4769_v62, %v4879_v51 }
 0x269   : > { %v885_v29 = vsel %vm884_vm12, %v880_v31, inf  ;;  %v1053_v31 = vmul.f32 1.442695, %v1034_v20  ;;  %v814_v20 = vcvt.f32.s32 %v4854_v22 }
 0x26a   : > { %886 = vmin.xlane.f32.xlu1 %v885_v29  ;;  %v1036_v29 = vsub.f32 %v4579_v57, %v4691_v61  ;;  %v1037_v57 = vsub.f32 %v4584_v3, %v4704_v5  ;;  %v1038_v3 = vsub.f32 %v4589_v13, %v4715_v11  ;;  %v799_v5 = vcvt.f32.s32 %v4849_v45 }
 0x26b   : > { %v4884_v60 = vpop.xlane.xlu0 %897  ;;  %v1039_v13 = vsub.f32 %v4594_v23, %v4728_v18  ;;  %v1040_v23 = vsub.f32 %v4599_v33, %v4739_v26  ;;  %v829_v18 = vcvt.f32.s32 %v4859_v63  ;;  %v1041_v33 = vsub.f32 %v4604_v43, %v4752_v40  ;;  %v7015_v43 = vld [vmem:[#allocation13_spill] sm:$0xff]  ;;  %v7016_v40 = vld [vmem:[#allocation8_spill] sm:$0xff] }
 0x26c   : > { %vm899_vm13 = vcmp.eq.f32.partialorder %v4781_v16, %v4884_v60  ;;  %v800_v11 = vshll.u32 %v799_v5, 16 }
 0x26d   : > { %v900_v46 = vsel %vm899_vm13, %v895_v58, inf  ;;  %v769_v58 = vcvt.f32.s32 %v4839_v35  ;;  %v830_v26 = vshll.u32 %v829_v18, 16  ;;  %v889_v18 = vcvt.f32.s32 %v4879_v51 }
 0x26e   : > { %901 = vmin.xlane.f32.xlu1 %v900_v46 }
 0x26f   : > { %v4889_v41 = vpop.xlane.xlu0 %912  ;;  %v770_v61 = vshll.u32 %v769_v58, 16 }
 0x270   : > { %vm914_vm14 = vcmp.eq.f32.partialorder %v4793_v44, %v4889_v41 }
 0x271   : > { %v915_v62 = vsel %vm914_vm14, %v910_v4, inf  ;;  %v1057_v4 = vmul.f32 1.442695, %v1036_v29 }
 0x272   : > { %916 = vmin.xlane.f32.xlu1 %v915_v62 }
 0x273   : > { %v4894_v0 = vpop.xlane.xlu0 %927 }
 0x274   : > { %vm929_vm15 = vcmp.eq.f32.partialorder %v4805_v19, %v4894_v0  ;;  %v1031_v19 = vsub.f32 %v4554_v12, %v4636_v34  ;;  %v1035_v12 = vsub.f32 %v4574_v48, %v4680_v55  ;;  %v4144_v55 = vmov 0.0  }
 0x275   : > { %v930_v16 = vsel %vm929_vm15, %v925_v50, inf }
 0x276   : > { %931 = vmin.xlane.f32.xlu1 %v930_v16  ;;  %v1047_v15 = vmul.f32 1.442695, %v1031_v19 }
 0x277   : > { %v4899_v9 = vpop.xlane.xlu0 %942 }
 0x278   : > { %vm944_vm1 = vcmp.eq.f32.partialorder %v4817_v27, %v4899_v9  ;;  %v1033_v27 = vsub.f32 %v4564_v30, %v4655_v42  ;;  %3919 = vpow2.f32 %v1047_v15  ;;  %v1055_v42 = vmul.f32 1.442695, %v1035_v12 }
 0x279   : > { %v945_v44 = vsel %vm944_vm1, %v940_v7, inf  ;;  %3921 = vpow2.f32 %v1049_v54 }
 0x27a   : > { %946 = vmin.xlane.f32.xlu1 %v945_v44  ;;  %v1051_v25 = vmul.f32 1.442695, %v1033_v27  ;;  %v1059_v44 = vmul.f32 1.442695, %v1037_v57 }
 0x27b   : > { %v4904_v53 = vpop.xlane.xlu0 %957 }
 0x27c   : > { %vm959_vm2 = vcmp.eq.f32.partialorder %v4825_v1, %v4904_v53  ;;  %v739_v1 = vcvt.f32.s32 %v4829_v8  ;;  %3923 = vpow2.f32 %v1051_v25  ;;  %v1061_v25 = vmul.f32 1.442695, %v1038_v3 }
 0x27d   : > { %v960_v2 = vsel %vm959_vm2, %v955_v17, inf  ;;  %3925 = vpow2.f32 %v1053_v31 }
 0x27e   : > { %961 = vmin.xlane.f32.xlu1 %v960_v2  ;;  %v740_v37 = vshll.u32 %v739_v1, 16  ;;  %3927 = vpow2.f32 %v1055_v42  ;;  %v785_v2 = vshll.u32 %v784_v6, 16  ;;  %v815_v42 = vshll.u32 %v814_v20, 16 }
 0x27f   : > { %3929 = vpow2.f32 %v1057_v4 }
 0x280   : > { %3931 = vpow2.f32 %v1059_v44 }
 0x281   : > { %3933 = vpow2.f32 %v1061_v25 }
 0x285   : > { %v3920_v48 = vpop.eup %3919 }
 0x286   : > { %v3922_v24 = vpop.eup %3921 }
 0x289   : > { %v3924_v17 = vpop.eup %3923 }
 0x2cb   : > { %v737_v34 = vpop.xlane.xlu1 %736 }
 0x2cc   : > { %v738_v36 = vcvt.f32.s32 %v737_v34  ;;  %v3926_v34 = vpop.eup %3925 }
 0x2ce   : > { %v741_v30 = vadd.s32 %v740_v37, %v738_v36  ;;  %v1063_v36 = vmul.f32 1.442695, %v1039_v13  ;;  %v874_v13 = vcvt.f32.s32 %v4874_v56 }
 0x2cf   : > { %v752_v39 = vpop.xlane.xlu1 %751 }
 0x2d0   : > { %v753_v8 = vcvt.f32.s32 %v752_v39  ;;  %vm967_vm3 = vcmp.eq.s32.totalorder %v4634_v32, %v741_v30  ;;  %v3928_v30 = vpop.eup %3927  ;;  %3935 = vpow2.f32 %v1063_v36  ;;  %v7020_v36 = vld [vmem:[#allocation10_spill] sm:$0xff] }
 0x2d1   : > { %v3503_v52 = vsel %vm967_vm3, 1.0, %v4144_v55 }
 0x2d2   : > { %v756_v46 = vadd.s32 %v755_v49, %v753_v8  ;;  %v4925_v10 = vmul.f32 %v3920_v48, %v3503_v52  ;;  %v1065_v48 = vmul.f32 1.442695, %v1040_v23  ;;  %v3930_v52 = vpop.eup %3929 }
 0x2d3   : > { %v767_v35 = vpop.xlane.xlu1 %766 }
 0x2d4   : > { %v768_v62 = vcvt.f32.s32 %v767_v35  ;;  %v1095_v50 = vsel %vm646_vm0, %v4925_v10, 0.0  ;;  %vm968_vm4 = vcmp.eq.s32.totalorder %v4634_v32, %v756_v46  ;;  %v844_v46 = vcvt.f32.s32 %v4864_v28 }
 0x2d5   : > { %1096 = vadd.xlane.f32.xlu0 %v1095_v50  ;;  %v3504_v16 = vsel %vm968_vm4, 1.0, %v4144_v55  ;;  %3937 = vpow2.f32 %v1065_v48  ;;  %v1042_v50 = vsub.f32 %v7016_v40, %v7015_v43 }
 0x2d6   : > { %v771_v7 = vadd.s32 %v770_v61, %v768_v62  ;;  %v4934_v59 = vmul.f32 %v3922_v24, %v3504_v16  ;;  %v1067_v62 = vmul.f32 1.442695, %v1041_v33  ;;  %v859_v24 = vcvt.f32.s32 %v4869_v47  ;;  %v3932_v16 = vpop.eup %3931 }
 0x2d7   : > { %v782_v38 = vpop.xlane.xlu1 %781  ;;  %v3934_v25 = vpop.eup %3933 }
 0x2d8   : > { %v783_v19 = vcvt.f32.s32 %v782_v38  ;;  %v1098_v15 = vsel %vm646_vm0, %v4934_v59, 0.0  ;;  %vm969_vm5 = vcmp.eq.s32.totalorder %v4634_v32, %v771_v7  ;;  %v845_v7 = vshll.u32 %v844_v46, 16 }
 0x2d9   : > { %1099 = vadd.xlane.f32.xlu1 %v1098_v15  ;;  %v3505_v14 = vsel %vm969_vm5, 1.0, %v4144_v55  ;;  %3939 = vpow2.f32 %v1067_v62  ;;  %v7018_v15 = vld [vmem:[#allocation9_spill] sm:$0xff] }
 0x2da   : > { %v786_v27 = vadd.s32 %v785_v2, %v783_v19  ;;  %v4943_v54 = vmul.f32 %v3924_v17, %v3505_v14  ;;  %v1069_v2 = vmul.f32 1.442695, %v1042_v50  ;;  %v7017_v19 = vld [vmem:[#allocation14_spill] sm:$0xff]  ;;  %v860_v14 = vshll.u32 %v859_v24, 16  ;;  %v7025_v24 = vld [vmem:[#allocation17_spill] sm:$0xff] }
 0x2db   : > { %v797_v45 = vpop.xlane.xlu1 %796  ;;  %v1043_v47 = vsub.f32 %v7018_v15, %v7017_v19 }
 0x2dc   : > { %v798_v1 = vcvt.f32.s32 %v797_v45  ;;  %v1101_v12 = vsel %vm646_vm0, %v4943_v54, 0.0  ;;  %vm970_vm6 = vcmp.eq.s32.totalorder %v4634_v32, %v786_v27  ;;  %3941 = vpow2.f32 %v1069_v2 }
 0x2dd   : > { %1102 = vadd.xlane.f32.xlu0 %v1101_v12  ;;  %v3506_v31 = vsel %vm970_vm6, 1.0, %v4144_v55  ;;  %v1071_v56 = vmul.f32 1.442695, %v1043_v47 }
 0x2de   : > { %v801_v37 = vadd.s32 %v800_v11, %v798_v1  ;;  %v4952_v21 = vmul.f32 %v3926_v34, %v3506_v31  ;;  %v6775_v34 = vmov 1   ;;  %v6789_v31 = vmov 0  }
 0x2df   : > { %v812_v22 = vpop.xlane.xlu1 %811  ;;  %3760 = vset.pattern.permute.xlu1 %v6775_v34  ;;  %3759 = vset.pattern.permute.xlu0 %v6789_v31  ;;  %3943 = vpow2.f32 %v1071_v56  ;;  %v949_v56 = vcvt.f32.s32 %v4899_v9  ;;  %v964_v9 = vcvt.f32.s32 %v4904_v53 }
 0x2e0   : > { %v813_v29 = vcvt.f32.s32 %v812_v22  ;;  %v1104_v58 = vsel %vm646_vm0, %v4952_v21, 0.0  ;;  %vm971_vm7 = vcmp.eq.s32.totalorder %v4634_v32, %v801_v37  ;;  %v7019_v37 = vld [vmem:[#allocation15_spill] sm:$0xff] }
 0x2e1   : > { %1105 = vadd.xlane.f32.xlu1 %v1104_v58  ;;  %v3507_v39 = vsel %vm971_vm7, 1.0, %v4144_v55  ;;  %v1044_v23 = vsub.f32 %v7020_v36, %v7019_v37 }
 0x2e2   : > { %v816_v49 = vadd.s32 %v815_v42, %v813_v29  ;;  %v4961_v8 = vmul.f32 %v3928_v30, %v3507_v39  ;;  %v3936_v30 = vpop.eup %3935  ;;  %v875_v42 = vshll.u32 %v874_v13, 16 }
 0x2e3   : > { %v827_v63 = vpop.xlane.xlu1 %826  ;;  %v1073_v33 = vmul.f32 1.442695, %v1044_v23 }
 0x2e4   : > { %v828_v4 = vcvt.f32.s32 %v827_v63  ;;  %v1107_v57 = vsel %vm646_vm0, %v4961_v8, 0.0  ;;  %vm972_vm8 = vcmp.eq.s32.totalorder %v4634_v32, %v816_v49  ;;  %v7023_v63 = vld [vmem:[#allocation11_spill] sm:$0xff] }
 0x2e5   : > { %1108 = vadd.xlane.f32.xlu0 %v1107_v57  ;;  %v3508_v61 = vsel %vm972_vm8, 1.0, %v4144_v55  ;;  %v904_v57 = vcvt.f32.s32 %v4884_v60  ;;  %3945 = vpow2.f32 %v1073_v33 }
 0x2e6   : > { %v831_v35 = vadd.s32 %v830_v26, %v828_v4  ;;  %v4970_v6 = vmul.f32 %v3930_v52, %v3508_v61  ;;  %v7022_v26 = vld [vmem:[#allocation16_spill] sm:$0xff]  ;;  %v890_v52 = vshll.u32 %v889_v18, 16  ;;  %v3938_v4 = vpop.eup %3937 }
 0x2e7   : > { %v842_v28 = vpop.xlane.xlu1 %841  ;;  %v1045_v51 = vsub.f32 %v7023_v63, %v7022_v26 }
 0x2e8   : > { %v843_v44 = vcvt.f32.s32 %v842_v28  ;;  %v1110_v3 = vsel %vm646_vm0, %v4970_v6, 0.0  ;;  %vm973_vm9 = vcmp.eq.s32.totalorder %v4634_v32, %v831_v35  ;;  %v7026_v28 = vld [vmem:[#allocation12_spill] sm:$0xff] }
 0x2e9   : > { %1111 = vadd.xlane.f32.xlu1 %v1110_v3  ;;  %v3509_v5 = vsel %vm973_vm9, 1.0, %v4144_v55  ;;  %v1075_v50 = vmul.f32 1.442695, %v1045_v51  ;;  %v905_v3 = vshll.u32 %v904_v57, 16 }
 0x2ea   : > { %v846_v38 = vadd.s32 %v845_v7, %v843_v44  ;;  %v4979_v17 = vmul.f32 %v3932_v16, %v3509_v5  ;;  %v1046_v16 = vsub.f32 %v7026_v28, %v7025_v24  ;;  %v919_v7 = vcvt.f32.s32 %v4889_v41  ;;  %v3940_v44 = vpop.eup %3939 }
 0x2eb   : > { %v857_v27 = vpop.xlane.xlu1 %856  ;;  %3947 = vpow2.f32 %v1075_v50  ;;  %v3942_v41 = vpop.eup %3941 }
 0x2ec   : > { %v858_v11 = vcvt.f32.s32 %v857_v27  ;;  %v1113_v45 = vsel %vm646_vm0, %v4979_v17, 0.0  ;;  %vm974_vm10 = vcmp.eq.s32.totalorder %v4634_v32, %v846_v38  ;;  %v1077_v47 = vmul.f32 1.442695, %v1046_v16  ;;  %v3944_v36 = vpop.eup %3943 }
 0x2ed   : > { %1114 = vadd.xlane.f32.xlu0 %v1113_v45  ;;  %v3510_v20 = vsel %vm974_vm10, 1.0, %v4144_v55 }
 0x2ee   : > { %v861_v1 = vadd.s32 %v860_v14, %v858_v11  ;;  %v4988_v12 = vmul.f32 %v3934_v25, %v3510_v20  ;;  %v920_v14 = vshll.u32 %v919_v7, 16  ;;  %v934_v25 = vcvt.f32.s32 %v4894_v0 }
 0x2ef   : > { %v872_v22 = vpop.xlane.xlu1 %871  ;;  %3949 = vpow2.f32 %v1077_v47  ;;  %v6777_v47 = vmov 8  }
 0x2f0   : > { %v873_v29 = vcvt.f32.s32 %v872_v22  ;;  %v1116_v58 = vsel %vm646_vm0, %v4988_v12, 0.0  ;;  %vm975_vm11 = vcmp.eq.s32.totalorder %v4634_v32, %v861_v1  ;;  %v935_v23 = vshll.u32 %v934_v25, 16 }
 0x2f1   : > { %1117 = vadd.xlane.f32.xlu1 %v1116_v58  ;;  %v3511_v39 = vsel %vm975_vm11, 1.0, %v4144_v55 }
 0x2f2   : > { %v876_v49 = vadd.s32 %v875_v42, %v873_v29  ;;  %v4999_v48 = vmul.f32 %v3936_v30, %v3511_v39  ;;  %v950_v29 = vshll.u32 %v949_v56, 16  ;;  %v3946_v39 = vpop.eup %3945 }
 0x2f3   : > { %v887_v46 = vpop.xlane.xlu1 %886 }
 0x2f4   : > { %7021 = vst [vmem:[#allocation13_spill] sm:$0xff] %v4999_v48  ;;  %v888_v61 = vcvt.f32.s32 %v887_v46  ;;  %v1119_v35 = vsel %vm646_vm0, %v4999_v48, 0.0  ;;  %vm976_vm12 = vcmp.eq.s32.totalorder %v4634_v32, %v876_v49 }
 0x2f5   : > { %1120 = vadd.xlane.f32.xlu0 %v1119_v35  ;;  %v3512_v62 = vsel %vm976_vm12, 1.0, %v4144_v55 }
 0x2f6   : > { %v891_v43 = vadd.s32 %v890_v52, %v888_v61  ;;  %v5008_v40 = vmul.f32 %v3938_v4, %v3512_v62  ;;  %v965_v4 = vshll.u32 %v964_v9, 16 }
 0x2f7   : > { %v902_v60 = vpop.xlane.xlu1 %901 }
 0x2f8   : > { %7024 = vst [vmem:[#allocation8_spill] sm:$0xff] %v5008_v40  ;;  %v903_v5 = vcvt.f32.s32 %v902_v60  ;;  %v1122_v38 = vsel %vm646_vm0, %v5008_v40, 0.0  ;;  %vm977_vm13 = vcmp.eq.s32.totalorder %v4634_v32, %v891_v43  ;;  %v3948_v46 = vpop.eup %3947 }
 0x2f9   : > { %1123 = vadd.xlane.f32.xlu1 %v1122_v38  ;;  %v3513_v2 = vsel %vm977_vm13, 1.0, %v4144_v55  ;;  %v6781_v38 = vmov 4  }
 0x2fa   : > { %v906_v19 = vadd.s32 %v905_v3, %v903_v5  ;;  %v5017_v15 = vmul.f32 %v3940_v44, %v3513_v2  ;;  %v6773_v5 = vmov 3   ;;  %v6779_v2 = vmov 6  }
 0x2fb   : > { %v917_v27 = vpop.xlane.xlu1 %916 }
 0x2fc   : > { %7027 = vst [vmem:[#allocation14_spill] sm:$0xff] %v5017_v15  ;;  %v918_v13 = vcvt.f32.s32 %v917_v27  ;;  %v1125_v11 = vsel %vm646_vm0, %v5017_v15, 0.0  ;;  %vm978_vm14 = vcmp.eq.s32.totalorder %v4634_v32, %v906_v19  ;;  %v3950_v43 = vpop.eup %3949  ;;  %v6785_v19 = vmov 9  }
 0x2fd   : > { %1126 = vadd.xlane.f32.xlu0 %v1125_v11  ;;  %v3514_v45 = vsel %vm978_vm14, 1.0, %v4144_v55 }
 0x2fe   : > { %v921_v20 = vadd.s32 %v920_v14, %v918_v13  ;;  %v5024_v1 = vmul.f32 %v3942_v41, %v3514_v45 }
 0x2ff   : > { %v932_v37 = vpop.xlane.xlu1 %931 }
 0x300   : > { %7028 = vst [vmem:[#allocation9_spill] sm:$0xff] %v5024_v1  ;;  %v933_v18 = vcvt.f32.s32 %v932_v37  ;;  %v1128_v0 = vsel %vm646_vm0, %v5024_v1, 0.0  ;;  %vm979_vm15 = vcmp.eq.s32.totalorder %v4634_v32, %v921_v20 }
 0x301   : > { %1129 = vadd.xlane.f32.xlu1 %v1128_v0  ;;  %v3515_v22 = vsel %vm979_vm15, 1.0, %v4144_v55  ;;  %v7035_v0 = vlaneseq }
 0x302   : > { %v936_v30 = vadd.s32 %v935_v23, %v933_v18  ;;  %v5031_v42 = vmul.f32 %v3944_v36, %v3515_v22 }
 0x303   : > { %v947_v58 = vpop.xlane.xlu1 %946  ;;  %v1258_v22 = vshrl.u32 %v7035_v0, 7  ;;  %v3524_v0 = vld [vmem:[%s6758_s3 + $0x6] ss:$8 sm:$0xf] }
 0x304   : > { %7029 = vst [vmem:[#allocation15_spill] sm:$0xff] %v5031_v42  ;;  %v948_v49 = vcvt.f32.s32 %v947_v58  ;;  %v1131_v33 = vsel %vm646_vm0, %v5031_v42, 0.0  ;;  %vm980_vm1 = vcmp.eq.s32.totalorder %v4634_v32, %v936_v30 }
 0x305   : > { %1132 = vadd.xlane.f32.xlu0 %v1131_v33  ;;  %v3516_v26 = vsel %vm980_vm1, 1.0, %v4144_v55  ;;  %v5138_v9 = vsub.s32 0, %v1258_v22  ;;  %v5142_v33 = vsub.s32 2, %v1258_v22 }
 0x306   : > { %v951_v63 = vadd.s32 %v950_v29, %v948_v49  ;;  %v5038_v51 = vmul.f32 %v3946_v39, %v3516_v26  ;;  %v5140_v49 = vsub.s32 1, %v1258_v22  ;;  %v3519_v26 = vld [vmem:[%s6758_s3 + $0x1] ss:$8 sm:$0xf] }
 0x307   : > { %v962_v52 = vpop.xlane.xlu1 %961 }
 0x308   : > { %7030 = vst [vmem:[#allocation10_spill] sm:$0xff] %v5038_v51  ;;  %v963_v57 = vcvt.f32.s32 %v962_v52  ;;  %v1134_v61 = vsel %vm646_vm0, %v5038_v51, 0.0  ;;  %vm981_vm2 = vcmp.eq.s32.totalorder %v4634_v32, %v951_v63  ;;  %v5149_v63 = vsub.s32 3, %v1258_v22 }
 0x309   : > { %1135 = vadd.xlane.f32.xlu1 %v1134_v61  ;;  %v3517_v53 = vsel %vm981_vm2, 1.0, %v4144_v55  ;;  %v5167_v61 = vrot.slane %v3519_v26, %v5140_v49 }
 0x30a   : > { %v966_v35 = vadd.s32 %v965_v4, %v963_v57  ;;  %v5044_v62 = vmul.f32 %v3948_v46, %v3517_v53  ;;  %v3521_v4 = vld [vmem:[%s6758_s3 + $0x3] ss:$8 sm:$0xf]  ;;  %v5164_v57 = vrot.slane %v3519_v26, %v5138_v9  ;;  %v5170_v53 = vrot.slane %v3519_v26, %v5142_v33 }
 0x30b   : > { %7041 = vst [vmem:[#allocation23_spill] sm:$0xff] %v5167_v61 }
 0x30c   : > { %7031 = vst [vmem:[#allocation16_spill] sm:$0xff] %v5044_v62  ;;  %v1137_v50 = vsel %vm646_vm0, %v5044_v62, 0.0  ;;  %vm982_vm3 = vcmp.eq.s32.totalorder %v4634_v32, %v966_v35  ;;  %v6783_v32 = vmov 2   ;;  %7040 = vst [vmem:[#allocation22_spill] sm:$0xff] %v5164_v57 }
 0x30d   : > { %1138 = vadd.xlane.f32.xlu0 %v1137_v50  ;;  %v3518_v24 = vsel %vm982_vm3, 1.0, %v4144_v55  ;;  %v6793_v55 = vmov 5   ;;  %7042 = vst [vmem:[#allocation24_spill] sm:$0xff] %v5170_v53  ;;  %v5179_v50 = vrot.slane %v3519_v26, %v5149_v63 }
 0x30e   : > { %v5050_v28 = vmul.f32 %v3950_v43, %v3518_v24  ;;  %v3520_v43 = vld [vmem:[%s6758_s3 + $0x2] ss:$8 sm:$0xf] }
 0x30f   : > { %7044 = vst [vmem:[#allocation26_spill] sm:$0xff] %v5179_v50 }
 0x310   : > { %7032 = vst [vmem:[#allocation11_spill] sm:$0xff] %v5050_v28  ;;  %v1140_v16 = vsel %vm646_vm0, %v5050_v28, 0.0  ;;  %v5288_v28 = vrot.slane %v3524_v0, %v5149_v63 }
 0x311   : > { %1141 = vadd.xlane.f32.xlu1 %v1140_v16 }
 0x35e   : > { %v1097_v7 = vpop.xlane.xlu0 %1096 }
 0x35f   : > { %3951 = vrcp.f32 %v1097_v7 }
 0x362   : > { %v1100_v3 = vpop.xlane.xlu1 %1099 }
 0x363   : > { %3953 = vrcp.f32 %v1100_v3 }
 0x366   : > { %v1103_v41 = vpop.xlane.xlu0 %1102 }
 0x367   : > { %3955 = vrcp.f32 %v1103_v41  ;;  %v5206_v41 = vrot.slane %v3521_v4, %v5142_v33 }
 0x369   : > { %7052 = vst [vmem:[#allocation34_spill] sm:$0xff] %v5206_v41 }
 0x36a   : > { %v1106_v25 = vpop.xlane.xlu1 %1105 }
 0x36b   : > { %3957 = vrcp.f32 %v1106_v25  ;;  %v3522_v25 = vld [vmem:[%s6758_s3 + $0x4] ss:$8 sm:$0xf] }
 0x36c   : > { %v3952_v60 = vpop.eup %3951  ;;  %v5247_v26 = vrot.slane %v3522_v25, %v5138_v9 }
 0x36d   : > { %v1144_v44 = vmul.f32 %v3952_v60, %v4925_v10  ;;  %v6787_v10 = vmov 7   ;;  %v3523_v60 = vld [vmem:[%s6758_s3 + $0x5] ss:$8 sm:$0xf] }
 0x36e   : > { %v1109_v20 = vpop.xlane.xlu0 %1108  ;;  %v5241_v22 = vrot.slane %v3523_v60, %v5142_v33  ;;  %7060 = vst [vmem:[#allocation42_spill] sm:$0xff] %v5247_v26 }
 0x36f   : > { %1408 = vperm.xlu1 %3760, %v1144_v44   ;;  %1178 = vperm.xlu0 %3759, %v1144_v44   ;;  %3959 = vrcp.f32 %v1109_v20  ;;  %v3525_v20 = vld [vmem:[%s6758_s3 + $0x7] ss:$8 sm:$0xf] }
 0x370   : > { %v3954_v14 = vpop.eup %3953  ;;  %7059 = vst [vmem:[#allocation41_spill] sm:$0xff] %v5241_v22 }
 0x371   : > { %v1146_v27 = vmul.f32 %v3954_v14, %v4934_v59  ;;  %v5200_v14 = vrot.slane %v3521_v4, %v5138_v9 }
 0x372   : > { %v1112_v56 = vpop.xlane.xlu1 %1111 }
 0x373   : > { %3762 = vset.pattern.permute.xlu1 %v6773_v5  ;;  %3761 = vset.pattern.permute.xlu0 %v6783_v32  ;;  %3961 = vrcp.f32 %v1112_v56  ;;  %7050 = vst [vmem:[#allocation32_spill] sm:$0xff] %v5200_v14  ;;  %v5229_v56 = vrot.slane %v3520_v43, %v5149_v63 }
 0x374   : > { %1838 = vperm.xlu1 %3762, %v1144_v44   ;;  %1623 = vperm.xlu0 %3761, %v1144_v44   ;;  %v3956_v59 = vpop.eup %3955 }
 0x375   : > { %v1148_v11 = vmul.f32 %v3956_v59, %v4943_v54  ;;  %v5214_v59 = vrot.slane %v3521_v4, %v5149_v63  ;;  %7057 = vst [vmem:[#allocation39_spill] sm:$0xff] %v5229_v56 }
 0x376   : > { %v1115_v36 = vpop.xlane.xlu0 %1114 }
 0x377   : > { %3963 = vrcp.f32 %v1115_v36  ;;  %7053 = vst [vmem:[#allocation35_spill] sm:$0xff] %v5214_v59  ;;  %v5235_v36 = vrot.slane %v3523_v60, %v5140_v49 }
 0x378   : > { %3764 = vset.pattern.permute.xlu1 %v6793_v55  ;;  %3763 = vset.pattern.permute.xlu0 %v6781_v38  ;;  %v3958_v13 = vpop.eup %3957 }
 0x379   : > { %2268 = vperm.xlu1 %3764, %v1144_v44   ;;  %2053 = vperm.xlu0 %3763, %v1144_v44   ;;  %v5076_v45 = vmul.f32 %v3958_v13, %v4952_v21  ;;  %v5217_v13 = vrot.slane %v3520_v43, %v5138_v9  ;;  %7058 = vst [vmem:[#allocation40_spill] sm:$0xff] %v5235_v36 }
 0x37a   : > { %v1118_v23 = vpop.xlane.xlu1 %1117 }
 0x37b   : > { %7054 = vst [vmem:[#allocation36_spill] sm:$0xff] %v5217_v13  ;;  %3965 = vrcp.f32 %v1118_v23  ;;  %v5269_v23 = vrot.slane %v3525_v20, %v5149_v63 }
 0x37c   : > { %v3960_v54 = vpop.eup %3959 }
 0x37d   : > { %3766 = vset.pattern.permute.xlu1 %v6787_v10  ;;  %3765 = vset.pattern.permute.xlu0 %v6779_v2  ;;  %v5091_v21 = vmul.f32 %v3960_v54, %v4961_v8  ;;  %v5226_v54 = vrot.slane %v3520_v43, %v5142_v33 }
 0x37e   : > { %2698 = vperm.xlu1 %3766, %v1144_v44   ;;  %2483 = vperm.xlu0 %3765, %v1144_v44  }
 0x37f   : > { %7056 = vst [vmem:[#allocation38_spill] sm:$0xff] %v5226_v54 }
 0x380   : > { %v3962_v8 = vpop.eup %3961 }
 0x381   : > { %v5109_v37 = vmul.f32 %v3962_v8, %v4970_v6  ;;  %v5122_v6 = vpop.xlane.xlu0 %1120  ;;  %v5232_v8 = vrot.slane %v3523_v60, %v5138_v9 }
 0x382   : > { %3768 = vset.pattern.permute.xlu1 %v6785_v19  ;;  %3767 = vset.pattern.permute.xlu0 %v6777_v47  ;;  %v5124_v18 = vpop.xlane.xlu1 %1123  ;;  %3967 = vrcp.f32 %v5122_v6 }
 0x383   : > { %3128 = vperm.xlu1 %3768, %v1144_v44   ;;  %2913 = vperm.xlu0 %3767, %v1144_v44   ;;  %7033 = vst [vmem:[#allocation17_spill] sm:$0xff] %v5109_v37  ;;  %7034 = vst [vmem:[#allocation12_spill] sm:$0xff] %v5124_v18 }
 0x384   : > { %v3964_v30 = vpop.eup %3963 }
 0x385   : > { %v5136_v39 = vmul.f32 %v3964_v30, %v4979_v17  ;;  %v1175_v17 = vld [vmem:[%s6758_s3] ss:$8 sm:$0xf]  ;;  %v5244_v30 = vrot.slane %v3523_v60, %v5149_v63  ;;  %v5263_v60 = vrot.slane %v3525_v20, %v5140_v49 }
 0x386   : > { %v5131_v29 = vpop.xlane.xlu0 %1126  ;;  %v5173_v35 = vrot.slane %v1175_v17, %v5138_v9  ;;  %v5182_v24 = vrot.slane %v1175_v17, %v5140_v49  ;;  %v5185_v16 = vrot.slane %v1175_v17, %v5142_v33  ;;  %v5188_v7 = vrot.slane %v1175_v17, %v5149_v63 }
 0x387   : > { %3769 = vset.pattern.permute.xlu1 %v6789_v31  ;;  %3770 = vset.pattern.permute.xlu0 %v6775_v34  ;;  %7036 = vst [vmem:[#allocation18_spill] sm:$0xff] %v5131_v29  ;;  %v5250_v17 = vrot.slane %v3522_v25, %v5140_v49 }
 0x388   : > { %1183 = vperm.xlu1 %3769, %v1146_v27   ;;  %1412 = vperm.xlu0 %3770, %v1146_v27   ;;  %7043 = vst [vmem:[#allocation25_spill] sm:$0xff] %v5173_v35  ;;  %7045 = vst [vmem:[#allocation27_spill] sm:$0xff] %v5182_v24 }
 0x389   : > { %7046 = vst [vmem:[#allocation28_spill] sm:$0xff] %v5185_v16  ;;  %7047 = vst [vmem:[#allocation29_spill] sm:$0xff] %v5188_v7 }
 0x38a   : > { %v5133_v58 = vpop.xlane.xlu1 %1129  ;;  %7061 = vst [vmem:[#allocation43_spill] sm:$0xff] %v5250_v17 }
 0x38b   : > { %7037 = vst [vmem:[#allocation19_spill] sm:$0xff] %v5133_v58 }
 0x38c   : > { %3771 = vset.pattern.permute.xlu1 %v6783_v32  ;;  %3772 = vset.pattern.permute.xlu0 %v6773_v5 }
 0x38d   : > { %1627 = vperm.xlu1 %3771, %v1146_v27   ;;  %1842 = vperm.xlu0 %3772, %v1146_v27  }
 0x38e   : > { %v5154_v52 = vpop.xlane.xlu0 %1132 }
 0x38f   : > { %7038 = vst [vmem:[#allocation20_spill] sm:$0xff] %v5154_v52 }
 0x391   : > { %3773 = vset.pattern.permute.xlu1 %v6781_v38  ;;  %3774 = vset.pattern.permute.xlu0 %v6793_v55 }
 0x392   : > { %2057 = vperm.xlu1 %3773, %v1146_v27   ;;  %2272 = vperm.xlu0 %3774, %v1146_v27   ;;  %v5156_v46 = vpop.xlane.xlu1 %1135 }
 0x393   : > { %7039 = vst [vmem:[#allocation21_spill] sm:$0xff] %v5156_v46  ;;  %v3986_v46 = vld [vmem:[%s4286_s22 + $0x18] sm:$0xff] }
 0x396   : > { %3775 = vset.pattern.permute.xlu1 %v6779_v2  ;;  %3776 = vset.pattern.permute.xlu0 %v6787_v10  ;;  %v5193_v44 = vpop.xlane.xlu0 %1138 }
 0x397   : > { %2487 = vperm.xlu1 %3775, %v1146_v27   ;;  %2702 = vperm.xlu0 %3776, %v1146_v27   ;;  %7048 = vst [vmem:[#allocation30_spill] sm:$0xff] %v5193_v44 }
 0x39a   : > { %v5195_v3 = vpop.xlane.xlu1 %1141 }
 0x39b   : > { %3777 = vset.pattern.permute.xlu1 %v6777_v47  ;;  %3778 = vset.pattern.permute.xlu0 %v6785_v19  ;;  %7049 = vst [vmem:[#allocation31_spill] sm:$0xff] %v5195_v3  ;;  %v3527_v3 = vld [vmem:[%s6758_s3 + $0x21] ss:$8 sm:$0xf] }
 0x39c   : > { %2917 = vperm.xlu1 %3777, %v1146_v27   ;;  %3132 = vperm.xlu0 %3778, %v1146_v27   ;;  %v5203_v27 = vrot.slane %v3521_v4, %v5140_v49 }
 0x39e   : > { %7051 = vst [vmem:[#allocation33_spill] sm:$0xff] %v5203_v27 }
 0x3a0   : > { %3779 = vset.pattern.permute.xlu1 %v6789_v31  ;;  %3791 = vset.pattern.permute.xlu0 %v6783_v32 }
 0x3a1   : > { %1635 = vperm.xlu0 %3791, %v5076_v45   ;;  %1188 = vperm.xlu1 %3779, %v1148_v11  }
 0x3a5   : > { %3793 = vset.pattern.permute.xlu0 %v6781_v38  ;;  %3780 = vset.pattern.permute.xlu1 %v6775_v34 }
 0x3a6   : > { %2065 = vperm.xlu0 %3793, %v5076_v45   ;;  %1416 = vperm.xlu1 %3780, %v1148_v11  }
 0x3aa   : > { %3795 = vset.pattern.permute.xlu0 %v6779_v2  ;;  %3781 = vset.pattern.permute.xlu1 %v6783_v32 }
 0x3ab   : > { %2495 = vperm.xlu0 %3795, %v5076_v45   ;;  %1631 = vperm.xlu1 %3781, %v1148_v11  }
 0x3af   : > { %3797 = vset.pattern.permute.xlu0 %v6777_v47  ;;  %3782 = vset.pattern.permute.xlu1 %v6773_v5 }
 0x3b0   : > { %2925 = vperm.xlu0 %3797, %v5076_v45   ;;  %1846 = vperm.xlu1 %3782, %v1148_v11  }
 0x3b4   : > { %3800 = vset.pattern.permute.xlu0 %v6775_v34  ;;  %3783 = vset.pattern.permute.xlu1 %v6781_v38 }
 0x3b5   : > { %2061 = vperm.xlu1 %3783, %v1148_v11   ;;  %1424 = vperm.xlu0 %3800, %v5091_v21  }
 0x3b9   : > { %3784 = vset.pattern.permute.xlu1 %v6793_v55  ;;  %3802 = vset.pattern.permute.xlu0 %v6773_v5 }
 0x3ba   : > { %2276 = vperm.xlu1 %3784, %v1148_v11   ;;  %1854 = vperm.xlu0 %3802, %v5091_v21  }
 0x3be   : > { %3785 = vset.pattern.permute.xlu1 %v6779_v2  ;;  %3804 = vset.pattern.permute.xlu0 %v6793_v55 }
 0x3bf   : > { %2491 = vperm.xlu1 %3785, %v1148_v11   ;;  %2284 = vperm.xlu0 %3804, %v5091_v21  }
 0x3c3   : > { %3786 = vset.pattern.permute.xlu1 %v6787_v10  ;;  %3806 = vset.pattern.permute.xlu0 %v6787_v10 }
 0x3c4   : > { %2706 = vperm.xlu1 %3786, %v1148_v11   ;;  %2714 = vperm.xlu0 %3806, %v5091_v21  }
 0x3c8   : > { %3787 = vset.pattern.permute.xlu1 %v6777_v47  ;;  %3808 = vset.pattern.permute.xlu0 %v6785_v19 }
 0x3c9   : > { %2921 = vperm.xlu1 %3787, %v1148_v11   ;;  %3144 = vperm.xlu0 %3808, %v5091_v21  }
 0x3cd   : > { %3788 = vset.pattern.permute.xlu1 %v6785_v19  ;;  %3811 = vset.pattern.permute.xlu0 %v6783_v32 }
 0x3ce   : > { %3136 = vperm.xlu1 %3788, %v1148_v11   ;;  %1643 = vperm.xlu0 %3811, %v5109_v37   ;;  %v5220_v11 = vrot.slane %v3520_v43, %v5140_v49 }
 0x3d0   : > { %7055 = vst [vmem:[#allocation37_spill] sm:$0xff] %v5220_v11 }
 0x3d2   : > { %3789 = vset.pattern.permute.xlu1 %v6789_v31  ;;  %3813 = vset.pattern.permute.xlu0 %v6781_v38  ;;  %v5272_v38 = vrot.slane %v3524_v0, %v5138_v9  ;;  %v5285_v31 = vrot.slane %v3524_v0, %v5142_v33 }
 0x3d3   : > { %1193 = vperm.xlu1 %3789, %v5076_v45   ;;  %2073 = vperm.xlu0 %3813, %v5109_v37  }
 0x3d4   : > { %7065 = vst [vmem:[#allocation47_spill] sm:$0xff] %v5285_v31 }
 0x3d7   : > { %3790 = vset.pattern.permute.xlu1 %v6775_v34  ;;  %3815 = vset.pattern.permute.xlu0 %v6779_v2  ;;  %v5266_v2 = vrot.slane %v3525_v20, %v5142_v33 }
 0x3d8   : > { %1420 = vperm.xlu1 %3790, %v5076_v45   ;;  %2503 = vperm.xlu0 %3815, %v5109_v37  }
 0x3d9   : > { %7063 = vst [vmem:[#allocation45_spill] sm:$0xff] %v5266_v2 }
 0x3dc   : > { %3792 = vset.pattern.permute.xlu1 %v6773_v5  ;;  %3817 = vset.pattern.permute.xlu0 %v6777_v47  ;;  %v5259_v47 = vrot.slane %v3525_v20, %v5138_v9  ;;  %v5282_v20 = vrot.slane %v3524_v0, %v5140_v49 }
 0x3dd   : > { %1850 = vperm.xlu1 %3792, %v5076_v45   ;;  %2933 = vperm.xlu0 %3817, %v5109_v37  }
 0x3de   : > { %7064 = vst [vmem:[#allocation46_spill] sm:$0xff] %v5282_v20 }
 0x3e1   : > { %3794 = vset.pattern.permute.xlu1 %v6793_v55  ;;  %3820 = vset.pattern.permute.xlu0 %v6775_v34  ;;  %v5256_v34 = vrot.slane %v3522_v25, %v5149_v63 }
 0x3e2   : > { %2280 = vperm.xlu1 %3794, %v5076_v45   ;;  %1432 = vperm.xlu0 %3820, %v5136_v39  }
 0x3e6   : > { %3796 = vset.pattern.permute.xlu1 %v6787_v10  ;;  %3822 = vset.pattern.permute.xlu0 %v6773_v5  ;;  %v5253_v5 = vrot.slane %v3522_v25, %v5142_v33 }
 0x3e7   : > { %2710 = vperm.xlu1 %3796, %v5076_v45   ;;  %1862 = vperm.xlu0 %3822, %v5136_v39  }
 0x3e8   : > { %7062 = vst [vmem:[#allocation44_spill] sm:$0xff] %v5253_v5 }
 0x3ea   : > { %v1409_v4 = vpop.permute.xlu1 %1408  ;;  %v1179_v43 = vpop.permute.xlu0 %1178 }
 0x3eb   : > { %3798 = vset.pattern.permute.xlu1 %v6785_v19  ;;  %v1277_v25 = vmul.f32 %v5173_v35, %v1179_v43  ;;  %v1278_v32 = vmul.f32 %v5182_v24, %v1179_v43  ;;  %v1279_v19 = vmul.f32 %v5185_v16, %v1179_v43  ;;  %v1280_v10 = vmul.f32 %v5188_v7, %v1179_v43  ;;  %v3983_v43 = vld [vmem:[%s4286_s22] sm:$0xff] }
 0x3ec   : > { %3824 = vset.pattern.permute.xlu0 %v6793_v55  ;;  %3140 = vperm.xlu1 %3798, %v5076_v45   ;;  %v3984_v55 = vld [vmem:[%s4286_s22 + $0x8] sm:$0xff]  ;;  %v3985_v45 = vld [vmem:[%s4286_s22 + $0x10] sm:$0xff]  ;;  %v1492_v52 = vmul.f32 %v5164_v57, %v1409_v4  ;;  %v1493_v1 = vmul.f32 %v5167_v61, %v1409_v4  ;;  %v1494_v58 = vmul.f32 %v5170_v53, %v1409_v4 }
 0x3ed   : > { %2292 = vperm.xlu0 %3824, %v5136_v39   ;;  %v1341_v62 = vadd.f32 %v3983_v43, %v1277_v25  ;;  %v1342_v44 = vadd.f32 %v3984_v55, %v1278_v32  ;;  %v1343_v51 = vadd.f32 %v3985_v45, %v1279_v19  ;;  %v1344_v42 = vadd.f32 %v3986_v46, %v1280_v10 }
 0x3ee   : > { %v1495_v0 = vmul.f32 %v5179_v50, %v1409_v4  ;;  %v5303_v25 = vrot.slane %v3527_v3, %v5138_v9  ;;  %v5306_v32 = vrot.slane %v3527_v3, %v5140_v49  ;;  %v5309_v55 = vrot.slane %v3527_v3, %v5142_v33  ;;  %v3526_v50 = vld [vmem:[%s6758_s3 + $0x20] ss:$8 sm:$0xf] }
 0x3ef   : > { %v1839_v15 = vpop.permute.xlu1 %1838  ;;  %v1624_v29 = vpop.permute.xlu0 %1623  ;;  %v1556_v10 = vadd.f32 %v1492_v52, %v1341_v62  ;;  %v1557_v19 = vadd.f32 %v1493_v1, %v1342_v44  ;;  %v1558_v46 = vadd.f32 %v1494_v58, %v1343_v51  ;;  %v7067_v45 = vmov 0  }
 0x3f0   : > { %v1922_v40 = vmul.f32 %v5200_v14, %v1839_v15  ;;  %7066 = vst [vmem:[#allocation48_spill] sm:$0xff] %v5309_v55  ;;  %v1559_v43 = vadd.f32 %v1495_v0, %v1344_v42  ;;  %3799 = vset.pattern.permute.xlu1 %v7067_v45  ;;  %v1707_v4 = vmul.f32 %v5217_v13, %v1624_v29  ;;  %v7068_v14 = vmov 7  }
 0x3f1   : > { %v1708_v18 = vmul.f32 %v5220_v11, %v1624_v29  ;;  %v1709_v37 = vmul.f32 %v5226_v54, %v1624_v29  ;;  %v1710_v48 = vmul.f32 %v5229_v56, %v1624_v29  ;;  %3826 = vset.pattern.permute.xlu0 %v7068_v14  ;;  %v1923_v1 = vmul.f32 %v5203_v27, %v1839_v15 }
 0x3f2   : > { %v1924_v42 = vmul.f32 %v5206_v41, %v1839_v15  ;;  %v1925_v51 = vmul.f32 %v5214_v59, %v1839_v15  ;;  %1198 = vperm.xlu1 %3799, %v5091_v21   ;;  %2722 = vperm.xlu0 %3826, %v5136_v39   ;;  %v1771_v62 = vadd.f32 %v1707_v4, %v1556_v10 }
 0x3f3   : > { %v1772_v58 = vadd.f32 %v1708_v18, %v1557_v19  ;;  %v1773_v52 = vadd.f32 %v1709_v37, %v1558_v46  ;;  %v1774_v29 = vadd.f32 %v1710_v48, %v1559_v43  ;;  %v5327_v45 = vrot.slane %v3527_v3, %v5149_v63  ;;  %v3966_v18 = vpop.eup %3965 }
 0x3f4   : > { %v2269_v44 = vpop.permute.xlu1 %2268  ;;  %v2054_v0 = vpop.permute.xlu0 %2053  ;;  %v5330_v27 = vrot.slane %v3526_v50, %v5138_v9  ;;  %v5333_v15 = vrot.slane %v3526_v50, %v5140_v49  ;;  %v1986_v59 = vadd.f32 %v1922_v40, %v1771_v62  ;;  %v7069_v46 = vmov 2  }
 0x3f5   : > { %v2352_v14 = vmul.f32 %v5232_v8, %v2269_v44  ;;  %v1987_v41 = vadd.f32 %v1923_v1, %v1772_v58  ;;  %v1988_v56 = vadd.f32 %v1924_v42, %v1773_v52  ;;  %v1989_v10 = vadd.f32 %v1925_v51, %v1774_v29 }
 0x3f6   : > { %v2137_v48 = vmul.f32 %v5247_v26, %v2054_v0  ;;  %v2138_v37 = vmul.f32 %v5250_v17, %v2054_v0  ;;  %v2139_v19 = vmul.f32 %v5253_v5, %v2054_v0  ;;  %v2140_v3 = vmul.f32 %v5256_v34, %v2054_v0  ;;  %3801 = vset.pattern.permute.xlu1 %v7069_v46 }
 0x3f7   : > { %v2353_v9 = vmul.f32 %v5235_v36, %v2269_v44  ;;  %v2354_v49 = vmul.f32 %v5241_v22, %v2269_v44  ;;  %v2355_v40 = vmul.f32 %v5244_v30, %v2269_v44  ;;  %v7070_v43 = vmov 9   ;;  %1639 = vperm.xlu1 %3801, %v5091_v21  }
 0x3f8   : > { %3828 = vset.pattern.permute.xlu0 %v7070_v43  ;;  %v2201_v4 = vadd.f32 %v2137_v48, %v1986_v59  ;;  %v2202_v1 = vadd.f32 %v2138_v37, %v1987_v41  ;;  %v2203_v42 = vadd.f32 %v2139_v19, %v1988_v56  ;;  %v2204_v51 = vadd.f32 %v2140_v3, %v1989_v10 }
 0x3f9   : > { %3152 = vperm.xlu0 %3828, %v5136_v39   ;;  %v2699_v62 = vpop.permute.xlu1 %2698  ;;  %v2484_v58 = vpop.permute.xlu0 %2483  ;;  %v5347_v52 = vmul.f32 %v3966_v18, %v4988_v12  ;;  %v5351_v0 = vrot.slane %v3526_v50, %v5142_v33  ;;  %v5354_v44 = vrot.slane %v3526_v50, %v5149_v63  ;;  %v7072_v18 = vmov 4  }
 0x3fa   : > { %v2782_v29 = vmul.f32 %v5259_v47, %v2699_v62  ;;  %v2416_v43 = vadd.f32 %v2352_v14, %v2201_v4  ;;  %v2417_v59 = vadd.f32 %v2353_v9, %v2202_v1  ;;  %v2418_v41 = vadd.f32 %v2354_v49, %v2203_v42 }
 0x3fb   : > { %7071 = vst [vmem:[#allocation49_spill] sm:$0xff] %v5347_v52  ;;  %v2419_v56 = vadd.f32 %v2355_v40, %v2204_v51  ;;  %v2567_v10 = vmul.f32 %v5272_v38, %v2484_v58  ;;  %v2568_v48 = vmul.f32 %v5282_v20, %v2484_v58  ;;  %v2569_v37 = vmul.f32 %v5285_v31, %v2484_v58 }
 0x3fc   : > { %v2570_v12 = vmul.f32 %v5288_v28, %v2484_v58  ;;  %3803 = vset.pattern.permute.xlu1 %v7072_v18  ;;  %v2783_v33 = vmul.f32 %v5263_v60, %v2699_v62  ;;  %v2784_v63 = vmul.f32 %v5266_v2, %v2699_v62  ;;  %v2785_v50 = vmul.f32 %v5269_v23, %v2699_v62 }
 0x3fd   : > { %3831 = vset.pattern.permute.xlu0 %v7069_v46  ;;  %2069 = vperm.xlu1 %3803, %v5091_v21   ;;  %v2631_v14 = vadd.f32 %v2567_v10, %v2416_v43  ;;  %v2632_v19 = vadd.f32 %v2568_v48, %v2417_v59  ;;  %v2633_v3 = vadd.f32 %v2569_v37, %v2418_v41  ;;  %v7073_v59 = vmov 6  }
 0x3fe   : > { %v2634_v9 = vadd.f32 %v2570_v12, %v2419_v56  ;;  %1651 = vperm.xlu0 %3831, %v5347_v52   ;;  %v3129_v49 = vpop.permute.xlu1 %3128  ;;  %v2914_v40 = vpop.permute.xlu0 %2913 }
 0x3ff   : > { %v3212_v6 = vmul.f32 %v5303_v25, %v3129_v49  ;;  %v2846_v4 = vadd.f32 %v2782_v29, %v2631_v14  ;;  %v2847_v1 = vadd.f32 %v2783_v33, %v2632_v19  ;;  %v2848_v42 = vadd.f32 %v2784_v63, %v2633_v3 }
 0x400   : > { %v2849_v51 = vadd.f32 %v2785_v50, %v2634_v9  ;;  %v2997_v62 = vmul.f32 %v5330_v27, %v2914_v40  ;;  %v2998_v58 = vmul.f32 %v5333_v15, %v2914_v40  ;;  %v2999_v46 = vmul.f32 %v5351_v0, %v2914_v40 }
 0x401   : > { %v3000_v43 = vmul.f32 %v5354_v44, %v2914_v40  ;;  %3805 = vset.pattern.permute.xlu1 %v7073_v59  ;;  %v3213_v41 = vmul.f32 %v5306_v32, %v3129_v49  ;;  %v3214_v56 = vmul.f32 %v5309_v55, %v3129_v49  ;;  %v3215_v10 = vmul.f32 %v5327_v45, %v3129_v49 }
 0x402   : > { %3833 = vset.pattern.permute.xlu0 %v7072_v18  ;;  %2499 = vperm.xlu1 %3805, %v5091_v21   ;;  %v3061_v29 = vadd.f32 %v2997_v62, %v2846_v4  ;;  %v3062_v48 = vadd.f32 %v2998_v58, %v2847_v1  ;;  %v3063_v37 = vadd.f32 %v2999_v46, %v2848_v42  ;;  %v3987_v4 = vld [vmem:[%s4286_s22 + $0x20] sm:$0xff]  ;;  %v3988_v42 = vld [vmem:[%s4286_s22 + $0x28] sm:$0xff]  ;;  %v3989_v62 = vld [vmem:[%s4286_s22 + $0x30] sm:$0xff] }
 0x403   : > { %v3064_v12 = vadd.f32 %v3000_v43, %v2849_v51  ;;  %2081 = vperm.xlu0 %3833, %v5347_v52   ;;  %v1184_v33 = vpop.permute.xlu1 %1183  ;;  %v1413_v63 = vpop.permute.xlu0 %1412  ;;  %v3990_v43 = vld [vmem:[%s4286_s22 + $0x38] sm:$0xff] }
 0x404   : > { %v1281_v50 = vmul.f32 %v5173_v35, %v1184_v33  ;;  %v1282_v14 = vmul.f32 %v5182_v24, %v1184_v33  ;;  %v1283_v19 = vmul.f32 %v5185_v16, %v1184_v33  ;;  %v1284_v3 = vmul.f32 %v5188_v7, %v1184_v33 }
 0x405   : > { %v3276_v9 = vadd.f32 %v3212_v6, %v3061_v29  ;;  %v3277_v49 = vadd.f32 %v3213_v41, %v3062_v48  ;;  %v3278_v40 = vadd.f32 %v3214_v56, %v3063_v37  ;;  %v3279_v46 = vadd.f32 %v3215_v10, %v3064_v12  ;;  %v7075_v10 = vld [vmem:[#allocation26_spill] sm:$0xff] }
 0x406   : > { %v1345_v1 = vadd.f32 %v3987_v4, %v1281_v50  ;;  %v1346_v51 = vadd.f32 %v3988_v42, %v1282_v14  ;;  %v1347_v58 = vadd.f32 %v3989_v62, %v1283_v19  ;;  %v1348_v18 = vadd.f32 %v3990_v43, %v1284_v3  ;;  %v3968_v19 = vpop.eup %3967  ;;  %v7079_v62 = vld [vmem:[#allocation34_spill] sm:$0xff] }
 0x407   : > { %v7074_v35 = vmov 8   ;;  %3340 = vst [vmem:[%s5391_s6] sm:$0xff] %v3276_v9  ;;  %3341 = vst [vmem:[%s5391_s6 + $0x8] sm:$0xff] %v3277_v49  ;;  %v1496_v6 = vmul.f32 %v5164_v57, %v1413_v63  ;;  %v1497_v41 = vmul.f32 %v5167_v61, %v1413_v63  ;;  %v1498_v56 = vmul.f32 %v5170_v53, %v1413_v63  ;;  %3835 = vset.pattern.permute.xlu0 %v7073_v59  ;;  %v7080_v59 = vld [vmem:[#allocation35_spill] sm:$0xff] }
 0x408   : > { %3807 = vset.pattern.permute.xlu1 %v7074_v35  ;;  %3342 = vst [vmem:[%s5391_s6 + $0x10] sm:$0xff] %v3278_v40  ;;  %3343 = vst [vmem:[%s5391_s6 + $0x18] sm:$0xff] %v3279_v46  ;;  %v1499_v29 = vmul.f32 %v7075_v10, %v1413_v63  ;;  %2511 = vperm.xlu0 %3835, %v5347_v52   ;;  %v1628_v48 = vpop.permute.xlu1 %1627  ;;  %v1843_v37 = vpop.permute.xlu0 %1842  ;;  %v7076_v63 = vld [vmem:[#allocation39_spill] sm:$0xff]  ;;  %v7077_v46 = vld [vmem:[#allocation32_spill] sm:$0xff] }
 0x409   : > { %2929 = vperm.xlu1 %3807, %v5091_v21   ;;  %v1560_v12 = vadd.f32 %v1496_v6, %v1345_v1  ;;  %v1561_v33 = vadd.f32 %v1497_v41, %v1346_v51  ;;  %v1562_v50 = vadd.f32 %v1498_v56, %v1347_v58  ;;  %v1711_v3 = vmul.f32 %v5217_v13, %v1628_v48  ;;  %v7078_v21 = vld [vmem:[#allocation33_spill] sm:$0xff] }
 0x40a   : > { %v1563_v14 = vadd.f32 %v1499_v29, %v1348_v18  ;;  %v1712_v9 = vmul.f32 %v5220_v11, %v1628_v48  ;;  %v1713_v49 = vmul.f32 %v5226_v54, %v1628_v48  ;;  %v1714_v40 = vmul.f32 %v7076_v63, %v1628_v48  ;;  %v7082_v56 = vld [vmem:[#allocation13_spill] sm:$0xff] }
 0x40b   : > { %v1926_v4 = vmul.f32 %v7077_v46, %v1843_v37  ;;  %v1927_v42 = vmul.f32 %v7078_v21, %v1843_v37  ;;  %v1928_v43 = vmul.f32 %v7079_v62, %v1843_v37  ;;  %v1929_v1 = vmul.f32 %v7080_v59, %v1843_v37  ;;  %v7084_v48 = vld [vmem:[#allocation17_spill] sm:$0xff] }
 0x40c   : > { %v1775_v51 = vadd.f32 %v1711_v3, %v1560_v12  ;;  %v1776_v58 = vadd.f32 %v1712_v9, %v1561_v33  ;;  %v1777_v18 = vadd.f32 %v1713_v49, %v1562_v50  ;;  %v1778_v6 = vadd.f32 %v1714_v40, %v1563_v14  ;;  %3837 = vset.pattern.permute.xlu0 %v7074_v35 }
 0x40d   : > { %v7081_v41 = vmov 0   ;;  %v5414_v29 = vmul.f32 %v3968_v19, %v7082_v56  ;;  %v2058_v46 = vpop.permute.xlu1 %2057  ;;  %v2273_v63 = vpop.permute.xlu0 %2272  ;;  %2941 = vperm.xlu0 %3837, %v5347_v52  }
 0x40e   : > { %3809 = vset.pattern.permute.xlu1 %v7081_v41  ;;  %v1990_v21 = vadd.f32 %v1926_v4, %v1775_v51  ;;  %v1991_v54 = vadd.f32 %v1927_v42, %v1776_v58  ;;  %v1992_v62 = vadd.f32 %v1928_v43, %v1777_v18  ;;  %v1993_v11 = vadd.f32 %v1929_v1, %v1778_v6 }
 0x40f   : > { %7083 = vst [vmem:[#allocation13_spill] sm:$0xff] %v5414_v29  ;;  %1203 = vperm.xlu1 %3809, %v7084_v48   ;;  %v2141_v37 = vmul.f32 %v5247_v26, %v2058_v46  ;;  %v2142_v12 = vmul.f32 %v5250_v17, %v2058_v46  ;;  %v2143_v33 = vmul.f32 %v5253_v5, %v2058_v46  ;;  %v7085_v43 = vmov 1  }
 0x410   : > { %v2144_v50 = vmul.f32 %v5256_v34, %v2058_v46  ;;  %v2356_v14 = vmul.f32 %v5232_v8, %v2273_v63  ;;  %v2357_v19 = vmul.f32 %v5235_v36, %v2273_v63  ;;  %v2358_v3 = vmul.f32 %v5241_v22, %v2273_v63 }
 0x411   : > { %v2359_v9 = vmul.f32 %v5244_v30, %v2273_v63  ;;  %v2205_v49 = vadd.f32 %v2141_v37, %v1990_v21  ;;  %v2206_v40 = vadd.f32 %v2142_v12, %v1991_v54  ;;  %v2207_v4 = vadd.f32 %v2143_v33, %v1992_v62  ;;  %3840 = vset.pattern.permute.xlu0 %v7085_v43 }
 0x412   : > { %v2208_v42 = vadd.f32 %v2144_v50, %v1993_v11  ;;  %v2488_v1 = vpop.permute.xlu1 %2487  ;;  %v2703_v46 = vpop.permute.xlu0 %2702  ;;  %1440 = vperm.xlu0 %3840, %v5414_v29  }
 0x413   : > { %3810 = vset.pattern.permute.xlu1 %v7085_v43  ;;  %v2420_v51 = vadd.f32 %v2356_v14, %v2205_v49  ;;  %v2421_v58 = vadd.f32 %v2357_v19, %v2206_v40  ;;  %v2422_v18 = vadd.f32 %v2358_v3, %v2207_v4  ;;  %v2571_v63 = vmul.f32 %v5272_v38, %v2488_v1 }
 0x414   : > { %1428 = vperm.xlu1 %3810, %v7084_v48   ;;  %v2423_v6 = vadd.f32 %v2359_v9, %v2208_v42  ;;  %v2572_v54 = vmul.f32 %v5282_v20, %v2488_v1  ;;  %v2573_v11 = vmul.f32 %v5285_v31, %v2488_v1  ;;  %v2574_v21 = vmul.f32 %v5288_v28, %v2488_v1  ;;  %v7087_v9 = vld [vmem:[#allocation12_spill] sm:$0xff] }
 0x415   : > { %v2786_v62 = vmul.f32 %v5259_v47, %v2703_v46  ;;  %v2787_v56 = vmul.f32 %v5263_v60, %v2703_v46  ;;  %v2788_v37 = vmul.f32 %v5266_v2, %v2703_v46  ;;  %v2789_v12 = vmul.f32 %v5269_v23, %v2703_v46 }
 0x416   : > { %v2635_v33 = vadd.f32 %v2571_v63, %v2420_v51  ;;  %v2636_v50 = vadd.f32 %v2572_v54, %v2421_v58  ;;  %v2637_v14 = vadd.f32 %v2573_v11, %v2422_v18  ;;  %v2638_v19 = vadd.f32 %v2574_v21, %v2423_v6 }
 0x417   : > { %v7086_v3 = vmov 3   ;;  %3969 = vrcp.f32 %v7087_v9  ;;  %v2918_v49 = vpop.permute.xlu1 %2917  ;;  %v3133_v40 = vpop.permute.xlu0 %3132 }
 0x418   : > { %3812 = vset.pattern.permute.xlu1 %v7086_v3  ;;  %3842 = vset.pattern.permute.xlu0 %v7086_v3  ;;  %v2850_v4 = vadd.f32 %v2786_v62, %v2635_v33  ;;  %v2851_v42 = vadd.f32 %v2787_v56, %v2636_v50  ;;  %v2852_v1 = vadd.f32 %v2788_v37, %v2637_v14 }
 0x419   : > { %1858 = vperm.xlu1 %3812, %v7084_v48   ;;  %v2853_v52 = vadd.f32 %v2789_v12, %v2638_v19  ;;  %1870 = vperm.xlu0 %3842, %v5414_v29   ;;  %v3001_v46 = vmul.f32 %v5330_v27, %v2918_v49  ;;  %v3002_v51 = vmul.f32 %v5333_v15, %v2918_v49  ;;  %v7088_v12 = vmov 5  }
 0x41a   : > { %v3003_v58 = vmul.f32 %v5351_v0, %v2918_v49  ;;  %v3004_v18 = vmul.f32 %v5354_v44, %v2918_v49  ;;  %v3216_v6 = vmul.f32 %v5303_v25, %v3133_v40  ;;  %v3217_v63 = vmul.f32 %v5306_v32, %v3133_v40 }
 0x41b   : > { %v3218_v54 = vmul.f32 %v5309_v55, %v3133_v40  ;;  %v3219_v11 = vmul.f32 %v5327_v45, %v3133_v40  ;;  %v3065_v21 = vadd.f32 %v3001_v46, %v2850_v4  ;;  %v3066_v62 = vadd.f32 %v3002_v51, %v2851_v42 }
 0x41c   : > { %v3067_v56 = vadd.f32 %v3003_v58, %v2852_v1  ;;  %v3068_v37 = vadd.f32 %v3004_v18, %v2853_v52  ;;  %v1189_v33 = vpop.permute.xlu1 %1188  ;;  %v5455_v50 = vpop.permute.xlu0 %1635  ;;  %v7090_v52 = vmov 7   ;;  %v7092_v1 = vmov 9   ;;  %v7094_v58 = vld [vmem:[#allocation8_spill] sm:$0xff] }
 0x41d   : > { %3814 = vset.pattern.permute.xlu1 %v7088_v12  ;;  %3844 = vset.pattern.permute.xlu0 %v7088_v12  ;;  %7089 = vst [vmem:[#allocation17_spill] sm:$0xff] %v5455_v50  ;;  %v3280_v14 = vadd.f32 %v3216_v6, %v3065_v21  ;;  %v3281_v19 = vadd.f32 %v3217_v63, %v3066_v62  ;;  %v7099_v21 = vld [vmem:[#allocation25_spill] sm:$0xff]  ;;  %v7109_v12 = vmov 6  }
 0x41e   : > { %2288 = vperm.xlu1 %3814, %v7084_v48   ;;  %v3282_v9 = vadd.f32 %v3218_v54, %v3067_v56  ;;  %v3283_v49 = vadd.f32 %v3219_v11, %v3068_v37  ;;  %2300 = vperm.xlu0 %3844, %v5414_v29   ;;  %v7098_v11 = vld [vmem:[#allocation18_spill] sm:$0xff]  ;;  %v1285_v62 = vmul.f32 %v7099_v21, %v1189_v33  ;;  %v7102_v50 = vld [vmem:[#allocation37_spill] sm:$0xff] }
 0x41f   : > { %3344 = vst [vmem:[%s5391_s6 + $0x20] sm:$0xff] %v3280_v14  ;;  %3345 = vst [vmem:[%s5391_s6 + $0x28] sm:$0xff] %v3281_v19  ;;  %3971 = vrcp.f32 %v7098_v11  ;;  %v1286_v56 = vmul.f32 %v5182_v24, %v1189_v33  ;;  %v1287_v37 = vmul.f32 %v5185_v16, %v1189_v33  ;;  %v1288_v14 = vmul.f32 %v5188_v7, %v1189_v33  ;;  %v3991_v11 = vld [vmem:[%s4286_s22 + $0x40] sm:$0xff] }
 0x420   : > { %3346 = vst [vmem:[%s5391_s6 + $0x30] sm:$0xff] %v3282_v9  ;;  %3347 = vst [vmem:[%s5391_s6 + $0x38] sm:$0xff] %v3283_v49  ;;  %v7105_v16 = vld [vmem:[#allocation32_spill] sm:$0xff] }
 0x421   : > { %v1417_v40 = vpop.permute.xlu1 %1416  ;;  %v5465_v4 = vpop.permute.xlu0 %2065 }
 0x422   : > { %3816 = vset.pattern.permute.xlu1 %v7090_v52  ;;  %3846 = vset.pattern.permute.xlu0 %v7090_v52  ;;  %7091 = vst [vmem:[#allocation12_spill] sm:$0xff] %v5465_v4  ;;  %v1500_v9 = vmul.f32 %v5164_v57, %v1417_v40  ;;  %v1501_v49 = vmul.f32 %v5167_v61, %v1417_v40 }
 0x423   : > { %2718 = vperm.xlu1 %3816, %v7084_v48   ;;  %2730 = vperm.xlu0 %3846, %v5414_v29  }
 0x424   : > { %v3970_v42 = vpop.eup %3969 }
 0x425   : > { %v5475_v18 = vmul.f32 %v3970_v42, %v7094_v58  ;;  %v1502_v42 = vmul.f32 %v5170_v53, %v1417_v40  ;;  %v7101_v58 = vmov 4   ;;  %v3994_v53 = vld [vmem:[%s4286_s22 + $0x58] sm:$0xff] }
 0x426   : > { %v1632_v46 = vpop.permute.xlu1 %1631  ;;  %v5472_v51 = vpop.permute.xlu0 %2495  ;;  %v1352_v57 = vadd.f32 %v3994_v53, %v1288_v14 }
 0x427   : > { %3818 = vset.pattern.permute.xlu1 %v7092_v1  ;;  %3848 = vset.pattern.permute.xlu0 %v7092_v1  ;;  %7093 = vst [vmem:[#allocation50_spill] sm:$0xff] %v5472_v51  ;;  %7095 = vst [vmem:[#allocation8_spill] sm:$0xff] %v5475_v18  ;;  %v3993_v51 = vld [vmem:[%s4286_s22 + $0x50] sm:$0xff]  ;;  %v1715_v1 = vmul.f32 %v5217_v13, %v1632_v46  ;;  %v1716_v61 = vmul.f32 %v7102_v50, %v1632_v46 }
 0x428   : > { %3148 = vperm.xlu1 %3818, %v7084_v48   ;;  %3160 = vperm.xlu0 %3848, %v5414_v29   ;;  %v7097_v48 = vmov 2   ;;  %v1503_v29 = vmul.f32 %v7075_v10, %v1417_v40  ;;  %v1351_v4 = vadd.f32 %v3993_v51, %v1287_v37  ;;  %v7104_v40 = vld [vmem:[#allocation39_spill] sm:$0xff]  ;;  %v7107_v37 = vld [vmem:[#allocation34_spill] sm:$0xff] }
 0x429   : > { %v1718_v10 = vmul.f32 %v7104_v40, %v1632_v46 }
 0x42a   : > { %v1566_v7 = vadd.f32 %v1502_v42, %v1351_v4 }
 0x42b   : > { %v1847_v6 = vpop.permute.xlu1 %1846  ;;  %v5481_v63 = vpop.permute.xlu0 %2925 }
 0x42c   : > { %3819 = vset.pattern.permute.xlu1 %v7081_v41  ;;  %3849 = vset.pattern.permute.xlu0 %v7081_v41  ;;  %7096 = vst [vmem:[#allocation51_spill] sm:$0xff] %v5481_v63  ;;  %v1349_v63 = vadd.f32 %v3991_v11, %v1285_v62  ;;  %v7103_v62 = vld [vmem:[#allocation38_spill] sm:$0xff]  ;;  %v1930_v24 = vmul.f32 %v7105_v16, %v1847_v6  ;;  %v3972_v42 = vpop.eup %3971 }
 0x42d   : > { %1208 = vperm.xlu1 %3819, %v5136_v39   ;;  %1223 = vperm.xlu0 %3849, %v5475_v18   ;;  %v1717_v11 = vmul.f32 %v7103_v62, %v1632_v46  ;;  %v1932_v13 = vmul.f32 %v7107_v37, %v1847_v6  ;;  %v1933_v50 = vmul.f32 %v7080_v59, %v1847_v6 }
 0x430   : > { %v2062_v54 = vpop.permute.xlu1 %2061  ;;  %v5492_v19 = vpop.permute.xlu0 %1424 }
 0x431   : > { %3821 = vset.pattern.permute.xlu1 %v7097_v48  ;;  %3851 = vset.pattern.permute.xlu0 %v7097_v48  ;;  %7100 = vst [vmem:[#allocation18_spill] sm:$0xff] %v5492_v19  ;;  %v3992_v48 = vld [vmem:[%s4286_s22 + $0x48] sm:$0xff]  ;;  %v2145_v46 = vmul.f32 %v5247_v26, %v2062_v54 }
 0x432   : > { %1647 = vperm.xlu1 %3821, %v5136_v39   ;;  %1659 = vperm.xlu0 %3851, %v5475_v18   ;;  %v1350_v19 = vadd.f32 %v3992_v48, %v1286_v56  ;;  %v1567_v48 = vadd.f32 %v1503_v29, %v1352_v57  ;;  %v7106_v56 = vld [vmem:[#allocation33_spill] sm:$0xff]  ;;  %v1781_v57 = vadd.f32 %v1717_v11, %v1566_v7 }
 0x433   : > { %v1931_v51 = vmul.f32 %v7106_v56, %v1847_v6 }
 0x434   : > { %v1565_v52 = vadd.f32 %v1501_v49, %v1350_v19  ;;  %v1782_v29 = vadd.f32 %v1718_v10, %v1567_v48  ;;  %v2147_v19 = vmul.f32 %v5253_v5, %v2062_v54 }
 0x435   : > { %v2277_v33 = vpop.permute.xlu1 %2276  ;;  %v5514_v21 = vpop.permute.xlu0 %1854 }
 0x436   : > { %3823 = vset.pattern.permute.xlu1 %v7101_v58  ;;  %3853 = vset.pattern.permute.xlu0 %v7101_v58  ;;  %v1564_v58 = vadd.f32 %v1500_v9, %v1349_v63  ;;  %7108 = vst [vmem:[#allocation52_spill] sm:$0xff] %v5514_v21  ;;  %v1780_v14 = vadd.f32 %v1716_v61, %v1565_v52 }
 0x437   : > { %2077 = vperm.xlu1 %3823, %v5136_v39   ;;  %2089 = vperm.xlu0 %3853, %v5475_v18   ;;  %v2146_v63 = vmul.f32 %v5250_v17, %v2062_v54  ;;  %v2148_v9 = vmul.f32 %v5256_v34, %v2062_v54  ;;  %v1996_v61 = vadd.f32 %v1932_v13, %v1781_v57 }
 0x438   : > { %v1779_v53 = vadd.f32 %v1715_v1, %v1564_v58  ;;  %v1995_v1 = vadd.f32 %v1931_v51, %v1780_v14  ;;  %v1997_v52 = vadd.f32 %v1933_v50, %v1782_v29  ;;  %v2360_v49 = vmul.f32 %v5232_v8, %v2277_v33  ;;  %v7111_v14 = vld [vmem:[#allocation14_spill] sm:$0xff] }
 0x439   : > { %v2361_v21 = vmul.f32 %v5235_v36, %v2277_v33  ;;  %v2362_v7 = vmul.f32 %v5241_v22, %v2277_v33  ;;  %v2363_v10 = vmul.f32 %v5244_v30, %v2277_v33  ;;  %v2211_v48 = vadd.f32 %v2147_v19, %v1996_v61 }
 0x43a   : > { %v2492_v4 = vpop.permute.xlu1 %2491  ;;  %v1994_v6 = vadd.f32 %v1930_v24, %v1779_v53  ;;  %v2210_v11 = vadd.f32 %v2146_v63, %v1995_v1  ;;  %v5530_v54 = vpop.permute.xlu0 %2284  ;;  %v2212_v50 = vadd.f32 %v2148_v9, %v1997_v52 }
 0x43b   : > { %3825 = vset.pattern.permute.xlu1 %v7109_v12  ;;  %3855 = vset.pattern.permute.xlu0 %v7109_v12  ;;  %v2575_v24 = vmul.f32 %v5272_v38, %v2492_v4  ;;  %7110 = vst [vmem:[#allocation53_spill] sm:$0xff] %v5530_v54  ;;  %v2576_v51 = vmul.f32 %v5282_v20, %v2492_v4 }
 0x43c   : > { %2507 = vperm.xlu1 %3825, %v5136_v39   ;;  %2519 = vperm.xlu0 %3855, %v5475_v18   ;;  %v2209_v58 = vadd.f32 %v2145_v46, %v1994_v6  ;;  %v2577_v53 = vmul.f32 %v5285_v31, %v2492_v4  ;;  %v2578_v33 = vmul.f32 %v5288_v28, %v2492_v4 }
 0x43d   : > { %v5539_v46 = vmul.f32 %v3972_v42, %v7111_v14  ;;  %v2425_v29 = vadd.f32 %v2361_v21, %v2210_v11  ;;  %v2426_v63 = vadd.f32 %v2362_v7, %v2211_v48  ;;  %v2427_v19 = vadd.f32 %v2363_v10, %v2212_v50 }
 0x43e   : > { %v2424_v57 = vadd.f32 %v2360_v49, %v2209_v58  ;;  %v7113_v49 = vld [vmem:[#allocation49_spill] sm:$0xff] }
 0x43f   : > { %v2707_v13 = vpop.permute.xlu1 %2706  ;;  %7112 = vst [vmem:[#allocation14_spill] sm:$0xff] %v5539_v46  ;;  %v2640_v4 = vadd.f32 %v2576_v51, %v2425_v29  ;;  %v2641_v52 = vadd.f32 %v2577_v53, %v2426_v63  ;;  %v5548_v42 = vpop.permute.xlu0 %2714 }
 0x440   : > { %3827 = vset.pattern.permute.xlu1 %v7074_v35  ;;  %3857 = vset.pattern.permute.xlu0 %v7074_v35  ;;  %v2790_v6 = vmul.f32 %v5259_v47, %v2707_v13  ;;  %v2791_v9 = vmul.f32 %v5263_v60, %v2707_v13  ;;  %v2792_v1 = vmul.f32 %v5266_v2, %v2707_v13 }
 0x441   : > { %2937 = vperm.xlu1 %3827, %v5136_v39   ;;  %2949 = vperm.xlu0 %3857, %v5475_v18   ;;  %v2639_v39 = vadd.f32 %v2575_v24, %v2424_v57  ;;  %v2793_v61 = vmul.f32 %v5269_v23, %v2707_v13  ;;  %v2642_v18 = vadd.f32 %v2578_v33, %v2427_v19 }
 0x442   : > { %7114 = vst [vmem:[#allocation49_spill] sm:$0xff] %v5548_v42  ;;  %v2855_v24 = vadd.f32 %v2791_v9, %v2640_v4  ;;  %v2856_v13 = vadd.f32 %v2792_v1, %v2641_v52  ;;  %v7117_v52 = vmov 5  }
 0x443   : > { %v2854_v48 = vadd.f32 %v2790_v6, %v2639_v39  ;;  %v2857_v50 = vadd.f32 %v2793_v61, %v2642_v18  ;;  %v7115_v6 = vld [vmem:[#allocation19_spill] sm:$0xff] }
 0x444   : > { %v2922_v21 = vpop.permute.xlu1 %2921  ;;  %3973 = vrcp.f32 %v7115_v6  ;;  %v5564_v39 = vpop.permute.xlu0 %3144  ;;  %v7123_v6 = vmov 7  }
 0x445   : > { %3829 = vset.pattern.permute.xlu1 %v7081_v41  ;;  %3860 = vset.pattern.permute.xlu0 %v7085_v43  ;;  %v3005_v58 = vmul.f32 %v5330_v27, %v2922_v21  ;;  %v3006_v7 = vmul.f32 %v5333_v15, %v2922_v21  ;;  %v3007_v10 = vmul.f32 %v5351_v0, %v2922_v21 }
 0x446   : > { %1213 = vperm.xlu1 %3829, %v7113_v49   ;;  %1448 = vperm.xlu0 %3860, %v5539_v46   ;;  %v3008_v11 = vmul.f32 %v5354_v44, %v2922_v21  ;;  %7116 = vst [vmem:[#allocation19_spill] sm:$0xff] %v5564_v39 }
 0x447   : > { %v3069_v51 = vadd.f32 %v3005_v58, %v2854_v48  ;;  %v3070_v53 = vadd.f32 %v3006_v7, %v2855_v24  ;;  %v3071_v33 = vadd.f32 %v3007_v10, %v2856_v13  ;;  %v7118_v58 = vld [vmem:[#allocation25_spill] sm:$0xff]  ;;  %v7119_v10 = vld [vmem:[#allocation27_spill] sm:$0xff]  ;;  %v7120_v48 = vld [vmem:[#allocation28_spill] sm:$0xff] }
 0x448   : > { %v3072_v14 = vadd.f32 %v3008_v11, %v2857_v50  ;;  %v7121_v13 = vld [vmem:[#allocation29_spill] sm:$0xff] }
 0x449   : > { %v3137_v57 = vpop.permute.xlu1 %3136 }
 0x44a   : > { %3830 = vset.pattern.permute.xlu1 %v7085_v43  ;;  %3862 = vset.pattern.permute.xlu0 %v7086_v3  ;;  %v3220_v29 = vmul.f32 %v5303_v25, %v3137_v57  ;;  %v3221_v18 = vmul.f32 %v5306_v32, %v3137_v57  ;;  %v3222_v63 = vmul.f32 %v5309_v55, %v3137_v57 }
 0x44b   : > { %1436 = vperm.xlu1 %3830, %v7113_v49   ;;  %1878 = vperm.xlu0 %3862, %v5539_v46   ;;  %v3223_v19 = vmul.f32 %v5327_v45, %v3137_v57 }
 0x44c   : > { %v3284_v9 = vadd.f32 %v3220_v29, %v3069_v51  ;;  %v3285_v1 = vadd.f32 %v3221_v18, %v3070_v53  ;;  %v3286_v61 = vadd.f32 %v3222_v63, %v3071_v33  ;;  %v5578_v51 = vpop.permute.xlu0 %1643  ;;  %v3995_v53 = vld [vmem:[%s4286_s22 + $0x60] sm:$0xff]  ;;  %v3997_v29 = vld [vmem:[%s4286_s22 + $0x70] sm:$0xff]  ;;  %v3998_v63 = vld [vmem:[%s4286_s22 + $0x78] sm:$0xff] }
 0x44d   : > { %v3287_v4 = vadd.f32 %v3223_v19, %v3072_v14  ;;  %7122 = vst [vmem:[#allocation54_spill] sm:$0xff] %v5578_v51  ;;  %v3996_v14 = vld [vmem:[%s4286_s22 + $0x68] sm:$0xff]  ;;  %v7127_v51 = vld [vmem:[#allocation26_spill] sm:$0xff] }
 0x44e   : > { %3348 = vst [vmem:[%s5391_s6 + $0x40] sm:$0xff] %v3284_v9  ;;  %3349 = vst [vmem:[%s5391_s6 + $0x48] sm:$0xff] %v3285_v1  ;;  %v1194_v21 = vpop.permute.xlu1 %1193  ;;  %v7124_v1 = vld [vmem:[#allocation22_spill] sm:$0xff] }
 0x44f   : > { %3832 = vset.pattern.permute.xlu1 %v7086_v3  ;;  %3350 = vst [vmem:[%s5391_s6 + $0x50] sm:$0xff] %v3286_v61  ;;  %3351 = vst [vmem:[%s5391_s6 + $0x58] sm:$0xff] %v3287_v4  ;;  %3864 = vset.pattern.permute.xlu0 %v7117_v52  ;;  %v1289_v7 = vmul.f32 %v7118_v58, %v1194_v21  ;;  %v1290_v11 = vmul.f32 %v7119_v10, %v1194_v21  ;;  %v7125_v4 = vld [vmem:[#allocation23_spill] sm:$0xff] }
 0x450   : > { %1866 = vperm.xlu1 %3832, %v7113_v49   ;;  %2308 = vperm.xlu0 %3864, %v5539_v46   ;;  %v1291_v24 = vmul.f32 %v7120_v48, %v1194_v21  ;;  %v1292_v50 = vmul.f32 %v7121_v13, %v1194_v21  ;;  %v5600_v35 = vpop.permute.xlu0 %2073 }
 0x451   : > { %v1353_v33 = vadd.f32 %v3995_v53, %v1289_v7  ;;  %v1354_v57 = vadd.f32 %v3996_v14, %v1290_v11  ;;  %v7126_v7 = vld [vmem:[#allocation24_spill] sm:$0xff]  ;;  %v7128_v11 = vld [vmem:[#allocation17_spill] sm:$0xff] }
 0x452   : > { %v1355_v18 = vadd.f32 %v3997_v29, %v1291_v24  ;;  %v1356_v19 = vadd.f32 %v3998_v63, %v1292_v50  ;;  %v7129_v14 = vld [vmem:[#allocation36_spill] sm:$0xff]  ;;  %v7130_v50 = vld [vmem:[#allocation37_spill] sm:$0xff]  ;;  %v1721_v63 = vmul.f32 %v7103_v62, %v7128_v11  ;;  %v1722_v43 = vmul.f32 %v7104_v40, %v7128_v11  ;;  %7131 = vst [vmem:[#allocation17_spill] sm:$0xff] %v5600_v35 }
 0x453   : > { %v1421_v9 = vpop.permute.xlu1 %1420  ;;  %v1719_v24 = vmul.f32 %v7129_v14, %v7128_v11  ;;  %v1720_v29 = vmul.f32 %v7130_v50, %v7128_v11 }
 0x454   : > { %3834 = vset.pattern.permute.xlu1 %v7117_v52  ;;  %3866 = vset.pattern.permute.xlu0 %v7123_v6  ;;  %v1504_v61 = vmul.f32 %v7124_v1, %v1421_v9  ;;  %v1505_v21 = vmul.f32 %v7125_v4, %v1421_v9  ;;  %v1506_v53 = vmul.f32 %v7126_v7, %v1421_v9 }
 0x455   : > { %2296 = vperm.xlu1 %3834, %v7113_v49   ;;  %2738 = vperm.xlu0 %3866, %v5539_v46   ;;  %v1507_v39 = vmul.f32 %v7127_v51, %v1421_v9  ;;  %v3974_v9 = vpop.eup %3973  ;;  %v7132_v51 = vmov 9  }
 0x456   : > { %v1568_v52 = vadd.f32 %v1504_v61, %v1353_v33  ;;  %v1569_v42 = vadd.f32 %v1505_v21, %v1354_v57  ;;  %v1570_v3 = vadd.f32 %v1506_v53, %v1355_v18 }
 0x457   : > { %v1571_v54 = vadd.f32 %v1507_v39, %v1356_v19  ;;  %v7133_v19 = vld [vmem:[#allocation12_spill] sm:$0xff] }
 0x458   : > { %v1851_v50 = vpop.permute.xlu1 %1850  ;;  %v1783_v14 = vadd.f32 %v1719_v24, %v1568_v52  ;;  %v1784_v7 = vadd.f32 %v1720_v29, %v1569_v42  ;;  %v1785_v62 = vadd.f32 %v1721_v63, %v1570_v3  ;;  %v2149_v61 = vmul.f32 %v5247_v26, %v7133_v19  ;;  %v5622_v63 = vpop.permute.xlu0 %2503 }
 0x459   : > { %3836 = vset.pattern.permute.xlu1 %v7123_v6  ;;  %3868 = vset.pattern.permute.xlu0 %v7132_v51  ;;  %v1786_v33 = vadd.f32 %v1722_v43, %v1571_v54  ;;  %v1934_v39 = vmul.f32 %v7105_v16, %v1851_v50  ;;  %v1935_v57 = vmul.f32 %v7106_v56, %v1851_v50  ;;  %v7134_v54 = vld [vmem:[#allocation9_spill] sm:$0xff] }
 0x45a   : > { %2726 = vperm.xlu1 %3836, %v7113_v49   ;;  %3168 = vperm.xlu0 %3868, %v5539_v46   ;;  %v1936_v18 = vmul.f32 %v7107_v37, %v1851_v50  ;;  %v2150_v21 = vmul.f32 %v5250_v17, %v7133_v19  ;;  %v1937_v53 = vmul.f32 %v7080_v59, %v1851_v50 }
 0x45b   : > { %v2151_v3 = vmul.f32 %v5253_v5, %v7133_v19  ;;  %v1998_v42 = vadd.f32 %v1934_v39, %v1783_v14  ;;  %v1999_v52 = vadd.f32 %v1935_v57, %v1784_v7  ;;  %v5617_v11 = vmul.f32 %v3974_v9, %v7134_v54  ;;  %7136 = vst [vmem:[#allocation9_spill] sm:$0xff] %v5622_v63  ;;  %v7137_v57 = vld [vmem:[#allocation50_spill] sm:$0xff] }
 0x45c   : > { %v2000_v43 = vadd.f32 %v1936_v18, %v1785_v62  ;;  %v2152_v24 = vmul.f32 %v5256_v34, %v7133_v19  ;;  %v2001_v29 = vadd.f32 %v1937_v53, %v1786_v33  ;;  %v2579_v18 = vmul.f32 %v5272_v38, %v7137_v57 }
 0x45d   : > { %7135 = vst [vmem:[#allocation12_spill] sm:$0xff] %v5617_v11  ;;  %v2281_v50 = vpop.permute.xlu1 %2280  ;;  %v2213_v46 = vadd.f32 %v2149_v61, %v1998_v42  ;;  %v2214_v14 = vadd.f32 %v2150_v21, %v1999_v52  ;;  %v2580_v19 = vmul.f32 %v5282_v20, %v7137_v57  ;;  %v2581_v61 = vmul.f32 %v5285_v31, %v7137_v57 }
 0x45e   : > { %3838 = vset.pattern.permute.xlu1 %v7132_v51  ;;  %3869 = vset.pattern.permute.xlu0 %v7081_v41  ;;  %v2215_v7 = vadd.f32 %v2151_v3, %v2000_v43  ;;  %v2216_v62 = vadd.f32 %v2152_v24, %v2001_v29  ;;  %v2364_v9 = vmul.f32 %v5232_v8, %v2281_v50  ;;  %v7138_v43 = vld [vmem:[#allocation20_spill] sm:$0xff]  ;;  %v7139_v54 = vmov 2   ;;  %v7140_v24 = vld [vmem:[#allocation13_spill] sm:$0xff]  ;;  %v5643_v51 = vpop.permute.xlu0 %2933 }
 0x45f   : > { %3156 = vperm.xlu1 %3838, %v7113_v49   ;;  %1233 = vperm.xlu0 %3869, %v5617_v11   ;;  %v2365_v39 = vmul.f32 %v5235_v36, %v2281_v50  ;;  %v2366_v33 = vmul.f32 %v5241_v22, %v2281_v50  ;;  %v2367_v49 = vmul.f32 %v5244_v30, %v2281_v50  ;;  %3975 = vrcp.f32 %v7138_v43 }
 0x460   : > { %v2428_v21 = vadd.f32 %v2364_v9, %v2213_v46  ;;  %v2582_v42 = vmul.f32 %v5288_v28, %v7137_v57  ;;  %7141 = vst [vmem:[#allocation50_spill] sm:$0xff] %v5643_v51  ;;  %v7142_v9 = vld [vmem:[#allocation51_spill] sm:$0xff] }
 0x461   : > { %v2429_v53 = vadd.f32 %v2365_v39, %v2214_v14  ;;  %v2430_v3 = vadd.f32 %v2366_v33, %v2215_v7  ;;  %v2431_v52 = vadd.f32 %v2367_v49, %v2216_v62  ;;  %v3009_v39 = vmul.f32 %v5330_v27, %v7142_v9  ;;  %v7150_v51 = vld [vmem:[#allocation15_spill] sm:$0xff] }
 0x462   : > { %v2711_v29 = vpop.permute.xlu1 %2710  ;;  %v2643_v50 = vadd.f32 %v2579_v18, %v2428_v21  ;;  %v3010_v33 = vmul.f32 %v5333_v15, %v7142_v9  ;;  %v3011_v18 = vmul.f32 %v5351_v0, %v7142_v9  ;;  %v3012_v21 = vmul.f32 %v5354_v44, %v7142_v9 }
 0x463   : > { %3839 = vset.pattern.permute.xlu1 %v7081_v41  ;;  %3871 = vset.pattern.permute.xlu0 %v7139_v54  ;;  %v2644_v63 = vadd.f32 %v2580_v19, %v2429_v53  ;;  %v2645_v35 = vadd.f32 %v2581_v61, %v2430_v3  ;;  %v2646_v46 = vadd.f32 %v2582_v42, %v2431_v52  ;;  %v7143_v3 = vmov 4  }
 0x464   : > { %1218 = vperm.xlu1 %3839, %v7140_v24   ;;  %1667 = vperm.xlu0 %3871, %v5617_v11   ;;  %v2794_v14 = vmul.f32 %v5259_v47, %v2711_v29  ;;  %v2795_v7 = vmul.f32 %v5263_v60, %v2711_v29  ;;  %v2796_v62 = vmul.f32 %v5266_v2, %v2711_v29 }
 0x465   : > { %v2797_v57 = vmul.f32 %v5269_v23, %v2711_v29 }
 0x466   : > { %v2858_v19 = vadd.f32 %v2794_v14, %v2643_v50  ;;  %v2859_v49 = vadd.f32 %v2795_v7, %v2644_v63  ;;  %v2860_v61 = vadd.f32 %v2796_v62, %v2645_v35  ;;  %v5662_v63 = vpop.permute.xlu0 %1432 }
 0x467   : > { %v2861_v53 = vadd.f32 %v2797_v57, %v2646_v46  ;;  %v3141_v29 = vpop.permute.xlu1 %3140  ;;  %7144 = vst [vmem:[#allocation20_spill] sm:$0xff] %v5662_v63  ;;  %v7149_v63 = vmov 8  }
 0x468   : > { %3841 = vset.pattern.permute.xlu1 %v7139_v54  ;;  %3873 = vset.pattern.permute.xlu0 %v7143_v3  ;;  %v3073_v42 = vadd.f32 %v3009_v39, %v2858_v19  ;;  %v3074_v52 = vadd.f32 %v3010_v33, %v2859_v49  ;;  %v3075_v43 = vadd.f32 %v3011_v18, %v2860_v61 }
 0x469   : > { %1655 = vperm.xlu1 %3841, %v7140_v24   ;;  %2097 = vperm.xlu0 %3873, %v5617_v11   ;;  %v3076_v35 = vadd.f32 %v3012_v21, %v2861_v53  ;;  %v3224_v50 = vmul.f32 %v5303_v25, %v3141_v29  ;;  %v3225_v46 = vmul.f32 %v5306_v32, %v3141_v29 }
 0x46a   : > { %v3226_v14 = vmul.f32 %v5309_v55, %v3141_v29  ;;  %v3227_v7 = vmul.f32 %v5327_v45, %v3141_v29  ;;  %v5676_v19 = vpop.permute.xlu0 %1862  ;;  %v7147_v29 = vld [vmem:[#allocation24_spill] sm:$0xff] }
 0x46b   : > { %v3288_v62 = vadd.f32 %v3224_v50, %v3073_v42  ;;  %v3289_v9 = vadd.f32 %v3225_v46, %v3074_v52  ;;  %7145 = vst [vmem:[#allocation13_spill] sm:$0xff] %v5676_v19  ;;  %v7146_v42 = vld [vmem:[#allocation18_spill] sm:$0xff] }
 0x46c   : > { %v3290_v39 = vadd.f32 %v3226_v14, %v3075_v43  ;;  %v3291_v33 = vadd.f32 %v3227_v7, %v3076_v35  ;;  %v3976_v18 = vpop.eup %3975  ;;  %v1508_v52 = vmul.f32 %v7124_v1, %v7146_v42  ;;  %v1509_v43 = vmul.f32 %v7125_v4, %v7146_v42  ;;  %v7148_v50 = vld [vmem:[#allocation26_spill] sm:$0xff]  ;;  %v3999_v14 = vld [vmem:[%s4286_s22 + $0x80] sm:$0xff] }
 0x46d   : > { %3843 = vset.pattern.permute.xlu1 %v7143_v3  ;;  %3875 = vset.pattern.permute.xlu0 %v7109_v12  ;;  %3352 = vst [vmem:[%s5391_s6 + $0x60] sm:$0xff] %v3288_v62  ;;  %3353 = vst [vmem:[%s5391_s6 + $0x68] sm:$0xff] %v3289_v9  ;;  %v1199_v57 = vpop.permute.xlu1 %1198  ;;  %v1510_v35 = vmul.f32 %v7147_v29, %v7146_v42  ;;  %v1511_v46 = vmul.f32 %v7148_v50, %v7146_v42  ;;  %v4000_v62 = vld [vmem:[%s4286_s22 + $0x88] sm:$0xff]  ;;  %v7155_v50 = vld [vmem:[#allocation52_spill] sm:$0xff] }
 0x46e   : > { %2085 = vperm.xlu1 %3843, %v7140_v24   ;;  %3354 = vst [vmem:[%s5391_s6 + $0x70] sm:$0xff] %v3290_v39  ;;  %3355 = vst [vmem:[%s5391_s6 + $0x78] sm:$0xff] %v3291_v33  ;;  %2527 = vperm.xlu0 %3875, %v5617_v11   ;;  %v1293_v49 = vmul.f32 %v7118_v58, %v1199_v57  ;;  %v1294_v61 = vmul.f32 %v7119_v10, %v1199_v57  ;;  %v4001_v39 = vld [vmem:[%s4286_s22 + $0x90] sm:$0xff] }
 0x46f   : > { %v1295_v21 = vmul.f32 %v7120_v48, %v1199_v57  ;;  %v1296_v53 = vmul.f32 %v7121_v13, %v1199_v57  ;;  %v4002_v57 = vld [vmem:[%s4286_s22 + $0x98] sm:$0xff]  ;;  %v5697_v3 = vmul.f32 %v3976_v18, %v7150_v51  ;;  %v1938_v51 = vmul.f32 %v7105_v16, %v7155_v50 }
 0x470   : > { %v1357_v7 = vadd.f32 %v3999_v14, %v1293_v49  ;;  %v1358_v9 = vadd.f32 %v4000_v62, %v1294_v61  ;;  %v7152_v14 = vld [vmem:[#allocation36_spill] sm:$0xff]  ;;  %v7153_v62 = vld [vmem:[#allocation37_spill] sm:$0xff]  ;;  %v1939_v18 = vmul.f32 %v7106_v56, %v7155_v50 }
 0x471   : > { %v1359_v33 = vadd.f32 %v4001_v39, %v1295_v21  ;;  %v1360_v19 = vadd.f32 %v4002_v57, %v1296_v53  ;;  %7151 = vst [vmem:[#allocation51_spill] sm:$0xff] %v5697_v3  ;;  %v7154_v39 = vld [vmem:[#allocation38_spill] sm:$0xff] }
 0x472   : > { %3845 = vset.pattern.permute.xlu1 %v7109_v12  ;;  %3877 = vset.pattern.permute.xlu0 %v7149_v63  ;;  %v1640_v42 = vpop.permute.xlu1 %1639  ;;  %v1572_v54 = vadd.f32 %v1508_v52, %v1357_v7  ;;  %v1573_v12 = vadd.f32 %v1509_v43, %v1358_v9  ;;  %v1940_v52 = vmul.f32 %v7107_v37, %v7155_v50  ;;  %v5713_v43 = vpop.permute.xlu0 %2292 }
 0x473   : > { %2515 = vperm.xlu1 %3845, %v7140_v24   ;;  %2957 = vperm.xlu0 %3877, %v5617_v11   ;;  %v1574_v41 = vadd.f32 %v1510_v35, %v1359_v33  ;;  %v1575_v49 = vadd.f32 %v1511_v46, %v1360_v19  ;;  %v1723_v61 = vmul.f32 %v7152_v14, %v1640_v42  ;;  %v7157_v33 = vmov 1  }
 0x474   : > { %v1724_v21 = vmul.f32 %v7153_v62, %v1640_v42  ;;  %v1725_v53 = vmul.f32 %v7154_v39, %v1640_v42  ;;  %v1726_v57 = vmul.f32 %v7104_v40, %v1640_v42  ;;  %v1941_v19 = vmul.f32 %v7080_v59, %v7155_v50  ;;  %7156 = vst [vmem:[#allocation18_spill] sm:$0xff] %v5713_v43 }
 0x475   : > { %v1787_v35 = vadd.f32 %v1723_v61, %v1572_v54 }
 0x476   : > { %v1788_v46 = vadd.f32 %v1724_v21, %v1573_v12  ;;  %v1789_v7 = vadd.f32 %v1725_v53, %v1574_v41  ;;  %v1790_v9 = vadd.f32 %v1726_v57, %v1575_v49  ;;  %v7158_v49 = vld [vmem:[#allocation53_spill] sm:$0xff]  ;;  %v5731_v57 = vpop.permute.xlu0 %2722 }
 0x477   : > { %3847 = vset.pattern.permute.xlu1 %v7149_v63  ;;  %3880 = vset.pattern.permute.xlu0 %v7157_v33  ;;  %v2002_v11 = vadd.f32 %v1938_v51, %v1787_v35  ;;  %v2368_v61 = vmul.f32 %v5232_v8, %v7158_v49  ;;  %v2370_v21 = vmul.f32 %v5241_v22, %v7158_v49  ;;  %v7160_v35 = vld [vmem:[#allocation21_spill] sm:$0xff] }
 0x478   : > { %2945 = vperm.xlu1 %3847, %v7140_v24   ;;  %1456 = vperm.xlu0 %3880, %v5697_v3   ;;  %v2070_v42 = vpop.permute.xlu1 %2069  ;;  %v2003_v37 = vadd.f32 %v1939_v18, %v1788_v46  ;;  %v2004_v56 = vadd.f32 %v1940_v52, %v1789_v7  ;;  %v2005_v16 = vadd.f32 %v1941_v19, %v1790_v9  ;;  %3977 = vrcp.f32 %v7160_v35  ;;  %v7162_v7 = vld [vmem:[#allocation8_spill] sm:$0xff] }
 0x479   : > { %v2153_v50 = vmul.f32 %v5247_v26, %v2070_v42  ;;  %v2154_v54 = vmul.f32 %v5250_v17, %v2070_v42  ;;  %v2155_v41 = vmul.f32 %v5253_v5, %v2070_v42  ;;  %v2156_v12 = vmul.f32 %v5256_v34, %v2070_v42  ;;  %7159 = vst [vmem:[#allocation15_spill] sm:$0xff] %v5731_v57 }
 0x47a   : > { %v2369_v24 = vmul.f32 %v5235_v36, %v7158_v49  ;;  %v2371_v53 = vmul.f32 %v5244_v30, %v7158_v49  ;;  %v7161_v46 = vmov 3  }
 0x47b   : > { %v2217_v51 = vadd.f32 %v2153_v50, %v2002_v11  ;;  %v2218_v18 = vadd.f32 %v2154_v54, %v2003_v37  ;;  %v2219_v52 = vadd.f32 %v2155_v41, %v2004_v56  ;;  %v2220_v19 = vadd.f32 %v2156_v12, %v2005_v16  ;;  %v7163_v50 = vld [vmem:[#allocation49_spill] sm:$0xff] }
 0x47c   : > { %3850 = vset.pattern.permute.xlu1 %v7157_v33  ;;  %3882 = vset.pattern.permute.xlu0 %v7161_v46  ;;  %v2798_v54 = vmul.f32 %v5259_v47, %v7163_v50  ;;  %v2799_v41 = vmul.f32 %v5263_v60, %v7163_v50  ;;  %v2800_v12 = vmul.f32 %v5266_v2, %v7163_v50 }
 0x47d   : > { %1444 = vperm.xlu1 %3850, %v7162_v7   ;;  %1886 = vperm.xlu0 %3882, %v5697_v3   ;;  %v2500_v9 = vpop.permute.xlu1 %2499  ;;  %v2432_v42 = vadd.f32 %v2368_v61, %v2217_v51  ;;  %v2433_v43 = vadd.f32 %v2369_v24, %v2218_v18  ;;  %v2434_v49 = vadd.f32 %v2370_v21, %v2219_v52  ;;  %v5751_v18 = vpop.permute.xlu0 %3152  ;;  %v7165_v52 = vmov 5  }
 0x47e   : > { %v2435_v63 = vadd.f32 %v2371_v53, %v2220_v19  ;;  %v2583_v11 = vmul.f32 %v5272_v38, %v2500_v9  ;;  %v2584_v56 = vmul.f32 %v5282_v20, %v2500_v9  ;;  %v2585_v16 = vmul.f32 %v5285_v31, %v2500_v9  ;;  %7164 = vst [vmem:[#allocation36_spill] sm:$0xff] %v5751_v18 }
 0x47f   : > { %v2586_v37 = vmul.f32 %v5288_v28, %v2500_v9  ;;  %v2801_v61 = vmul.f32 %v5269_v23, %v7163_v50 }
 0x480   : > { %v2647_v24 = vadd.f32 %v2583_v11, %v2432_v42  ;;  %v2648_v21 = vadd.f32 %v2584_v56, %v2433_v43  ;;  %v2649_v53 = vadd.f32 %v2585_v16, %v2434_v49  ;;  %v7166_v11 = vld [vmem:[#allocation19_spill] sm:$0xff] }
 0x481   : > { %v2650_v51 = vadd.f32 %v2586_v37, %v2435_v63  ;;  %3852 = vset.pattern.permute.xlu1 %v7161_v46  ;;  %3884 = vset.pattern.permute.xlu0 %v7165_v52  ;;  %v3228_v56 = vmul.f32 %v5303_v25, %v7166_v11  ;;  %v3229_v16 = vmul.f32 %v5306_v32, %v7166_v11 }
 0x482   : > { %1874 = vperm.xlu1 %3852, %v7162_v7   ;;  %2316 = vperm.xlu0 %3884, %v5697_v3   ;;  %v2862_v19 = vadd.f32 %v2798_v54, %v2647_v24  ;;  %v2863_v35 = vadd.f32 %v2799_v41, %v2648_v21  ;;  %v2864_v9 = vadd.f32 %v2800_v12, %v2649_v53 }
 0x483   : > { %v2865_v57 = vadd.f32 %v2801_v61, %v2650_v51  ;;  %v3230_v37 = vmul.f32 %v5309_v55, %v7166_v11  ;;  %v3231_v50 = vmul.f32 %v5327_v45, %v7166_v11  ;;  %v7170_v11 = vmov 9  }
 0x484   : > { %v2930_v33 = vpop.permute.xlu1 %2929 }
 0x485   : > { %v3013_v42 = vmul.f32 %v5330_v27, %v2930_v33  ;;  %v3014_v43 = vmul.f32 %v5333_v15, %v2930_v33  ;;  %v3015_v63 = vmul.f32 %v5351_v0, %v2930_v33  ;;  %v3016_v49 = vmul.f32 %v5354_v44, %v2930_v33  ;;  %v5770_v33 = vpop.permute.xlu0 %1651 }
 0x486   : > { %3854 = vset.pattern.permute.xlu1 %v7165_v52  ;;  %3886 = vset.pattern.permute.xlu0 %v7123_v6  ;;  %7167 = vst [vmem:[#allocation37_spill] sm:$0xff] %v5770_v33 }
 0x487   : > { %v3077_v54 = vadd.f32 %v3013_v42, %v2862_v19  ;;  %v3078_v41 = vadd.f32 %v3014_v43, %v2863_v35  ;;  %v3079_v12 = vadd.f32 %v3015_v63, %v2864_v9  ;;  %v3080_v61 = vadd.f32 %v3016_v49, %v2865_v57  ;;  %2304 = vperm.xlu1 %3854, %v7162_v7   ;;  %v3978_v35 = vpop.eup %3977  ;;  %v7168_v63 = vld [vmem:[#allocation10_spill] sm:$0xff] }
 0x488   : > { %2746 = vperm.xlu0 %3886, %v5697_v3   ;;  %v5784_v49 = vmul.f32 %v3978_v35, %v7168_v63  ;;  %v7172_v35 = vld [vmem:[#allocation26_spill] sm:$0xff] }
 0x489   : > { %v3292_v24 = vadd.f32 %v3228_v56, %v3077_v54  ;;  %v3293_v21 = vadd.f32 %v3229_v16, %v3078_v41  ;;  %v3294_v53 = vadd.f32 %v3230_v37, %v3079_v12  ;;  %v3295_v51 = vadd.f32 %v3231_v50, %v3080_v61  ;;  %v5788_v56 = vpop.permute.xlu0 %2081  ;;  %v4003_v16 = vld [vmem:[%s4286_s22 + $0xa0] sm:$0xff]  ;;  %v4004_v50 = vld [vmem:[%s4286_s22 + $0xa8] sm:$0xff]  ;;  %v4005_v41 = vld [vmem:[%s4286_s22 + $0xb0] sm:$0xff] }
 0x48a   : > { %v1204_v19 = vpop.permute.xlu1 %1203  ;;  %7169 = vst [vmem:[#allocation52_spill] sm:$0xff] %v5784_v49  ;;  %7171 = vst [vmem:[#allocation53_spill] sm:$0xff] %v5788_v56  ;;  %v4006_v61 = vld [vmem:[%s4286_s22 + $0xb8] sm:$0xff]  ;;  %v7173_v56 = vld [vmem:[#allocation54_spill] sm:$0xff] }
 0x48b   : > { %v1297_v57 = vmul.f32 %v7118_v58, %v1204_v19  ;;  %v1298_v9 = vmul.f32 %v7119_v10, %v1204_v19  ;;  %v1299_v42 = vmul.f32 %v7120_v48, %v1204_v19  ;;  %v1300_v43 = vmul.f32 %v7121_v13, %v1204_v19  ;;  %3356 = vst [vmem:[%s5391_s6 + $0x80] sm:$0xff] %v3292_v24 }
 0x48c   : > { %3357 = vst [vmem:[%s5391_s6 + $0x88] sm:$0xff] %v3293_v21  ;;  %3358 = vst [vmem:[%s5391_s6 + $0x90] sm:$0xff] %v3294_v53  ;;  %3856 = vset.pattern.permute.xlu1 %v7123_v6  ;;  %3888 = vset.pattern.permute.xlu0 %v7170_v11 }
 0x48d   : > { %3359 = vst [vmem:[%s5391_s6 + $0x98] sm:$0xff] %v3295_v51  ;;  %2734 = vperm.xlu1 %3856, %v7162_v7   ;;  %v1361_v37 = vadd.f32 %v4003_v16, %v1297_v57  ;;  %v1362_v54 = vadd.f32 %v4004_v50, %v1298_v9  ;;  %v1363_v12 = vadd.f32 %v4005_v41, %v1299_v42  ;;  %v5811_v46 = vpop.permute.xlu0 %2511 }
 0x48e   : > { %v1364_v24 = vadd.f32 %v4006_v61, %v1300_v43  ;;  %3176 = vperm.xlu0 %3888, %v5697_v3   ;;  %v1727_v57 = vmul.f32 %v7152_v14, %v7173_v56  ;;  %v1728_v9 = vmul.f32 %v7153_v62, %v7173_v56  ;;  %v1729_v42 = vmul.f32 %v7154_v39, %v7173_v56 }
 0x48f   : > { %v1429_v21 = vpop.permute.xlu1 %1428  ;;  %v1730_v43 = vmul.f32 %v7104_v40, %v7173_v56  ;;  %v7174_v3 = vmov 0   ;;  %7175 = vst [vmem:[#allocation21_spill] sm:$0xff] %v5811_v46  ;;  %v7176_v56 = vld [vmem:[#allocation32_spill] sm:$0xff] }
 0x490   : > { %v1512_v53 = vmul.f32 %v7124_v1, %v1429_v21  ;;  %v1513_v51 = vmul.f32 %v7125_v4, %v1429_v21  ;;  %v1514_v19 = vmul.f32 %v7147_v29, %v1429_v21  ;;  %v1515_v63 = vmul.f32 %v7172_v35, %v1429_v21 }
 0x491   : > { %3858 = vset.pattern.permute.xlu1 %v7170_v11 }
 0x492   : > { %v1576_v16 = vadd.f32 %v1512_v53, %v1361_v37  ;;  %v1577_v50 = vadd.f32 %v1513_v51, %v1362_v54  ;;  %v1578_v41 = vadd.f32 %v1514_v19, %v1363_v12  ;;  %v1579_v61 = vadd.f32 %v1515_v63, %v1364_v24  ;;  %3889 = vset.pattern.permute.xlu0 %v7174_v3  ;;  %v7177_v54 = vld [vmem:[#allocation33_spill] sm:$0xff]  ;;  %v7178_v24 = vld [vmem:[#allocation34_spill] sm:$0xff] }
 0x493   : > { %3164 = vperm.xlu1 %3858, %v7162_v7   ;;  %1243 = vperm.xlu0 %3889, %v5784_v49   ;;  %v7179_v19 = vld [vmem:[#allocation17_spill] sm:$0xff] }
 0x494   : > { %v1859_v21 = vpop.permute.xlu1 %1858  ;;  %v1791_v33 = vadd.f32 %v1727_v57, %v1576_v16  ;;  %v1792_v18 = vadd.f32 %v1728_v9, %v1577_v50  ;;  %v1793_v6 = vadd.f32 %v1729_v42, %v1578_v41  ;;  %v1794_v52 = vadd.f32 %v1730_v43, %v1579_v61  ;;  %v7180_v41 = vld [vmem:[#allocation30_spill] sm:$0xff] }
 0x495   : > { %v1942_v37 = vmul.f32 %v7176_v56, %v1859_v21  ;;  %v1943_v12 = vmul.f32 %v7177_v54, %v1859_v21  ;;  %v1944_v53 = vmul.f32 %v7178_v24, %v1859_v21  ;;  %v1945_v51 = vmul.f32 %v7080_v59, %v1859_v21  ;;  %v7182_v21 = vld [vmem:[#allocation14_spill] sm:$0xff] }
 0x496   : > { %v2157_v7 = vmul.f32 %v5247_v26, %v7179_v19  ;;  %v2158_v63 = vmul.f32 %v5250_v17, %v7179_v19  ;;  %v2159_v57 = vmul.f32 %v5253_v5, %v7179_v19  ;;  %v2160_v9 = vmul.f32 %v5256_v34, %v7179_v19 }
 0x497   : > { %v2006_v42 = vadd.f32 %v1942_v37, %v1791_v33  ;;  %v2007_v43 = vadd.f32 %v1943_v12, %v1792_v18  ;;  %v2008_v16 = vadd.f32 %v1944_v53, %v1793_v6  ;;  %v2009_v50 = vadd.f32 %v1945_v51, %v1794_v52  ;;  %3859 = vset.pattern.permute.xlu1 %v7174_v3  ;;  %v7183_v37 = vld [vmem:[#allocation9_spill] sm:$0xff] }
 0x498   : > { %3979 = vrcp.f32 %v7180_v41  ;;  %v7181_v61 = vmov 2   ;;  %1228 = vperm.xlu1 %3859, %v7182_v21   ;;  %v2587_v12 = vmul.f32 %v5272_v38, %v7183_v37  ;;  %v2588_v53 = vmul.f32 %v5282_v20, %v7183_v37 }
 0x499   : > { %3891 = vset.pattern.permute.xlu0 %v7181_v61  ;;  %v2289_v46 = vpop.permute.xlu1 %2288  ;;  %v2221_v11 = vadd.f32 %v2157_v7, %v2006_v42  ;;  %v2222_v5 = vadd.f32 %v2158_v63, %v2007_v43  ;;  %v2223_v17 = vadd.f32 %v2159_v57, %v2008_v16  ;;  %v2224_v26 = vadd.f32 %v2160_v9, %v2009_v50  ;;  %v5842_v7 = vpop.permute.xlu0 %2941 }
 0x49a   : > { %1675 = vperm.xlu0 %3891, %v5784_v49   ;;  %v2372_v33 = vmul.f32 %v5232_v8, %v2289_v46  ;;  %v2373_v6 = vmul.f32 %v5235_v36, %v2289_v46  ;;  %v2374_v18 = vmul.f32 %v5241_v22, %v2289_v46  ;;  %v2375_v52 = vmul.f32 %v5244_v30, %v2289_v46 }
 0x49b   : > { %v2589_v51 = vmul.f32 %v5285_v31, %v7183_v37  ;;  %v2590_v19 = vmul.f32 %v5288_v28, %v7183_v37  ;;  %7184 = vst [vmem:[#allocation8_spill] sm:$0xff] %v5842_v7  ;;  %v7185_v46 = vmov 4  }
 0x49c   : > { %v2436_v63 = vadd.f32 %v2372_v33, %v2221_v11  ;;  %v2437_v57 = vadd.f32 %v2373_v6, %v2222_v5  ;;  %v2438_v9 = vadd.f32 %v2374_v18, %v2223_v17  ;;  %v2439_v42 = vadd.f32 %v2375_v52, %v2224_v26  ;;  %3861 = vset.pattern.permute.xlu1 %v7181_v61  ;;  %v7186_v17 = vld [vmem:[#allocation50_spill] sm:$0xff] }
 0x49d   : > { %1663 = vperm.xlu1 %3861, %v7182_v21   ;;  %v3017_v33 = vmul.f32 %v5330_v27, %v7186_v17  ;;  %v3018_v6 = vmul.f32 %v5333_v15, %v7186_v17  ;;  %v3019_v18 = vmul.f32 %v5351_v0, %v7186_v17  ;;  %v3020_v52 = vmul.f32 %v5354_v44, %v7186_v17 }
 0x49e   : > { %3893 = vset.pattern.permute.xlu0 %v7185_v46  ;;  %v2719_v43 = vpop.permute.xlu1 %2718  ;;  %v2651_v16 = vadd.f32 %v2587_v12, %v2436_v63  ;;  %v2652_v50 = vadd.f32 %v2588_v53, %v2437_v57  ;;  %v2653_v41 = vadd.f32 %v2589_v51, %v2438_v9  ;;  %v2654_v3 = vadd.f32 %v2590_v19, %v2439_v42  ;;  %v5860_v12 = vpop.permute.xlu0 %1440 }
 0x49f   : > { %2105 = vperm.xlu0 %3893, %v5784_v49   ;;  %v2802_v37 = vmul.f32 %v5259_v47, %v2719_v43  ;;  %v2803_v11 = vmul.f32 %v5263_v60, %v2719_v43  ;;  %v2804_v5 = vmul.f32 %v5266_v2, %v2719_v43  ;;  %v2805_v26 = vmul.f32 %v5269_v23, %v2719_v43 }
 0x4a0   : > { %7187 = vst [vmem:[#allocation49_spill] sm:$0xff] %v5860_v12  ;;  %v7188_v57 = vmov 6  }
 0x4a1   : > { %v2866_v53 = vadd.f32 %v2802_v37, %v2651_v16  ;;  %v2867_v51 = vadd.f32 %v2803_v11, %v2652_v50  ;;  %v2868_v19 = vadd.f32 %v2804_v5, %v2653_v41  ;;  %v2869_v63 = vadd.f32 %v2805_v26, %v2654_v3  ;;  %3863 = vset.pattern.permute.xlu1 %v7185_v46 }
 0x4a2   : > { %2093 = vperm.xlu1 %3863, %v7182_v21  }
 0x4a3   : > { %3895 = vset.pattern.permute.xlu0 %v7188_v57  ;;  %v3149_v9 = vpop.permute.xlu1 %3148  ;;  %v3081_v42 = vadd.f32 %v3017_v33, %v2866_v53  ;;  %v3082_v43 = vadd.f32 %v3018_v6, %v2867_v51  ;;  %v3083_v7 = vadd.f32 %v3019_v18, %v2868_v19  ;;  %v3084_v17 = vadd.f32 %v3020_v52, %v2869_v63  ;;  %v5871_v6 = vpop.permute.xlu0 %1870  ;;  %v7191_v63 = vld [vmem:[#allocation16_spill] sm:$0xff] }
 0x4a4   : > { %2535 = vperm.xlu0 %3895, %v5784_v49   ;;  %v3232_v16 = vmul.f32 %v5303_v25, %v3149_v9  ;;  %v3233_v3 = vmul.f32 %v5306_v32, %v3149_v9  ;;  %v3234_v50 = vmul.f32 %v5309_v55, %v3149_v9  ;;  %v3235_v41 = vmul.f32 %v5327_v45, %v3149_v9 }
 0x4a5   : > { %v3980_v37 = vpop.eup %3979  ;;  %7189 = vst [vmem:[#allocation19_spill] sm:$0xff] %v5871_v6  ;;  %v7190_v18 = vmov 8   ;;  %v7194_v6 = vld [vmem:[#allocation31_spill] sm:$0xff] }
 0x4a6   : > { %v3296_v11 = vadd.f32 %v3232_v16, %v3081_v42  ;;  %v3297_v5 = vadd.f32 %v3233_v3, %v3082_v43  ;;  %v3298_v26 = vadd.f32 %v3234_v50, %v3083_v7  ;;  %v3299_v33 = vadd.f32 %v3235_v41, %v3084_v17  ;;  %3865 = vset.pattern.permute.xlu1 %v7188_v57  ;;  %v7192_v42 = vld [vmem:[#allocation20_spill] sm:$0xff]  ;;  %v4008_v41 = vld [vmem:[%s4286_s22 + $0xc8] sm:$0xff] }
 0x4a7   : > { %2523 = vperm.xlu1 %3865, %v7182_v21   ;;  %v5885_v9 = vmul.f32 %v3980_v37, %v7191_v63  ;;  %v1516_v43 = vmul.f32 %v7124_v1, %v7192_v42  ;;  %v1517_v17 = vmul.f32 %v7125_v4, %v7192_v42  ;;  %v1518_v16 = vmul.f32 %v7147_v29, %v7192_v42  ;;  %v4007_v3 = vld [vmem:[%s4286_s22 + $0xc0] sm:$0xff] }
 0x4a8   : > { %3897 = vset.pattern.permute.xlu0 %v7190_v18  ;;  %3360 = vst [vmem:[%s5391_s6 + $0xa0] sm:$0xff] %v3296_v11  ;;  %3361 = vst [vmem:[%s5391_s6 + $0xa8] sm:$0xff] %v3297_v5  ;;  %v1209_v7 = vpop.permute.xlu1 %1208  ;;  %v4009_v5 = vld [vmem:[%s4286_s22 + $0xd0] sm:$0xff]  ;;  %v1519_v37 = vmul.f32 %v7172_v35, %v7192_v42  ;;  %v7193_v63 = vmov 1   ;;  %3981 = vrcp.f32 %v7194_v6 }
 0x4a9   : > { %3362 = vst [vmem:[%s5391_s6 + $0xb0] sm:$0xff] %v3298_v26  ;;  %3363 = vst [vmem:[%s5391_s6 + $0xb8] sm:$0xff] %v3299_v33  ;;  %2965 = vperm.xlu0 %3897, %v5784_v49   ;;  %v1301_v52 = vmul.f32 %v7118_v58, %v1209_v7  ;;  %v1302_v53 = vmul.f32 %v7119_v10, %v1209_v7  ;;  %v1303_v51 = vmul.f32 %v7120_v48, %v1209_v7  ;;  %v4010_v33 = vld [vmem:[%s4286_s22 + $0xd8] sm:$0xff]  ;;  %v5902_v49 = vpop.permute.xlu0 %2300 }
 0x4aa   : > { %v1304_v19 = vmul.f32 %v7121_v13, %v1209_v7  ;;  %7195 = vst [vmem:[#allocation10_spill] sm:$0xff] %v5902_v49 }
 0x4ab   : > { %v1365_v50 = vadd.f32 %v4007_v3, %v1301_v52  ;;  %v1366_v11 = vadd.f32 %v4008_v41, %v1302_v53  ;;  %v1367_v26 = vadd.f32 %v4009_v5, %v1303_v51  ;;  %3867 = vset.pattern.permute.xlu1 %v7190_v18 }
 0x4ac   : > { %v1368_v7 = vadd.f32 %v4010_v33, %v1304_v19  ;;  %2953 = vperm.xlu1 %3867, %v7182_v21   ;;  %v7196_v33 = vld [vmem:[#allocation13_spill] sm:$0xff] }
 0x4ad   : > { %3900 = vset.pattern.permute.xlu0 %v7193_v63  ;;  %v1648_v52 = vpop.permute.xlu1 %1647  ;;  %v1580_v53 = vadd.f32 %v1516_v43, %v1365_v50  ;;  %v1581_v51 = vadd.f32 %v1517_v17, %v1366_v11  ;;  %v1582_v3 = vadd.f32 %v1518_v16, %v1367_v26  ;;  %v1946_v6 = vmul.f32 %v7176_v56, %v7196_v33 }
 0x4ae   : > { %1464 = vperm.xlu0 %3900, %v5885_v9   ;;  %v1583_v19 = vadd.f32 %v1519_v37, %v1368_v7  ;;  %v1731_v41 = vmul.f32 %v7152_v14, %v1648_v52  ;;  %v1732_v5 = vmul.f32 %v7153_v62, %v1648_v52  ;;  %v1733_v42 = vmul.f32 %v7154_v39, %v1648_v52  ;;  %v7198_v37 = vld [vmem:[#allocation12_spill] sm:$0xff] }
 0x4af   : > { %v1947_v49 = vmul.f32 %v7177_v54, %v7196_v33  ;;  %v1734_v21 = vmul.f32 %v7104_v40, %v1648_v52  ;;  %v1948_v43 = vmul.f32 %v7178_v24, %v7196_v33  ;;  %v1949_v11 = vmul.f32 %v7080_v59, %v7196_v33  ;;  %v5922_v24 = vpop.permute.xlu0 %2730  ;;  %v7203_v33 = vld [vmem:[#allocation18_spill] sm:$0xff] }
 0x4b0   : > { %v1795_v17 = vadd.f32 %v1731_v41, %v1580_v53  ;;  %v1796_v16 = vadd.f32 %v1732_v5, %v1581_v51  ;;  %v1797_v50 = vadd.f32 %v1733_v42, %v1582_v3  ;;  %3870 = vset.pattern.permute.xlu1 %v7193_v63  ;;  %v7197_v7 = vmov 3   ;;  %7199 = vst [vmem:[#allocation54_spill] sm:$0xff] %v5922_v24  ;;  %v7200_v51 = vld [vmem:[#allocation42_spill] sm:$0xff]  ;;  %v7201_v41 = vld [vmem:[#allocation43_spill] sm:$0xff] }
 0x4b1   : > { %v1798_v26 = vadd.f32 %v1734_v21, %v1583_v19  ;;  %1452 = vperm.xlu1 %3870, %v7198_v37   ;;  %v7202_v19 = vld [vmem:[#allocation44_spill] sm:$0xff]  ;;  %v2376_v21 = vmul.f32 %v5232_v8, %v7203_v33  ;;  %v2377_v63 = vmul.f32 %v5235_v36, %v7203_v33 }
 0x4b2   : > { %3902 = vset.pattern.permute.xlu0 %v7197_v7  ;;  %v2078_v12 = vpop.permute.xlu1 %2077  ;;  %v2010_v52 = vadd.f32 %v1946_v6, %v1795_v17  ;;  %v2011_v18 = vadd.f32 %v1947_v49, %v1796_v16  ;;  %v2012_v57 = vadd.f32 %v1948_v43, %v1797_v50  ;;  %v2378_v49 = vmul.f32 %v5241_v22, %v7203_v33 }
 0x4b3   : > { %1894 = vperm.xlu0 %3902, %v5885_v9   ;;  %v2013_v53 = vadd.f32 %v1949_v11, %v1798_v26  ;;  %v2161_v3 = vmul.f32 %v7200_v51, %v2078_v12  ;;  %v2162_v5 = vmul.f32 %v7201_v41, %v2078_v12  ;;  %v2163_v42 = vmul.f32 %v7202_v19, %v2078_v12 }
 0x4b4   : > { %v2164_v59 = vmul.f32 %v5256_v34, %v2078_v12  ;;  %v2379_v16 = vmul.f32 %v5244_v30, %v7203_v33  ;;  %v7204_v11 = vmov 5  }
 0x4b5   : > { %v2225_v6 = vadd.f32 %v2161_v3, %v2010_v52  ;;  %v2226_v43 = vadd.f32 %v2162_v5, %v2011_v18  ;;  %v2227_v17 = vadd.f32 %v2163_v42, %v2012_v57  ;;  %3872 = vset.pattern.permute.xlu1 %v7197_v7  ;;  %v5947_v5 = vpop.permute.xlu0 %3160  ;;  %v3982_v33 = vpop.eup %3981 }
 0x4b6   : > { %v2228_v50 = vadd.f32 %v2164_v59, %v2013_v53  ;;  %1882 = vperm.xlu1 %3872, %v7198_v37   ;;  %v7205_v59 = vld [vmem:[#allocation15_spill] sm:$0xff]  ;;  %7206 = vst [vmem:[#allocation32_spill] sm:$0xff] %v5947_v5 }
 0x4b7   : > { %3904 = vset.pattern.permute.xlu0 %v7204_v11  ;;  %v2508_v26 = vpop.permute.xlu1 %2507  ;;  %v2440_v12 = vadd.f32 %v2376_v21, %v2225_v6  ;;  %v2441_v24 = vadd.f32 %v2377_v63, %v2226_v43  ;;  %v2442_v36 = vadd.f32 %v2378_v49, %v2227_v17  ;;  %v2806_v53 = vmul.f32 %v5259_v47, %v7205_v59 }
 0x4b8   : > { %2324 = vperm.xlu0 %3904, %v5885_v9   ;;  %v2443_v22 = vadd.f32 %v2379_v16, %v2228_v50  ;;  %v2591_v18 = vmul.f32 %v5272_v38, %v2508_v26  ;;  %v2592_v57 = vmul.f32 %v5282_v20, %v2508_v26  ;;  %v2593_v52 = vmul.f32 %v5285_v31, %v2508_v26 }
 0x4b9   : > { %v2807_v3 = vmul.f32 %v5263_v60, %v7205_v59  ;;  %v2594_v42 = vmul.f32 %v5288_v28, %v2508_v26  ;;  %v2808_v63 = vmul.f32 %v5266_v2, %v7205_v59  ;;  %v2809_v43 = vmul.f32 %v5269_v23, %v7205_v59 }
 0x4ba   : > { %v2655_v21 = vadd.f32 %v2591_v18, %v2440_v12  ;;  %v2656_v49 = vadd.f32 %v2592_v57, %v2441_v24  ;;  %v2657_v6 = vadd.f32 %v2593_v52, %v2442_v36  ;;  %3874 = vset.pattern.permute.xlu1 %v7204_v11  ;;  %v7207_v16 = vmov 7   ;;  %v7210_v57 = vld [vmem:[#allocation36_spill] sm:$0xff] }
 0x4bb   : > { %v2658_v17 = vadd.f32 %v2594_v42, %v2443_v22  ;;  %2312 = vperm.xlu1 %3874, %v7198_v37   ;;  %v7208_v22 = vld [vmem:[#allocation11_spill] sm:$0xff]  ;;  %v3236_v52 = vmul.f32 %v5303_v25, %v7210_v57  ;;  %v3237_v59 = vmul.f32 %v5306_v32, %v7210_v57  ;;  %v5971_v42 = vpop.permute.xlu0 %1223 }
 0x4bc   : > { %3906 = vset.pattern.permute.xlu0 %v7207_v16  ;;  %v2938_v50 = vpop.permute.xlu1 %2937  ;;  %v2870_v26 = vadd.f32 %v2806_v53, %v2655_v21  ;;  %v2871_v5 = vadd.f32 %v2807_v3, %v2656_v49  ;;  %v2872_v7 = vadd.f32 %v2808_v63, %v2657_v6  ;;  %v5962_v18 = vmul.f32 %v3982_v33, %v7208_v22 }
 0x4bd   : > { %2754 = vperm.xlu0 %3906, %v5885_v9   ;;  %v2873_v2 = vadd.f32 %v2809_v43, %v2658_v17  ;;  %v3021_v24 = vmul.f32 %v5330_v27, %v2938_v50  ;;  %v3022_v36 = vmul.f32 %v5333_v15, %v2938_v50  ;;  %v3023_v12 = vmul.f32 %v5351_v0, %v2938_v50 }
 0x4be   : > { %7209 = vst [vmem:[#allocation17_spill] sm:$0xff] %v5962_v18  ;;  %v3024_v53 = vmul.f32 %v5354_v44, %v2938_v50  ;;  %v3238_v3 = vmul.f32 %v5309_v55, %v7210_v57  ;;  %7211 = vst [vmem:[#allocation30_spill] sm:$0xff] %v5971_v42  ;;  %v3239_v33 = vmul.f32 %v5327_v45, %v7210_v57  ;;  %v7212_v43 = vmov 0   ;;  %v4011_v57 = vld [vmem:[%s4286_s22 + $0xe0] sm:$0xff] }
 0x4bf   : > { %v3085_v63 = vadd.f32 %v3021_v24, %v2870_v26  ;;  %v3086_v21 = vadd.f32 %v3022_v36, %v2871_v5  ;;  %v3087_v49 = vadd.f32 %v3023_v12, %v2872_v7  ;;  %3876 = vset.pattern.permute.xlu1 %v7207_v16  ;;  %v5987_v12 = vpop.permute.xlu0 %1659 }
 0x4c0   : > { %v3088_v6 = vadd.f32 %v3024_v53, %v2873_v2  ;;  %2742 = vperm.xlu1 %3876, %v7198_v37   ;;  %7213 = vst [vmem:[#allocation14_spill] sm:$0xff] %v5987_v12  ;;  %v4012_v53 = vld [vmem:[%s4286_s22 + $0xe8] sm:$0xff] }
 0x4c1   : > { %3908 = vset.pattern.permute.xlu0 %v7212_v43  ;;  %v3300_v17 = vadd.f32 %v3236_v52, %v3085_v63  ;;  %v3301_v50 = vadd.f32 %v3237_v59, %v3086_v21  ;;  %v3302_v22 = vadd.f32 %v3238_v3, %v3087_v49  ;;  %v1214_v7 = vpop.permute.xlu1 %1213  ;;  %v7214_v59 = vmov 9   ;;  %v4013_v63 = vld [vmem:[%s4286_s22 + $0xf0] sm:$0xff]  ;;  %v4014_v49 = vld [vmem:[%s4286_s22 + $0xf8] sm:$0xff] }
 0x4c2   : > { %1253 = vperm.xlu0 %3908, %v5962_v18   ;;  %v3303_v5 = vadd.f32 %v3239_v33, %v3088_v6  ;;  %v1305_v26 = vmul.f32 %v7118_v58, %v1214_v7  ;;  %v1306_v2 = vmul.f32 %v7119_v10, %v1214_v7  ;;  %v1307_v24 = vmul.f32 %v7120_v48, %v1214_v7 }
 0x4c3   : > { %3364 = vst [vmem:[%s5391_s6 + $0xc0] sm:$0xff] %v3300_v17  ;;  %3365 = vst [vmem:[%s5391_s6 + $0xc8] sm:$0xff] %v3301_v50  ;;  %v1308_v36 = vmul.f32 %v7121_v13, %v1214_v7 }
 0x4c4   : > { %3366 = vst [vmem:[%s5391_s6 + $0xd0] sm:$0xff] %v3302_v22  ;;  %3367 = vst [vmem:[%s5391_s6 + $0xd8] sm:$0xff] %v3303_v5  ;;  %v1369_v52 = vadd.f32 %v4011_v57, %v1305_v26  ;;  %3878 = vset.pattern.permute.xlu1 %v7214_v59  ;;  %v1370_v3 = vadd.f32 %v4012_v53, %v1306_v2  ;;  %v1371_v21 = vadd.f32 %v4013_v63, %v1307_v24  ;;  %v7215_v5 = vld [vmem:[#allocation37_spill] sm:$0xff] }
 0x4c5   : > { %v1372_v33 = vadd.f32 %v4014_v49, %v1308_v36  ;;  %3172 = vperm.xlu1 %3878, %v7198_v37   ;;  %v1735_v26 = vmul.f32 %v7152_v14, %v7215_v5  ;;  %v1736_v2 = vmul.f32 %v7153_v62, %v7215_v5  ;;  %v1737_v37 = vmul.f32 %v7154_v39, %v7215_v5  ;;  %v6011_v49 = vpop.permute.xlu0 %2089 }
 0x4c6   : > { %3910 = vset.pattern.permute.xlu0 %v7181_v61  ;;  %v1437_v6 = vpop.permute.xlu1 %1436  ;;  %v1738_v63 = vmul.f32 %v7104_v40, %v7215_v5  ;;  %7216 = vst [vmem:[#allocation9_spill] sm:$0xff] %v6011_v49  ;;  %v7220_v49 = vld [vmem:[#allocation35_spill] sm:$0xff] }
 0x4c7   : > { %1683 = vperm.xlu0 %3910, %v5962_v18   ;;  %v1520_v17 = vmul.f32 %v7124_v1, %v1437_v6  ;;  %v1521_v50 = vmul.f32 %v7125_v4, %v1437_v6  ;;  %v1522_v22 = vmul.f32 %v7147_v29, %v1437_v6  ;;  %v1523_v7 = vmul.f32 %v7172_v35, %v1437_v6  ;;  %v7217_v6 = vld [vmem:[#allocation51_spill] sm:$0xff] }
 0x4c9   : > { %v1584_v24 = vadd.f32 %v1520_v17, %v1369_v52  ;;  %v1585_v36 = vadd.f32 %v1521_v50, %v1370_v3  ;;  %v1586_v57 = vadd.f32 %v1522_v22, %v1371_v21  ;;  %v1587_v53 = vadd.f32 %v1523_v7, %v1372_v33  ;;  %3879 = vset.pattern.permute.xlu1 %v7212_v43  ;;  %v7218_v17 = vld [vmem:[#allocation34_spill] sm:$0xff]  ;;  %v7219_v22 = vld [vmem:[#allocation53_spill] sm:$0xff] }
 0x4ca   : > { %1238 = vperm.xlu1 %3879, %v7217_v6   ;;  %v2165_v7 = vmul.f32 %v7200_v51, %v7219_v22  ;;  %v2166_v5 = vmul.f32 %v7201_v41, %v7219_v22 }
 0x4cb   : > { %3912 = vset.pattern.permute.xlu0 %v7185_v46  ;;  %v1867_v12 = vpop.permute.xlu1 %1866  ;;  %v1799_v42 = vadd.f32 %v1735_v26, %v1584_v24  ;;  %v1800_v16 = vadd.f32 %v1736_v2, %v1585_v36  ;;  %v1801_v52 = vadd.f32 %v1737_v37, %v1586_v57  ;;  %v1802_v3 = vadd.f32 %v1738_v63, %v1587_v53 }
 0x4cc   : > { %2113 = vperm.xlu0 %3912, %v5962_v18   ;;  %v1950_v21 = vmul.f32 %v7176_v56, %v1867_v12  ;;  %v1951_v33 = vmul.f32 %v7177_v54, %v1867_v12  ;;  %v1952_v50 = vmul.f32 %v7218_v17, %v1867_v12  ;;  %v1953_v43 = vmul.f32 %v7220_v49, %v1867_v12 }
 0x4cd   : > { %v2167_v26 = vmul.f32 %v7202_v19, %v7219_v22  ;;  %v2168_v36 = vmul.f32 %v5256_v34, %v7219_v22  ;;  %v7221_v53 = vmov 6   ;;  %v6031_v19 = vpop.permute.xlu0 %2519 }
 0x4ce   : > { %v2014_v2 = vadd.f32 %v1950_v21, %v1799_v42  ;;  %v2015_v37 = vadd.f32 %v1951_v33, %v1800_v16  ;;  %v2016_v24 = vadd.f32 %v1952_v50, %v1801_v52  ;;  %v2017_v57 = vadd.f32 %v1953_v43, %v1802_v3  ;;  %3881 = vset.pattern.permute.xlu1 %v7181_v61  ;;  %v7223_v52 = vld [vmem:[#allocation40_spill] sm:$0xff]  ;;  %v7224_v43 = vld [vmem:[#allocation41_spill] sm:$0xff] }
 0x4cf   : > { %1671 = vperm.xlu1 %3881, %v7217_v6   ;;  %7222 = vst [vmem:[#allocation50_spill] sm:$0xff] %v6031_v19  ;;  %v7225_v33 = vld [vmem:[#allocation21_spill] sm:$0xff] }
 0x4d0   : > { %3914 = vset.pattern.permute.xlu0 %v7221_v53  ;;  %v2297_v63 = vpop.permute.xlu1 %2296  ;;  %v2229_v12 = vadd.f32 %v2165_v7, %v2014_v2  ;;  %v2230_v11 = vadd.f32 %v2166_v5, %v2015_v37  ;;  %v2231_v41 = vadd.f32 %v2167_v26, %v2016_v24  ;;  %v2232_v16 = vadd.f32 %v2168_v36, %v2017_v57 }
 0x4d1   : > { %2543 = vperm.xlu0 %3914, %v5962_v18   ;;  %v2380_v42 = vmul.f32 %v5232_v8, %v2297_v63  ;;  %v2381_v21 = vmul.f32 %v7223_v52, %v2297_v63  ;;  %v2382_v3 = vmul.f32 %v7224_v43, %v2297_v63  ;;  %v2595_v50 = vmul.f32 %v5272_v38, %v7225_v33 }
 0x4d2   : > { %v2596_v22 = vmul.f32 %v5282_v20, %v7225_v33  ;;  %v2383_v61 = vmul.f32 %v5244_v30, %v2297_v63  ;;  %v2597_v7 = vmul.f32 %v5285_v31, %v7225_v33  ;;  %v2598_v37 = vmul.f32 %v5288_v28, %v7225_v33 }
 0x4d3   : > { %v2444_v5 = vadd.f32 %v2380_v42, %v2229_v12  ;;  %v2445_v26 = vadd.f32 %v2381_v21, %v2230_v11  ;;  %v2446_v2 = vadd.f32 %v2382_v3, %v2231_v41  ;;  %3883 = vset.pattern.permute.xlu1 %v7185_v46  ;;  %v7226_v36 = vmov 8   ;;  %v7227_v12 = vld [vmem:[#allocation45_spill] sm:$0xff]  ;;  %v6056_v3 = vpop.permute.xlu0 %2949 }
 0x4d4   : > { %v2447_v24 = vadd.f32 %v2383_v61, %v2232_v16  ;;  %2101 = vperm.xlu1 %3883, %v7217_v6   ;;  %v7228_v61 = vld [vmem:[#allocation8_spill] sm:$0xff]  ;;  %7229 = vst [vmem:[#allocation16_spill] sm:$0xff] %v6056_v3 }
 0x4d5   : > { %3916 = vset.pattern.permute.xlu0 %v7226_v36  ;;  %v2727_v57 = vpop.permute.xlu1 %2726  ;;  %v2659_v63 = vadd.f32 %v2595_v50, %v2444_v5  ;;  %v2660_v19 = vadd.f32 %v2596_v22, %v2445_v26  ;;  %v2661_v20 = vadd.f32 %v2597_v7, %v2446_v2  ;;  %v3025_v16 = vmul.f32 %v5330_v27, %v7228_v61 }
 0x4d6   : > { %2973 = vperm.xlu0 %3916, %v5962_v18   ;;  %v2662_v31 = vadd.f32 %v2598_v37, %v2447_v24  ;;  %v2810_v11 = vmul.f32 %v5259_v47, %v2727_v57  ;;  %v2811_v41 = vmul.f32 %v5263_v60, %v2727_v57  ;;  %v2812_v42 = vmul.f32 %v7227_v12, %v2727_v57 }
 0x4d7   : > { %v3026_v21 = vmul.f32 %v5333_v15, %v7228_v61  ;;  %v2813_v33 = vmul.f32 %v5269_v23, %v2727_v57  ;;  %v3027_v50 = vmul.f32 %v5351_v0, %v7228_v61  ;;  %v3028_v26 = vmul.f32 %v5354_v44, %v7228_v61 }
 0x4d8   : > { %v2874_v22 = vadd.f32 %v2810_v11, %v2659_v63  ;;  %v2875_v7 = vadd.f32 %v2811_v41, %v2660_v19  ;;  %v2876_v5 = vadd.f32 %v2812_v42, %v2661_v20  ;;  %3885 = vset.pattern.permute.xlu1 %v7221_v53  ;;  %v6071_v42 = vpop.permute.xlu0 %1448 }
 0x4d9   : > { %v2877_v2 = vadd.f32 %v2813_v33, %v2662_v31  ;;  %2531 = vperm.xlu1 %3885, %v7217_v6   ;;  %7230 = vst [vmem:[#allocation20_spill] sm:$0xff] %v6071_v42 }
 0x4da   : > { %3917 = vset.pattern.permute.xlu0 %v7214_v59  ;;  %v3157_v37 = vpop.permute.xlu1 %3156  ;;  %v3089_v24 = vadd.f32 %v3025_v16, %v2874_v22  ;;  %v3090_v57 = vadd.f32 %v3026_v21, %v2875_v7  ;;  %v3091_v19 = vadd.f32 %v3027_v50, %v2876_v5  ;;  %v7231_v5 = vld [vmem:[#allocation49_spill] sm:$0xff] }
 0x4db   : > { %3184 = vperm.xlu0 %3917, %v5885_v9   ;;  %v3092_v20 = vadd.f32 %v3028_v26, %v2877_v2  ;;  %v3240_v63 = vmul.f32 %v5303_v25, %v3157_v37  ;;  %v3241_v31 = vmul.f32 %v5306_v32, %v3157_v37  ;;  %v3242_v11 = vmul.f32 %v5309_v55, %v3157_v37  ;;  %v4015_v2 = vld [vmem:[%s4286_s22 + $0x100] sm:$0xff] }
 0x4dc   : > { %v3243_v41 = vmul.f32 %v5327_v45, %v3157_v37  ;;  %v1524_v26 = vmul.f32 %v7124_v1, %v7231_v5 }
 0x4dd   : > { %v3304_v61 = vadd.f32 %v3240_v63, %v3089_v24  ;;  %v3305_v33 = vadd.f32 %v3241_v31, %v3090_v57  ;;  %v3306_v18 = vadd.f32 %v3242_v11, %v3091_v19  ;;  %3887 = vset.pattern.permute.xlu1 %v7226_v36  ;;  %v4016_v24 = vld [vmem:[%s4286_s22 + $0x108] sm:$0xff]  ;;  %v4017_v19 = vld [vmem:[%s4286_s22 + $0x110] sm:$0xff]  ;;  %v4018_v63 = vld [vmem:[%s4286_s22 + $0x118] sm:$0xff]  ;;  %v6095_v11 = vpop.permute.xlu0 %1878 }
 0x4de   : > { %v3307_v53 = vadd.f32 %v3243_v41, %v3092_v20  ;;  %2961 = vperm.xlu1 %3887, %v7217_v6   ;;  %v1526_v6 = vmul.f32 %v7147_v29, %v7231_v5  ;;  %7232 = vst [vmem:[#allocation31_spill] sm:$0xff] %v6095_v11  ;;  %v7233_v41 = vmov 1  }
 0x4df   : > { %3368 = vst [vmem:[%s5391_s6 + $0xe0] sm:$0xff] %v3304_v61  ;;  %3369 = vst [vmem:[%s5391_s6 + $0xe8] sm:$0xff] %v3305_v33  ;;  %v1219_v16 = vpop.permute.xlu1 %1218  ;;  %v7234_v61 = vld [vmem:[#allocation52_spill] sm:$0xff] }
 0x4e0   : > { %3370 = vst [vmem:[%s5391_s6 + $0xf0] sm:$0xff] %v3306_v18  ;;  %3371 = vst [vmem:[%s5391_s6 + $0xf8] sm:$0xff] %v3307_v53  ;;  %v1309_v21 = vmul.f32 %v7118_v58, %v1219_v16  ;;  %v1310_v50 = vmul.f32 %v7119_v10, %v1219_v16  ;;  %v1311_v22 = vmul.f32 %v7120_v48, %v1219_v16 }
 0x4e1   : > { %v1312_v7 = vmul.f32 %v7121_v13, %v1219_v16  ;;  %v1525_v18 = vmul.f32 %v7125_v4, %v7231_v5  ;;  %v1527_v53 = vmul.f32 %v7172_v35, %v7231_v5 }
 0x4e2   : > { %v1373_v37 = vadd.f32 %v4015_v2, %v1309_v21  ;;  %v1374_v57 = vadd.f32 %v4016_v24, %v1310_v50  ;;  %v1375_v20 = vadd.f32 %v4017_v19, %v1311_v22  ;;  %3890 = vset.pattern.permute.xlu1 %v7233_v41  ;;  %v7236_v19 = vmov 3  }
 0x4e3   : > { %v1376_v31 = vadd.f32 %v4018_v63, %v1312_v7  ;;  %1460 = vperm.xlu1 %3890, %v7234_v61   ;;  %v7235_v7 = vld [vmem:[#allocation19_spill] sm:$0xff] }
 0x4e4   : > { %v1656_v33 = vpop.permute.xlu1 %1655  ;;  %v1588_v16 = vadd.f32 %v1524_v26, %v1373_v37  ;;  %v1589_v42 = vadd.f32 %v1525_v18, %v1374_v57  ;;  %v1590_v36 = vadd.f32 %v1526_v6, %v1375_v20  ;;  %v1954_v2 = vmul.f32 %v7176_v56, %v7235_v7  ;;  %v6112_v20 = vpop.permute.xlu0 %2308 }
 0x4e5   : > { %v1591_v3 = vadd.f32 %v1527_v53, %v1376_v31  ;;  %v1739_v5 = vmul.f32 %v7152_v14, %v1656_v33  ;;  %v1740_v21 = vmul.f32 %v7153_v62, %v1656_v33  ;;  %v1741_v50 = vmul.f32 %v7154_v39, %v1656_v33  ;;  %7237 = vst [vmem:[#allocation13_spill] sm:$0xff] %v6112_v20 }
 0x4e6   : > { %v1742_v22 = vmul.f32 %v7104_v40, %v1656_v33  ;;  %v1955_v24 = vmul.f32 %v7177_v54, %v7235_v7  ;;  %v1956_v26 = vmul.f32 %v7218_v17, %v7235_v7  ;;  %v1957_v18 = vmul.f32 %v7220_v49, %v7235_v7  ;;  %v7238_v17 = vld [vmem:[#allocation43_spill] sm:$0xff]  ;;  %v7239_v7 = vld [vmem:[#allocation44_spill] sm:$0xff] }
 0x4e7   : > { %v1803_v6 = vadd.f32 %v1739_v5, %v1588_v16  ;;  %v1804_v53 = vadd.f32 %v1740_v21, %v1589_v42  ;;  %v1805_v37 = vadd.f32 %v1741_v50, %v1590_v36  ;;  %3892 = vset.pattern.permute.xlu1 %v7236_v19 }
 0x4e8   : > { %v1806_v57 = vadd.f32 %v1742_v22, %v1591_v3  ;;  %1890 = vperm.xlu1 %3892, %v7234_v61   ;;  %v7240_v3 = vld [vmem:[#allocation10_spill] sm:$0xff] }
 0x4e9   : > { %v2086_v63 = vpop.permute.xlu1 %2085  ;;  %v2018_v31 = vadd.f32 %v1954_v2, %v1803_v6  ;;  %v2019_v33 = vadd.f32 %v1955_v24, %v1804_v53  ;;  %v2020_v11 = vadd.f32 %v1956_v26, %v1805_v37  ;;  %v2384_v42 = vmul.f32 %v5232_v8, %v7240_v3 }
 0x4ea   : > { %v2021_v41 = vadd.f32 %v1957_v18, %v1806_v57  ;;  %v2169_v46 = vmul.f32 %v7200_v51, %v2086_v63  ;;  %v2170_v54 = vmul.f32 %v7238_v17, %v2086_v63  ;;  %v2171_v16 = vmul.f32 %v7239_v7, %v2086_v63 }
 0x4eb   : > { %v2172_v36 = vmul.f32 %v5256_v34, %v2086_v63  ;;  %v2385_v5 = vmul.f32 %v7223_v52, %v7240_v3  ;;  %v2386_v21 = vmul.f32 %v7224_v43, %v7240_v3  ;;  %v2387_v50 = vmul.f32 %v5244_v30, %v7240_v3  ;;  %v6129_v63 = vpop.permute.xlu0 %2738  ;;  %v7243_v43 = vld [vmem:[#allocation46_spill] sm:$0xff]  ;;  %v7244_v3 = vld [vmem:[#allocation47_spill] sm:$0xff] }
 0x4ec   : > { %v2233_v22 = vadd.f32 %v2169_v46, %v2018_v31  ;;  %v2234_v2 = vadd.f32 %v2170_v54, %v2019_v33  ;;  %v2235_v24 = vadd.f32 %v2171_v16, %v2020_v11  ;;  %v7241_v18 = vmov 5   ;;  %7242 = vst [vmem:[#allocation12_spill] sm:$0xff] %v6129_v63  ;;  %v7245_v11 = vld [vmem:[#allocation54_spill] sm:$0xff]  ;;  %v4020_v63 = vld [vmem:[%s4286_s22 + $0x128] sm:$0xff] }
 0x4ed   : > { %v2236_v26 = vadd.f32 %v2172_v36, %v2021_v41  ;;  %3894 = vset.pattern.permute.xlu1 %v7241_v18  ;;  %v2814_v41 = vmul.f32 %v5259_v47, %v7245_v11  ;;  %v2815_v31 = vmul.f32 %v5263_v60, %v7245_v11  ;;  %v2816_v33 = vmul.f32 %v7227_v12, %v7245_v11 }
 0x4ee   : > { %2320 = vperm.xlu1 %3894, %v7234_v61   ;;  %v2448_v6 = vadd.f32 %v2384_v42, %v2233_v22  ;;  %v2449_v53 = vadd.f32 %v2385_v5, %v2234_v2  ;;  %v2450_v37 = vadd.f32 %v2386_v21, %v2235_v24  ;;  %v2516_v20 = vpop.permute.xlu1 %2515  ;;  %v2817_v16 = vmul.f32 %v5269_v23, %v7245_v11  ;;  %v7247_v22 = vld [vmem:[#allocation30_spill] sm:$0xff] }
 0x4ef   : > { %v2451_v57 = vadd.f32 %v2387_v50, %v2236_v26  ;;  %v2599_v19 = vmul.f32 %v5272_v38, %v2516_v20  ;;  %v2600_v52 = vmul.f32 %v7243_v43, %v2516_v20  ;;  %v2601_v46 = vmul.f32 %v7244_v3, %v2516_v20 }
 0x4f0   : > { %v2602_v54 = vmul.f32 %v5288_v28, %v2516_v20  ;;  %v7246_v50 = vmov 7   ;;  %v1313_v20 = vmul.f32 %v7118_v58, %v7247_v22  ;;  %v1314_v2 = vmul.f32 %v7119_v10, %v7247_v22  ;;  %v4022_v10 = vld [vmem:[%s4286_s22 + $0x138] sm:$0xff] }
 0x4f1   : > { %v2663_v36 = vadd.f32 %v2599_v19, %v2448_v6  ;;  %v2664_v42 = vadd.f32 %v2600_v52, %v2449_v53  ;;  %v2665_v5 = vadd.f32 %v2601_v46, %v2450_v37  ;;  %v1315_v24 = vmul.f32 %v7120_v48, %v7247_v22 }
 0x4f2   : > { %v2666_v21 = vadd.f32 %v2602_v54, %v2451_v57  ;;  %3896 = vset.pattern.permute.xlu1 %v7246_v50  ;;  %v1316_v26 = vmul.f32 %v7121_v13, %v7247_v22  ;;  %v6153_v57 = vpop.permute.xlu0 %3168  ;;  %v7249_v50 = vld [vmem:[#allocation32_spill] sm:$0xff]  ;;  %v1378_v18 = vadd.f32 %v4020_v63, %v1314_v2  ;;  %v4021_v13 = vld [vmem:[%s4286_s22 + $0x130] sm:$0xff] }
 0x4f3   : > { %2750 = vperm.xlu1 %3896, %v7234_v61   ;;  %v2946_v19 = vpop.permute.xlu1 %2945  ;;  %v2878_v52 = vadd.f32 %v2814_v41, %v2663_v36  ;;  %v2879_v6 = vadd.f32 %v2815_v31, %v2664_v42  ;;  %v2880_v53 = vadd.f32 %v2816_v33, %v2665_v5  ;;  %7248 = vst [vmem:[#allocation42_spill] sm:$0xff] %v6153_v57 }
 0x4f4   : > { %v2881_v37 = vadd.f32 %v2817_v16, %v2666_v21  ;;  %v3029_v46 = vmul.f32 %v5330_v27, %v2946_v19  ;;  %v3030_v54 = vmul.f32 %v5333_v15, %v2946_v19  ;;  %v3031_v11 = vmul.f32 %v5351_v0, %v2946_v19 }
 0x4f5   : > { %v3032_v22 = vmul.f32 %v5354_v44, %v2946_v19  ;;  %v3244_v41 = vmul.f32 %v5303_v25, %v7249_v50  ;;  %v3245_v31 = vmul.f32 %v5306_v32, %v7249_v50  ;;  %v3246_v33 = vmul.f32 %v5309_v55, %v7249_v50  ;;  %v4019_v19 = vld [vmem:[%s4286_s22 + $0x120] sm:$0xff] }
 0x4f6   : > { %v3247_v16 = vmul.f32 %v5327_v45, %v7249_v50  ;;  %v3093_v36 = vadd.f32 %v3029_v46, %v2878_v52  ;;  %v3094_v42 = vadd.f32 %v3030_v54, %v2879_v6  ;;  %v3095_v5 = vadd.f32 %v3031_v11, %v2880_v53  ;;  %v6185_v46 = vpop.permute.xlu0 %1233 }
 0x4f7   : > { %v3096_v21 = vadd.f32 %v3032_v22, %v2881_v37  ;;  %3898 = vset.pattern.permute.xlu1 %v7214_v59  ;;  %v1377_v57 = vadd.f32 %v4019_v19, %v1313_v20  ;;  %v1379_v48 = vadd.f32 %v4021_v13, %v1315_v24  ;;  %v1380_v58 = vadd.f32 %v4022_v10, %v1316_v26  ;;  %v7250_v10 = vld [vmem:[#allocation14_spill] sm:$0xff]  ;;  %v7252_v19 = vld [vmem:[#allocation33_spill] sm:$0xff] }
 0x4f8   : > { %3180 = vperm.xlu1 %3898, %v7234_v61   ;;  %v3308_v55 = vadd.f32 %v3244_v41, %v3093_v36  ;;  %v3309_v50 = vadd.f32 %v3245_v31, %v3094_v42  ;;  %v3310_v52 = vadd.f32 %v3246_v33, %v3095_v5  ;;  %v1445_v53 = vpop.permute.xlu1 %1444  ;;  %v1743_v2 = vmul.f32 %v7152_v14, %v7250_v10 }
 0x4f9   : > { %v3311_v6 = vadd.f32 %v3247_v16, %v3096_v21  ;;  %v1528_v37 = vmul.f32 %v7124_v1, %v1445_v53  ;;  %v1529_v20 = vmul.f32 %v7125_v4, %v1445_v53  ;;  %v1530_v63 = vmul.f32 %v7147_v29, %v1445_v53 }
 0x4fa   : > { %v1531_v13 = vmul.f32 %v7172_v35, %v1445_v53  ;;  %v1744_v61 = vmul.f32 %v7153_v62, %v7250_v10  ;;  %v1745_v24 = vmul.f32 %v7154_v39, %v7250_v10  ;;  %v1746_v26 = vmul.f32 %v7104_v40, %v7250_v10  ;;  %3372 = vst [vmem:[%s5391_s6 + $0x100] sm:$0xff] %v3308_v55 }
 0x4fb   : > { %3373 = vst [vmem:[%s5391_s6 + $0x108] sm:$0xff] %v3309_v50  ;;  %3374 = vst [vmem:[%s5391_s6 + $0x110] sm:$0xff] %v3310_v52  ;;  %v1592_v54 = vadd.f32 %v1528_v37, %v1377_v57  ;;  %v1593_v11 = vadd.f32 %v1529_v20, %v1378_v18  ;;  %v1594_v22 = vadd.f32 %v1530_v63, %v1379_v48  ;;  %v7251_v31 = vmov 0   ;;  %v7253_v50 = vld [vmem:[#allocation34_spill] sm:$0xff]  ;;  %v7254_v18 = vld [vmem:[#allocation9_spill] sm:$0xff]  ;;  %v6205_v37 = vpop.permute.xlu0 %1667 }
 0x4fc   : > { %3375 = vst [vmem:[%s5391_s6 + $0x118] sm:$0xff] %v3311_v6  ;;  %v1595_v41 = vadd.f32 %v1531_v13, %v1380_v58  ;;  %3899 = vset.pattern.permute.xlu1 %v7251_v31  ;;  %v2173_v58 = vmul.f32 %v7200_v51, %v7254_v18  ;;  %v2174_v48 = vmul.f32 %v7238_v17, %v7254_v18  ;;  %7255 = vst [vmem:[#allocation18_spill] sm:$0xff] %v6205_v37 }
 0x4fd   : > { %1248 = vperm.xlu1 %3899, %v5885_v9   ;;  %v1875_v33 = vpop.permute.xlu1 %1874  ;;  %v1807_v16 = vadd.f32 %v1743_v2, %v1592_v54  ;;  %v1808_v36 = vadd.f32 %v1744_v61, %v1593_v11  ;;  %v1809_v42 = vadd.f32 %v1745_v24, %v1594_v22  ;;  %v2175_v6 = vmul.f32 %v7239_v7, %v7254_v18 }
 0x4fe   : > { %v1810_v5 = vadd.f32 %v1746_v26, %v1595_v41  ;;  %v1958_v21 = vmul.f32 %v7176_v56, %v1875_v33  ;;  %v1959_v55 = vmul.f32 %v7252_v19, %v1875_v33  ;;  %v1960_v52 = vmul.f32 %v7253_v50, %v1875_v33  ;;  %v7257_v41 = vld [vmem:[#allocation40_spill] sm:$0xff] }
 0x4ff   : > { %v1961_v57 = vmul.f32 %v7220_v49, %v1875_v33  ;;  %v2176_v53 = vmul.f32 %v5256_v34, %v7254_v18  ;;  %v7256_v2 = vmov 2   ;;  %v7258_v33 = vld [vmem:[#allocation41_spill] sm:$0xff] }
 0x500   : > { %v2022_v20 = vadd.f32 %v1958_v21, %v1807_v16  ;;  %v2023_v63 = vadd.f32 %v1959_v55, %v1808_v36  ;;  %v2024_v13 = vadd.f32 %v1960_v52, %v1809_v42  ;;  %v7259_v36 = vld [vmem:[#allocation50_spill] sm:$0xff]  ;;  %v7260_v52 = vmov 4  }
 0x501   : > { %v2025_v10 = vadd.f32 %v1961_v57, %v1810_v5  ;;  %3901 = vset.pattern.permute.xlu1 %v7256_v2  ;;  %v2603_v42 = vmul.f32 %v5272_v38, %v7259_v36  ;;  %v2604_v5 = vmul.f32 %v7243_v43, %v7259_v36  ;;  %v2605_v21 = vmul.f32 %v7244_v3, %v7259_v36  ;;  %v6222_v57 = vpop.permute.xlu0 %2097 }
 0x502   : > { %1679 = vperm.xlu1 %3901, %v5885_v9   ;;  %v2237_v61 = vadd.f32 %v2173_v58, %v2022_v20  ;;  %v2238_v24 = vadd.f32 %v2174_v48, %v2023_v63  ;;  %v2239_v26 = vadd.f32 %v2175_v6, %v2024_v13  ;;  %v2305_v11 = vpop.permute.xlu1 %2304  ;;  %v2606_v55 = vmul.f32 %v5288_v28, %v7259_v36 }
 0x503   : > { %v2240_v54 = vadd.f32 %v2176_v53, %v2025_v10  ;;  %v2388_v22 = vmul.f32 %v5232_v8, %v2305_v11  ;;  %v2389_v31 = vmul.f32 %v7257_v41, %v2305_v11  ;;  %v2390_v18 = vmul.f32 %v7258_v33, %v2305_v11  ;;  %7261 = vst [vmem:[#allocation15_spill] sm:$0xff] %v6222_v57  ;;  %v7262_v57 = vld [vmem:[#allocation16_spill] sm:$0xff] }
 0x504   : > { %v2391_v16 = vmul.f32 %v5244_v30, %v2305_v11 }
 0x505   : > { %v2452_v58 = vadd.f32 %v2388_v22, %v2237_v61  ;;  %v2453_v48 = vadd.f32 %v2389_v31, %v2238_v24  ;;  %v2454_v6 = vadd.f32 %v2390_v18, %v2239_v26  ;;  %v3033_v61 = vmul.f32 %v5330_v27, %v7262_v57 }
 0x506   : > { %3903 = vset.pattern.permute.xlu1 %v7260_v52  ;;  %v2455_v53 = vadd.f32 %v2391_v16, %v2240_v54  ;;  %v3034_v24 = vmul.f32 %v5333_v15, %v7262_v57  ;;  %v3035_v26 = vmul.f32 %v5351_v0, %v7262_v57  ;;  %v3036_v54 = vmul.f32 %v5354_v44, %v7262_v57 }
 0x507   : > { %2109 = vperm.xlu1 %3903, %v5885_v9   ;;  %v2667_v63 = vadd.f32 %v2603_v42, %v2452_v58  ;;  %v2668_v13 = vadd.f32 %v2604_v5, %v2453_v48  ;;  %v2669_v10 = vadd.f32 %v2605_v21, %v2454_v6  ;;  %v7263_v22 = vmov 6   ;;  %v6239_v5 = vpop.permute.xlu0 %2527 }
 0x508   : > { %v2735_v20 = vpop.permute.xlu1 %2734  ;;  %v2670_v2 = vadd.f32 %v2606_v55, %v2455_v53  ;;  %7264 = vst [vmem:[#allocation11_spill] sm:$0xff] %v6239_v5 }
 0x509   : > { %v2818_v11 = vmul.f32 %v5259_v47, %v2735_v20  ;;  %v2819_v37 = vmul.f32 %v5263_v60, %v2735_v20  ;;  %v2820_v36 = vmul.f32 %v7227_v12, %v2735_v20  ;;  %v2821_v52 = vmul.f32 %v5269_v23, %v2735_v20 }
 0x50b   : > { %3905 = vset.pattern.permute.xlu1 %v7263_v22  ;;  %v2882_v31 = vadd.f32 %v2818_v11, %v2667_v63  ;;  %v2883_v18 = vadd.f32 %v2819_v37, %v2668_v13  ;;  %v2884_v16 = vadd.f32 %v2820_v36, %v2669_v10  ;;  %v2885_v42 = vadd.f32 %v2821_v52, %v2670_v2  ;;  %v7265_v37 = vld [vmem:[#allocation48_spill] sm:$0xff]  ;;  %v6247_v52 = vpop.permute.xlu0 %2957 }
 0x50c   : > { %2539 = vperm.xlu1 %3905, %v5885_v9   ;;  %v7266_v13 = vmov 8   ;;  %7267 = vst [vmem:[#allocation36_spill] sm:$0xff] %v6247_v52 }
 0x50d   : > { %v3097_v55 = vadd.f32 %v3033_v61, %v2882_v31  ;;  %v3098_v58 = vadd.f32 %v3034_v24, %v2883_v18  ;;  %v3099_v48 = vadd.f32 %v3035_v26, %v2884_v16  ;;  %v3100_v6 = vadd.f32 %v3036_v54, %v2885_v42  ;;  %v7268_v24 = vld [vmem:[#allocation25_spill] sm:$0xff]  ;;  %v7269_v54 = vld [vmem:[#allocation27_spill] sm:$0xff]  ;;  %v7270_v31 = vld [vmem:[#allocation28_spill] sm:$0xff] }
 0x50e   : > { %v3165_v21 = vpop.permute.xlu1 %3164  ;;  %v7271_v16 = vld [vmem:[#allocation29_spill] sm:$0xff] }
 0x50f   : > { %v3248_v57 = vmul.f32 %v5303_v25, %v3165_v21  ;;  %v3249_v53 = vmul.f32 %v5306_v32, %v3165_v21  ;;  %v3250_v20 = vmul.f32 %v7265_v37, %v3165_v21  ;;  %v3251_v63 = vmul.f32 %v5327_v45, %v3165_v21 }
 0x510   : > { %3907 = vset.pattern.permute.xlu1 %v7266_v13  ;;  %v4025_v13 = vld [vmem:[%s4286_s22 + $0x150] sm:$0xff] }
 0x511   : > { %v3312_v10 = vadd.f32 %v3248_v57, %v3097_v55  ;;  %v3313_v2 = vadd.f32 %v3249_v53, %v3098_v58  ;;  %v3314_v11 = vadd.f32 %v3250_v20, %v3099_v48  ;;  %v3315_v36 = vadd.f32 %v3251_v63, %v3100_v6  ;;  %2969 = vperm.xlu1 %3907, %v5885_v9   ;;  %v7272_v9 = vld [vmem:[#allocation20_spill] sm:$0xff]  ;;  %v4024_v20 = vld [vmem:[%s4286_s22 + $0x148] sm:$0xff] }
 0x512   : > { %v1532_v21 = vmul.f32 %v7124_v1, %v7272_v9  ;;  %v1533_v55 = vmul.f32 %v7125_v4, %v7272_v9  ;;  %v1534_v58 = vmul.f32 %v7147_v29, %v7272_v9  ;;  %v1535_v48 = vmul.f32 %v7172_v35, %v7272_v9  ;;  %v4023_v57 = vld [vmem:[%s4286_s22 + $0x140] sm:$0xff]  ;;  %v6271_v1 = vpop.permute.xlu0 %1456 }
 0x513   : > { %3376 = vst [vmem:[%s5391_s6 + $0x120] sm:$0xff] %v3312_v10  ;;  %3377 = vst [vmem:[%s5391_s6 + $0x128] sm:$0xff] %v3313_v2  ;;  %v1229_v61 = vpop.permute.xlu1 %1228  ;;  %v7273_v6 = vmov 1   ;;  %v4026_v2 = vld [vmem:[%s4286_s22 + $0x158] sm:$0xff] }
 0x514   : > { %3378 = vst [vmem:[%s5391_s6 + $0x130] sm:$0xff] %v3314_v11  ;;  %3379 = vst [vmem:[%s5391_s6 + $0x138] sm:$0xff] %v3315_v36  ;;  %v1317_v26 = vmul.f32 %v7268_v24, %v1229_v61  ;;  %v1318_v22 = vmul.f32 %v7269_v54, %v1229_v61  ;;  %v1319_v18 = vmul.f32 %v7270_v31, %v1229_v61  ;;  %v7274_v36 = vld [vmem:[#allocation17_spill] sm:$0xff] }
 0x515   : > { %v1320_v42 = vmul.f32 %v7271_v16, %v1229_v61  ;;  %3909 = vset.pattern.permute.xlu1 %v7273_v6  ;;  %7275 = vst [vmem:[#allocation37_spill] sm:$0xff] %v6271_v1 }
 0x516   : > { %v1381_v53 = vadd.f32 %v4023_v57, %v1317_v26  ;;  %v1382_v63 = vadd.f32 %v4024_v20, %v1318_v22  ;;  %v1383_v10 = vadd.f32 %v4025_v13, %v1319_v18  ;;  %1468 = vperm.xlu1 %3909, %v7274_v36   ;;  %v7276_v18 = vld [vmem:[#allocation31_spill] sm:$0xff] }
 0x517   : > { %v1384_v11 = vadd.f32 %v4026_v2, %v1320_v42  ;;  %v1962_v42 = vmul.f32 %v7176_v56, %v7276_v18  ;;  %v1963_v57 = vmul.f32 %v7252_v19, %v7276_v18 }
 0x518   : > { %v1664_v61 = vpop.permute.xlu1 %1663  ;;  %v1596_v52 = vadd.f32 %v1532_v21, %v1381_v53  ;;  %v1597_v5 = vadd.f32 %v1533_v55, %v1382_v63  ;;  %v1598_v4 = vadd.f32 %v1534_v58, %v1383_v10  ;;  %v1964_v21 = vmul.f32 %v7253_v50, %v7276_v18 }
 0x519   : > { %v1599_v29 = vadd.f32 %v1535_v48, %v1384_v11  ;;  %v1747_v9 = vmul.f32 %v7152_v14, %v1664_v61  ;;  %v1748_v6 = vmul.f32 %v7153_v62, %v1664_v61  ;;  %v1749_v26 = vmul.f32 %v7154_v39, %v1664_v61 }
 0x51a   : > { %v1750_v22 = vmul.f32 %v7104_v40, %v1664_v61  ;;  %v1965_v55 = vmul.f32 %v7220_v49, %v7276_v18  ;;  %v7277_v58 = vmov 3  }
 0x51b   : > { %3911 = vset.pattern.permute.xlu1 %v7277_v58  ;;  %v1811_v48 = vadd.f32 %v1747_v9, %v1596_v52  ;;  %v1812_v53 = vadd.f32 %v1748_v6, %v1597_v5  ;;  %v1813_v20 = vadd.f32 %v1749_v26, %v1598_v4  ;;  %v7278_v58 = vld [vmem:[#allocation13_spill] sm:$0xff]  ;;  %v6299_v9 = vpop.permute.xlu0 %1886  ;;  %v7280_v6 = vmov 5  }
 0x51c   : > { %v1814_v63 = vadd.f32 %v1750_v22, %v1599_v29  ;;  %1898 = vperm.xlu1 %3911, %v7274_v36   ;;  %v2392_v5 = vmul.f32 %v5232_v8, %v7278_v58  ;;  %v2393_v4 = vmul.f32 %v7257_v41, %v7278_v58  ;;  %v2394_v29 = vmul.f32 %v7258_v33, %v7278_v58 }
 0x51d   : > { %v2094_v13 = vpop.permute.xlu1 %2093  ;;  %v2026_v10 = vadd.f32 %v1962_v42, %v1811_v48  ;;  %v2027_v2 = vadd.f32 %v1963_v57, %v1812_v53  ;;  %v2028_v11 = vadd.f32 %v1964_v21, %v1813_v20  ;;  %v2395_v52 = vmul.f32 %v5244_v30, %v7278_v58  ;;  %7279 = vst [vmem:[#allocation51_spill] sm:$0xff] %v6299_v9 }
 0x51e   : > { %v2029_v61 = vadd.f32 %v1965_v55, %v1814_v63  ;;  %v2177_v1 = vmul.f32 %v7200_v51, %v2094_v13  ;;  %v2178_v50 = vmul.f32 %v7238_v17, %v2094_v13  ;;  %v2179_v19 = vmul.f32 %v7239_v7, %v2094_v13 }
 0x51f   : > { %v2180_v18 = vmul.f32 %v5256_v34, %v2094_v13 }
 0x520   : > { %3913 = vset.pattern.permute.xlu1 %v7280_v6  ;;  %v2241_v26 = vadd.f32 %v2177_v1, %v2026_v10  ;;  %v2242_v22 = vadd.f32 %v2178_v50, %v2027_v2  ;;  %v2243_v42 = vadd.f32 %v2179_v19, %v2028_v11  ;;  %v7281_v6 = vld [vmem:[#allocation12_spill] sm:$0xff]  ;;  %v7282_v2 = vmov 7   ;;  %v6316_v11 = vpop.permute.xlu0 %2316 }
 0x521   : > { %v2244_v57 = vadd.f32 %v2180_v18, %v2029_v61  ;;  %2328 = vperm.xlu1 %3913, %v7274_v36   ;;  %v2822_v1 = vmul.f32 %v5259_v47, %v7281_v6  ;;  %v2823_v19 = vmul.f32 %v5263_v60, %v7281_v6  ;;  %v2824_v50 = vmul.f32 %v7227_v12, %v7281_v6 }
 0x522   : > { %v2524_v21 = vpop.permute.xlu1 %2523  ;;  %v2456_v55 = vadd.f32 %v2392_v5, %v2241_v26  ;;  %v2457_v48 = vadd.f32 %v2393_v4, %v2242_v22  ;;  %v2458_v53 = vadd.f32 %v2394_v29, %v2243_v42  ;;  %v2825_v10 = vmul.f32 %v5269_v23, %v7281_v6  ;;  %7283 = vst [vmem:[#allocation53_spill] sm:$0xff] %v6316_v11 }
 0x523   : > { %v2459_v20 = vadd.f32 %v2395_v52, %v2244_v57  ;;  %v2607_v63 = vmul.f32 %v5272_v38, %v2524_v21  ;;  %v2608_v13 = vmul.f32 %v7243_v43, %v2524_v21  ;;  %v2609_v58 = vmul.f32 %v7244_v3, %v2524_v21 }
 0x524   : > { %v2610_v9 = vmul.f32 %v5288_v28, %v2524_v21  ;;  %v1321_v42 = vmul.f32 %v7268_v24, %v6185_v46  ;;  %v1322_v57 = vmul.f32 %v7269_v54, %v6185_v46  ;;  %v1323_v21 = vmul.f32 %v7270_v31, %v6185_v46 }
 0x525   : > { %3915 = vset.pattern.permute.xlu1 %v7282_v2  ;;  %v2671_v61 = vadd.f32 %v2607_v63, %v2456_v55  ;;  %v2672_v18 = vadd.f32 %v2608_v13, %v2457_v48  ;;  %v2673_v5 = vadd.f32 %v2609_v58, %v2458_v53  ;;  %v1324_v55 = vmul.f32 %v7271_v16, %v6185_v46  ;;  %v7284_v13 = vld [vmem:[#allocation42_spill] sm:$0xff]  ;;  %v4030_v16 = vld [vmem:[%s4286_s22 + $0x178] sm:$0xff] }
 0x526   : > { %v2674_v4 = vadd.f32 %v2610_v9, %v2459_v20  ;;  %2758 = vperm.xlu1 %3915, %v7274_v36   ;;  %v3252_v58 = vmul.f32 %v5303_v25, %v7284_v13  ;;  %v3253_v46 = vmul.f32 %v5306_v32, %v7284_v13  ;;  %v3254_v6 = vmul.f32 %v7265_v37, %v7284_v13 }
 0x527   : > { %v2886_v29 = vadd.f32 %v2822_v1, %v2671_v61  ;;  %v2887_v52 = vadd.f32 %v2823_v19, %v2672_v18  ;;  %v2888_v26 = vadd.f32 %v2824_v50, %v2673_v5  ;;  %v2954_v48 = vpop.permute.xlu1 %2953  ;;  %v3255_v1 = vmul.f32 %v5327_v45, %v7284_v13  ;;  %v6341_v19 = vpop.permute.xlu0 %2746  ;;  %v4027_v61 = vld [vmem:[%s4286_s22 + $0x160] sm:$0xff]  ;;  %v4028_v5 = vld [vmem:[%s4286_s22 + $0x168] sm:$0xff] }
 0x528   : > { %v2889_v22 = vadd.f32 %v2825_v10, %v2674_v4  ;;  %v3037_v9 = vmul.f32 %v5330_v27, %v2954_v48  ;;  %v3038_v53 = vmul.f32 %v5333_v15, %v2954_v48  ;;  %v3039_v20 = vmul.f32 %v5351_v0, %v2954_v48  ;;  %7285 = vst [vmem:[#allocation35_spill] sm:$0xff] %v6341_v19 }
 0x529   : > { %v3040_v63 = vmul.f32 %v5354_v44, %v2954_v48  ;;  %v1385_v18 = vadd.f32 %v4027_v61, %v1321_v42  ;;  %v1386_v4 = vadd.f32 %v4028_v5, %v1322_v57  ;;  %v4029_v48 = vld [vmem:[%s4286_s22 + $0x170] sm:$0xff]  ;;  %v1388_v31 = vadd.f32 %v4030_v16, %v1324_v55  ;;  %v7288_v42 = vld [vmem:[#allocation24_spill] sm:$0xff] }
 0x52a   : > { %3918 = vset.pattern.permute.xlu1 %v7214_v59  ;;  %v3101_v50 = vadd.f32 %v3037_v9, %v2886_v29  ;;  %v3102_v10 = vadd.f32 %v3038_v53, %v2887_v52  ;;  %v3103_v59 = vadd.f32 %v3039_v20, %v2888_v26  ;;  %v1387_v11 = vadd.f32 %v4029_v48, %v1323_v21  ;;  %v7286_v52 = vld [vmem:[#allocation22_spill] sm:$0xff] }
 0x52b   : > { %3188 = vperm.xlu1 %3918, %v7274_v36   ;;  %v3104_v2 = vadd.f32 %v3040_v63, %v2889_v22  ;;  %v7287_v22 = vld [vmem:[#allocation23_spill] sm:$0xff]  ;;  %v7289_v21 = vld [vmem:[#allocation18_spill] sm:$0xff] }
 0x52c   : > { %v3316_v13 = vadd.f32 %v3252_v58, %v3101_v50  ;;  %v3317_v36 = vadd.f32 %v3253_v46, %v3102_v10  ;;  %v3318_v54 = vadd.f32 %v3254_v6, %v3103_v59  ;;  %v1453_v29 = vpop.permute.xlu1 %1452  ;;  %v1751_v20 = vmul.f32 %v7152_v14, %v7289_v21  ;;  %v6363_v50 = vpop.permute.xlu0 %3176 }
 0x52d   : > { %v3319_v19 = vadd.f32 %v3255_v1, %v3104_v2  ;;  %v1536_v26 = vmul.f32 %v7286_v52, %v1453_v29  ;;  %v1537_v9 = vmul.f32 %v7287_v22, %v1453_v29  ;;  %v1538_v53 = vmul.f32 %v7288_v42, %v1453_v29  ;;  %7290 = vst [vmem:[#allocation21_spill] sm:$0xff] %v6363_v50 }
 0x52e   : > { %v1539_v57 = vmul.f32 %v7172_v35, %v1453_v29  ;;  %v1752_v16 = vmul.f32 %v7153_v62, %v7289_v21  ;;  %v1753_v55 = vmul.f32 %v7154_v39, %v7289_v21  ;;  %v1754_v63 = vmul.f32 %v7104_v40, %v7289_v21  ;;  %3380 = vst [vmem:[%s5391_s6 + $0x140] sm:$0xff] %v3316_v13  ;;  %v7291_v29 = vld [vmem:[#allocation33_spill] sm:$0xff]  ;;  %v7292_v21 = vld [vmem:[#allocation34_spill] sm:$0xff] }
 0x52f   : > { %3381 = vst [vmem:[%s5391_s6 + $0x148] sm:$0xff] %v3317_v36  ;;  %3382 = vst [vmem:[%s5391_s6 + $0x150] sm:$0xff] %v3318_v54  ;;  %v1600_v58 = vadd.f32 %v1536_v26, %v1385_v18  ;;  %v1601_v46 = vadd.f32 %v1537_v9, %v1386_v4  ;;  %v1602_v6 = vadd.f32 %v1538_v53, %v1387_v11 }
 0x530   : > { %3383 = vst [vmem:[%s5391_s6 + $0x158] sm:$0xff] %v3319_v19  ;;  %v1603_v1 = vadd.f32 %v1539_v57, %v1388_v31  ;;  %v7293_v19 = vld [vmem:[#allocation15_spill] sm:$0xff]  ;;  %v6377_v57 = vpop.permute.xlu0 %1243 }
 0x531   : > { %v1883_v10 = vpop.permute.xlu1 %1882  ;;  %v1815_v59 = vadd.f32 %v1751_v20, %v1600_v58  ;;  %v1816_v2 = vadd.f32 %v1752_v16, %v1601_v46  ;;  %v1817_v61 = vadd.f32 %v1753_v55, %v1602_v6  ;;  %v2181_v18 = vmul.f32 %v7200_v51, %v7293_v19 }
 0x532   : > { %v1818_v5 = vadd.f32 %v1754_v63, %v1603_v1  ;;  %v1966_v48 = vmul.f32 %v7176_v56, %v1883_v10  ;;  %v1967_v39 = vmul.f32 %v7291_v29, %v1883_v10  ;;  %v1968_v13 = vmul.f32 %v7292_v21, %v1883_v10 }
 0x533   : > { %v1969_v54 = vmul.f32 %v7220_v49, %v1883_v10  ;;  %v2182_v31 = vmul.f32 %v7238_v17, %v7293_v19  ;;  %v2183_v11 = vmul.f32 %v7239_v7, %v7293_v19  ;;  %v2184_v4 = vmul.f32 %v5256_v34, %v7293_v19  ;;  %v7294_v19 = vld [vmem:[#allocation11_spill] sm:$0xff] }
 0x534   : > { %v2030_v36 = vadd.f32 %v1966_v48, %v1815_v59  ;;  %v2031_v26 = vadd.f32 %v1967_v39, %v1816_v2  ;;  %v2032_v9 = vadd.f32 %v1968_v13, %v1817_v61  ;;  %v2611_v39 = vmul.f32 %v5272_v38, %v7294_v19 }
 0x535   : > { %v2033_v53 = vadd.f32 %v1969_v54, %v1818_v5  ;;  %v2612_v59 = vmul.f32 %v7243_v43, %v7294_v19  ;;  %v2613_v2 = vmul.f32 %v7244_v3, %v7294_v19  ;;  %v2614_v61 = vmul.f32 %v5288_v28, %v7294_v19  ;;  %v7296_v19 = vld [vmem:[#allocation36_spill] sm:$0xff] }
 0x536   : > { %v2313_v20 = vpop.permute.xlu1 %2312  ;;  %v2245_v16 = vadd.f32 %v2181_v18, %v2030_v36  ;;  %v2246_v55 = vadd.f32 %v2182_v31, %v2031_v26  ;;  %v2247_v63 = vadd.f32 %v2183_v11, %v2032_v9  ;;  %v6391_v26 = vpop.permute.xlu0 %1675 }
 0x537   : > { %v2248_v58 = vadd.f32 %v2184_v4, %v2033_v53  ;;  %v2396_v46 = vmul.f32 %v5232_v8, %v2313_v20  ;;  %v2397_v6 = vmul.f32 %v7257_v41, %v2313_v20  ;;  %v2398_v1 = vmul.f32 %v7258_v33, %v2313_v20  ;;  %7295 = vst [vmem:[#allocation45_spill] sm:$0xff] %v6391_v26 }
 0x538   : > { %v2399_v10 = vmul.f32 %v5244_v30, %v2313_v20 }
 0x539   : > { %v2460_v5 = vadd.f32 %v2396_v46, %v2245_v16  ;;  %v2461_v48 = vadd.f32 %v2397_v6, %v2246_v55  ;;  %v2462_v13 = vadd.f32 %v2398_v1, %v2247_v63  ;;  %v3041_v16 = vmul.f32 %v5330_v27, %v7296_v19 }
 0x53a   : > { %v2463_v54 = vadd.f32 %v2399_v10, %v2248_v58  ;;  %v3042_v55 = vmul.f32 %v5333_v15, %v7296_v19  ;;  %v3043_v63 = vmul.f32 %v5351_v0, %v7296_v19  ;;  %v3044_v58 = vmul.f32 %v5354_v44, %v7296_v19 }
 0x53b   : > { %v2743_v18 = vpop.permute.xlu1 %2742  ;;  %v2675_v31 = vadd.f32 %v2611_v39, %v2460_v5  ;;  %v2676_v11 = vadd.f32 %v2612_v59, %v2461_v48  ;;  %v2677_v4 = vadd.f32 %v2613_v2, %v2462_v13 }
 0x53c   : > { %v2678_v36 = vadd.f32 %v2614_v61, %v2463_v54  ;;  %v2826_v9 = vmul.f32 %v5259_v47, %v2743_v18  ;;  %v2827_v53 = vmul.f32 %v5263_v60, %v2743_v18  ;;  %v2828_v20 = vmul.f32 %v7227_v12, %v2743_v18 }
 0x53d   : > { %v2829_v50 = vmul.f32 %v5269_v23, %v2743_v18 }
 0x53e   : > { %v2890_v46 = vadd.f32 %v2826_v9, %v2675_v31  ;;  %v2891_v6 = vadd.f32 %v2827_v53, %v2676_v11  ;;  %v2892_v1 = vadd.f32 %v2828_v20, %v2677_v4  ;;  %v6409_v31 = vpop.permute.xlu0 %2105  ;;  %v7298_v20 = vld [vmem:[#allocation27_spill] sm:$0xff] }
 0x53f   : > { %v2893_v10 = vadd.f32 %v2829_v50, %v2678_v36  ;;  %7297 = vst [vmem:[#allocation8_spill] sm:$0xff] %v6409_v31 }
 0x540   : > { %v3173_v39 = vpop.permute.xlu1 %3172  ;;  %v3105_v59 = vadd.f32 %v3041_v16, %v2890_v46  ;;  %v3106_v2 = vadd.f32 %v3042_v55, %v2891_v6  ;;  %v3107_v61 = vadd.f32 %v3043_v63, %v2892_v1  ;;  %v7299_v16 = vld [vmem:[#allocation28_spill] sm:$0xff]  ;;  %v7300_v63 = vld [vmem:[#allocation29_spill] sm:$0xff] }
 0x541   : > { %v3108_v5 = vadd.f32 %v3044_v58, %v2893_v10  ;;  %v3256_v48 = vmul.f32 %v5303_v25, %v3173_v39  ;;  %v3257_v13 = vmul.f32 %v5306_v32, %v3173_v39  ;;  %v3258_v54 = vmul.f32 %v7265_v37, %v3173_v39  ;;  %v7301_v46 = vld [vmem:[#allocation37_spill] sm:$0xff] }
 0x542   : > { %v3259_v18 = vmul.f32 %v5327_v45, %v3173_v39  ;;  %v1540_v6 = vmul.f32 %v7286_v52, %v7301_v46  ;;  %v1541_v1 = vmul.f32 %v7287_v22, %v7301_v46  ;;  %v1542_v10 = vmul.f32 %v7288_v42, %v7301_v46 }
 0x543   : > { %v3320_v11 = vadd.f32 %v3256_v48, %v3105_v59  ;;  %v3321_v50 = vadd.f32 %v3257_v13, %v3106_v2  ;;  %v3322_v4 = vadd.f32 %v3258_v54, %v3107_v61  ;;  %v1543_v39 = vmul.f32 %v7172_v35, %v7301_v46  ;;  %v6427_v59 = vpop.permute.xlu0 %2535  ;;  %v4031_v2 = vld [vmem:[%s4286_s22 + $0x180] sm:$0xff]  ;;  %v4033_v13 = vld [vmem:[%s4286_s22 + $0x190] sm:$0xff] }
 0x544   : > { %v3323_v36 = vadd.f32 %v3259_v18, %v3108_v5  ;;  %7302 = vst [vmem:[#allocation49_spill] sm:$0xff] %v6427_v59  ;;  %v4032_v5 = vld [vmem:[%s4286_s22 + $0x188] sm:$0xff]  ;;  %v4034_v18 = vld [vmem:[%s4286_s22 + $0x198] sm:$0xff]  ;;  %v7303_v46 = vld [vmem:[#allocation38_spill] sm:$0xff] }
 0x545   : > { %3384 = vst [vmem:[%s5391_s6 + $0x160] sm:$0xff] %v3320_v11  ;;  %3385 = vst [vmem:[%s5391_s6 + $0x168] sm:$0xff] %v3321_v50  ;;  %v1239_v9 = vpop.permute.xlu1 %1238 }
 0x546   : > { %3386 = vst [vmem:[%s5391_s6 + $0x170] sm:$0xff] %v3322_v4  ;;  %3387 = vst [vmem:[%s5391_s6 + $0x178] sm:$0xff] %v3323_v36  ;;  %v1325_v53 = vmul.f32 %v7268_v24, %v1239_v9  ;;  %v1326_v19 = vmul.f32 %v7298_v20, %v1239_v9  ;;  %v1327_v55 = vmul.f32 %v7299_v16, %v1239_v9 }
 0x547   : > { %v1328_v58 = vmul.f32 %v7300_v63, %v1239_v9 }
 0x548   : > { %v1389_v61 = vadd.f32 %v4031_v2, %v1325_v53  ;;  %v1390_v48 = vadd.f32 %v4032_v5, %v1326_v19  ;;  %v1391_v54 = vadd.f32 %v4033_v13, %v1327_v55  ;;  %v7304_v53 = vld [vmem:[#allocation51_spill] sm:$0xff] }
 0x549   : > { %v1392_v11 = vadd.f32 %v4034_v18, %v1328_v58  ;;  %v1970_v19 = vmul.f32 %v7176_v56, %v7304_v53  ;;  %v1971_v55 = vmul.f32 %v7291_v29, %v7304_v53  ;;  %v1972_v58 = vmul.f32 %v7292_v21, %v7304_v53 }
 0x54a   : > { %v1672_v50 = vpop.permute.xlu1 %1671  ;;  %v1604_v4 = vadd.f32 %v1540_v6, %v1389_v61  ;;  %v1605_v36 = vadd.f32 %v1541_v1, %v1390_v48  ;;  %v1606_v9 = vadd.f32 %v1542_v10, %v1391_v54  ;;  %v1973_v6 = vmul.f32 %v7220_v49, %v7304_v53  ;;  %v6445_v61 = vpop.permute.xlu0 %2965  ;;  %v7306_v53 = vld [vmem:[#allocation53_spill] sm:$0xff] }
 0x54b   : > { %v1607_v31 = vadd.f32 %v1543_v39, %v1392_v11  ;;  %v1755_v26 = vmul.f32 %v7152_v14, %v1672_v50  ;;  %v1756_v42 = vmul.f32 %v7153_v62, %v1672_v50  ;;  %v1757_v35 = vmul.f32 %v7303_v46, %v1672_v50  ;;  %7305 = vst [vmem:[#allocation52_spill] sm:$0xff] %v6445_v61 }
 0x54c   : > { %v1758_v59 = vmul.f32 %v7104_v40, %v1672_v50 }
 0x54d   : > { %v1819_v1 = vadd.f32 %v1755_v26, %v1604_v4  ;;  %v1820_v10 = vadd.f32 %v1756_v42, %v1605_v36  ;;  %v1821_v39 = vadd.f32 %v1757_v35, %v1606_v9  ;;  %v2400_v42 = vmul.f32 %v5232_v8, %v7306_v53 }
 0x54e   : > { %v1822_v2 = vadd.f32 %v1758_v59, %v1607_v31  ;;  %v2401_v35 = vmul.f32 %v7257_v41, %v7306_v53  ;;  %v2402_v26 = vmul.f32 %v7258_v33, %v7306_v53  ;;  %v2403_v31 = vmul.f32 %v5244_v30, %v7306_v53  ;;  %v7308_v53 = vld [vmem:[#allocation35_spill] sm:$0xff] }
 0x54f   : > { %v2102_v5 = vpop.permute.xlu1 %2101  ;;  %v2034_v48 = vadd.f32 %v1970_v19, %v1819_v1  ;;  %v2035_v13 = vadd.f32 %v1971_v55, %v1820_v10  ;;  %v2036_v54 = vadd.f32 %v1972_v58, %v1821_v39  ;;  %v6459_v19 = vpop.permute.xlu0 %1464 }
 0x550   : > { %v2037_v18 = vadd.f32 %v1973_v6, %v1822_v2  ;;  %v2185_v11 = vmul.f32 %v7200_v51, %v2102_v5  ;;  %v2186_v50 = vmul.f32 %v7238_v17, %v2102_v5  ;;  %v2187_v21 = vmul.f32 %v7239_v7, %v2102_v5  ;;  %7307 = vst [vmem:[#allocation19_spill] sm:$0xff] %v6459_v19  ;;  %v4038_v19 = vld [vmem:[%s4286_s22 + $0x1b8] sm:$0xff] }
 0x551   : > { %v2188_v29 = vmul.f32 %v5256_v34, %v2102_v5 }
 0x552   : > { %v2249_v59 = vadd.f32 %v2185_v11, %v2034_v48  ;;  %v2250_v4 = vadd.f32 %v2186_v50, %v2035_v13  ;;  %v2251_v36 = vadd.f32 %v2187_v21, %v2036_v54  ;;  %v2830_v48 = vmul.f32 %v5259_v47, %v7308_v53 }
 0x553   : > { %v2252_v9 = vadd.f32 %v2188_v29, %v2037_v18  ;;  %v2831_v29 = vmul.f32 %v5263_v60, %v7308_v53  ;;  %v2832_v21 = vmul.f32 %v7227_v12, %v7308_v53  ;;  %v2833_v13 = vmul.f32 %v5269_v23, %v7308_v53 }
 0x554   : > { %v2532_v55 = vpop.permute.xlu1 %2531  ;;  %v2464_v58 = vadd.f32 %v2400_v42, %v2249_v59  ;;  %v2465_v6 = vadd.f32 %v2401_v35, %v2250_v4  ;;  %v2466_v1 = vadd.f32 %v2402_v26, %v2251_v36  ;;  %v1329_v42 = vmul.f32 %v7268_v24, %v6377_v57 }
 0x555   : > { %v2467_v10 = vadd.f32 %v2403_v31, %v2252_v9  ;;  %v2615_v39 = vmul.f32 %v5272_v38, %v2532_v55  ;;  %v2616_v2 = vmul.f32 %v7243_v43, %v2532_v55  ;;  %v2617_v5 = vmul.f32 %v7244_v3, %v2532_v55 }
 0x556   : > { %v2618_v61 = vmul.f32 %v5288_v28, %v2532_v55  ;;  %v1330_v35 = vmul.f32 %v7298_v20, %v6377_v57  ;;  %v1331_v26 = vmul.f32 %v7299_v16, %v6377_v57  ;;  %v1332_v31 = vmul.f32 %v7300_v63, %v6377_v57  ;;  %v7310_v57 = vld [vmem:[#allocation21_spill] sm:$0xff] }
 0x557   : > { %v2679_v54 = vadd.f32 %v2615_v39, %v2464_v58  ;;  %v2680_v18 = vadd.f32 %v2616_v2, %v2465_v6  ;;  %v2681_v11 = vadd.f32 %v2617_v5, %v2466_v1  ;;  %v3260_v39 = vmul.f32 %v5303_v25, %v7310_v57 }
 0x558   : > { %v2682_v50 = vadd.f32 %v2618_v61, %v2467_v10  ;;  %v6481_v61 = vpop.permute.xlu0 %1894  ;;  %v3261_v2 = vmul.f32 %v5306_v32, %v7310_v57  ;;  %v3262_v5 = vmul.f32 %v7265_v37, %v7310_v57  ;;  %v3263_v53 = vmul.f32 %v5327_v45, %v7310_v57 }
 0x559   : > { %v2962_v59 = vpop.permute.xlu1 %2961  ;;  %v2894_v4 = vadd.f32 %v2830_v48, %v2679_v54  ;;  %v2895_v36 = vadd.f32 %v2831_v29, %v2680_v18  ;;  %v2896_v9 = vadd.f32 %v2832_v21, %v2681_v11  ;;  %7309 = vst [vmem:[#allocation43_spill] sm:$0xff] %v6481_v61  ;;  %v4035_v54 = vld [vmem:[%s4286_s22 + $0x1a0] sm:$0xff]  ;;  %v4036_v11 = vld [vmem:[%s4286_s22 + $0x1a8] sm:$0xff]  ;;  %v1396_v63 = vadd.f32 %v4038_v19, %v1332_v31 }
 0x55a   : > { %v2897_v55 = vadd.f32 %v2833_v13, %v2682_v50  ;;  %v3045_v58 = vmul.f32 %v5330_v27, %v2962_v59  ;;  %v3046_v6 = vmul.f32 %v5333_v15, %v2962_v59  ;;  %v3047_v1 = vmul.f32 %v5351_v0, %v2962_v59 }
 0x55b   : > { %v3048_v10 = vmul.f32 %v5354_v44, %v2962_v59  ;;  %v1393_v18 = vadd.f32 %v4035_v54, %v1329_v42  ;;  %v1394_v50 = vadd.f32 %v4036_v11, %v1330_v35  ;;  %v4037_v59 = vld [vmem:[%s4286_s22 + $0x1b0] sm:$0xff]  ;;  %v7311_v42 = vld [vmem:[#allocation24_spill] sm:$0xff] }
 0x55c   : > { %v3109_v48 = vadd.f32 %v3045_v58, %v2894_v4  ;;  %v3110_v29 = vadd.f32 %v3046_v6, %v2895_v36  ;;  %v3111_v21 = vadd.f32 %v3047_v1, %v2896_v9  ;;  %v1395_v61 = vadd.f32 %v4037_v59, %v1331_v26  ;;  %v7312_v35 = vld [vmem:[#allocation26_spill] sm:$0xff]  ;;  %v7313_v26 = vld [vmem:[#allocation45_spill] sm:$0xff] }
 0x55d   : > { %v3112_v13 = vadd.f32 %v3048_v10, %v2897_v55  ;;  %v1759_v6 = vmul.f32 %v7152_v14, %v7313_v26  ;;  %v1760_v19 = vmul.f32 %v7153_v62, %v7313_v26  ;;  %v1761_v31 = vmul.f32 %v7303_v46, %v7313_v26  ;;  %v6511_v10 = vpop.permute.xlu0 %2324  ;;  %v7314_v59 = vld [vmem:[#allocation33_spill] sm:$0xff] }
 0x55e   : > { %v3324_v16 = vadd.f32 %v3260_v39, %v3109_v48  ;;  %v3325_v20 = vadd.f32 %v3261_v2, %v3110_v29  ;;  %v3326_v24 = vadd.f32 %v3262_v5, %v3111_v21  ;;  %v1461_v4 = vpop.permute.xlu1 %1460  ;;  %v1762_v1 = vmul.f32 %v7104_v40, %v7313_v26  ;;  %v7315_v26 = vld [vmem:[#allocation34_spill] sm:$0xff] }
 0x55f   : > { %v3327_v57 = vadd.f32 %v3263_v53, %v3112_v13  ;;  %v1544_v36 = vmul.f32 %v7286_v52, %v1461_v4  ;;  %v1545_v9 = vmul.f32 %v7287_v22, %v1461_v4  ;;  %v1546_v55 = vmul.f32 %v7311_v42, %v1461_v4 }
 0x560   : > { %v1547_v58 = vmul.f32 %v7312_v35, %v1461_v4  ;;  %3388 = vst [vmem:[%s5391_s6 + $0x180] sm:$0xff] %v3324_v16  ;;  %3389 = vst [vmem:[%s5391_s6 + $0x188] sm:$0xff] %v3325_v20  ;;  %v7316_v20 = vld [vmem:[#allocation8_spill] sm:$0xff] }
 0x561   : > { %3390 = vst [vmem:[%s5391_s6 + $0x190] sm:$0xff] %v3326_v24  ;;  %3391 = vst [vmem:[%s5391_s6 + $0x198] sm:$0xff] %v3327_v57  ;;  %v1608_v39 = vadd.f32 %v1544_v36, %v1393_v18  ;;  %v1609_v2 = vadd.f32 %v1545_v9, %v1394_v50  ;;  %v1610_v5 = vadd.f32 %v1546_v55, %v1395_v61  ;;  %v6529_v50 = vpop.permute.xlu0 %2754 }
 0x562   : > { %v1611_v53 = vadd.f32 %v1547_v58, %v1396_v63  ;;  %v2189_v24 = vmul.f32 %v7200_v51, %v7316_v20  ;;  %v2190_v61 = vmul.f32 %v7238_v17, %v7316_v20  ;;  %v2191_v63 = vmul.f32 %v7239_v7, %v7316_v20 }
 0x563   : > { %v1891_v48 = vpop.permute.xlu1 %1890  ;;  %v1823_v29 = vadd.f32 %v1759_v6, %v1608_v39  ;;  %v1824_v21 = vadd.f32 %v1760_v19, %v1609_v2  ;;  %v1825_v13 = vadd.f32 %v1761_v31, %v1610_v5  ;;  %v2192_v18 = vmul.f32 %v5256_v34, %v7316_v20 }
 0x564   : > { %v1826_v54 = vadd.f32 %v1762_v1, %v1611_v53  ;;  %v1974_v11 = vmul.f32 %v7176_v56, %v1891_v48  ;;  %v1975_v4 = vmul.f32 %v7314_v59, %v1891_v48  ;;  %v1976_v40 = vmul.f32 %v7315_v26, %v1891_v48 }
 0x565   : > { %v1977_v16 = vmul.f32 %v7220_v49, %v1891_v48  ;;  %v7317_v48 = vld [vmem:[#allocation49_spill] sm:$0xff] }
 0x566   : > { %v2038_v57 = vadd.f32 %v1974_v11, %v1823_v29  ;;  %v2039_v36 = vadd.f32 %v1975_v4, %v1824_v21  ;;  %v2040_v9 = vadd.f32 %v1976_v40, %v1825_v13  ;;  %v2619_v20 = vmul.f32 %v5272_v38, %v7317_v48 }
 0x567   : > { %v2041_v55 = vadd.f32 %v1977_v16, %v1826_v54  ;;  %v2620_v40 = vmul.f32 %v7243_v43, %v7317_v48  ;;  %v2621_v29 = vmul.f32 %v7244_v3, %v7317_v48  ;;  %v2622_v21 = vmul.f32 %v5288_v28, %v7317_v48  ;;  %v6543_v16 = vpop.permute.xlu0 %1253  ;;  %v7318_v48 = vld [vmem:[#allocation52_spill] sm:$0xff] }
 0x568   : > { %v2253_v6 = vadd.f32 %v2189_v24, %v2038_v57  ;;  %v2254_v19 = vadd.f32 %v2190_v61, %v2039_v36  ;;  %v2255_v31 = vadd.f32 %v2191_v63, %v2040_v9 }
 0x569   : > { %v2321_v58 = vpop.permute.xlu1 %2320  ;;  %v2256_v1 = vadd.f32 %v2192_v18, %v2041_v55 }
 0x56a   : > { %v2404_v39 = vmul.f32 %v5232_v8, %v2321_v58  ;;  %v2405_v2 = vmul.f32 %v7257_v41, %v2321_v58  ;;  %v2406_v5 = vmul.f32 %v7258_v33, %v2321_v58  ;;  %v2407_v53 = vmul.f32 %v5244_v30, %v2321_v58 }
 0x56c   : > { %v2468_v13 = vadd.f32 %v2404_v39, %v2253_v6  ;;  %v2469_v54 = vadd.f32 %v2405_v2, %v2254_v19  ;;  %v2470_v11 = vadd.f32 %v2406_v5, %v2255_v31  ;;  %v2471_v4 = vadd.f32 %v2407_v53, %v2256_v1 }
 0x56d   : > { %v3049_v6 = vmul.f32 %v5330_v27, %v7318_v48  ;;  %v3050_v19 = vmul.f32 %v5333_v15, %v7318_v48  ;;  %v3051_v31 = vmul.f32 %v5351_v0, %v7318_v48  ;;  %v3052_v1 = vmul.f32 %v5354_v44, %v7318_v48 }
 0x56e   : > { %v2751_v24 = vpop.permute.xlu1 %2750  ;;  %v2683_v61 = vadd.f32 %v2619_v20, %v2468_v13  ;;  %v2684_v63 = vadd.f32 %v2620_v40, %v2469_v54  ;;  %v2685_v18 = vadd.f32 %v2621_v29, %v2470_v11  ;;  %v2686_v57 = vadd.f32 %v2622_v21, %v2471_v4  ;;  %v6557_v20 = vpop.permute.xlu0 %1683 }
 0x56f   : > { %v2834_v36 = vmul.f32 %v5259_v47, %v2751_v24  ;;  %v2835_v9 = vmul.f32 %v5263_v60, %v2751_v24  ;;  %v2836_v55 = vmul.f32 %v7227_v12, %v2751_v24  ;;  %v2837_v58 = vmul.f32 %v5269_v23, %v2751_v24  ;;  %7319 = vst [vmem:[#allocation44_spill] sm:$0xff] %v6557_v20 }
 0x571   : > { %v2898_v39 = vadd.f32 %v2834_v36, %v2683_v61  ;;  %v2899_v2 = vadd.f32 %v2835_v9, %v2684_v63  ;;  %v2900_v5 = vadd.f32 %v2836_v55, %v2685_v18  ;;  %v2901_v53 = vadd.f32 %v2837_v58, %v2686_v57  ;;  %v7321_v58 = vld [vmem:[#allocation25_spill] sm:$0xff] }
 0x572   : > { %v6567_v55 = vpop.permute.xlu0 %2113 }
 0x573   : > { %v3181_v40 = vpop.permute.xlu1 %3180  ;;  %v3113_v29 = vadd.f32 %v3049_v6, %v2898_v39  ;;  %v3114_v21 = vadd.f32 %v3050_v19, %v2899_v2  ;;  %v3115_v13 = vadd.f32 %v3051_v31, %v2900_v5  ;;  %v3116_v54 = vadd.f32 %v3052_v1, %v2901_v53  ;;  %7320 = vst [vmem:[#allocation10_spill] sm:$0xff] %v6567_v55  ;;  %v7322_v6 = vld [vmem:[#allocation27_spill] sm:$0xff]  ;;  %v7323_v31 = vld [vmem:[#allocation28_spill] sm:$0xff]  ;;  %v7324_v39 = vld [vmem:[#allocation29_spill] sm:$0xff] }
 0x574   : > { %v3264_v11 = vmul.f32 %v5303_v25, %v3181_v40  ;;  %v3265_v4 = vmul.f32 %v5306_v32, %v3181_v40  ;;  %v3266_v24 = vmul.f32 %v7265_v37, %v3181_v40  ;;  %v3267_v61 = vmul.f32 %v5327_v45, %v3181_v40  ;;  %v7325_v5 = vld [vmem:[#allocation19_spill] sm:$0xff] }
 0x575   : > { %v1548_v53 = vmul.f32 %v7286_v52, %v7325_v5  ;;  %v1549_v40 = vmul.f32 %v7287_v22, %v7325_v5 }
 0x576   : > { %v3328_v63 = vadd.f32 %v3264_v11, %v3113_v29  ;;  %v3329_v18 = vadd.f32 %v3265_v4, %v3114_v21  ;;  %v3330_v57 = vadd.f32 %v3266_v24, %v3115_v13  ;;  %v3331_v36 = vadd.f32 %v3267_v61, %v3116_v54  ;;  %v4039_v13 = vld [vmem:[%s4286_s22 + $0x1c0] sm:$0xff]  ;;  %v4040_v11 = vld [vmem:[%s4286_s22 + $0x1c8] sm:$0xff]  ;;  %v4041_v24 = vld [vmem:[%s4286_s22 + $0x1d0] sm:$0xff] }
 0x577   : > { %v1550_v29 = vmul.f32 %v7311_v42, %v7325_v5  ;;  %v1551_v21 = vmul.f32 %v7312_v35, %v7325_v5  ;;  %v7326_v5 = vld [vmem:[#allocation39_spill] sm:$0xff] }
 0x578   : > { %3392 = vst [vmem:[%s5391_s6 + $0x1a0] sm:$0xff] %v3328_v63  ;;  %3393 = vst [vmem:[%s5391_s6 + $0x1a8] sm:$0xff] %v3329_v18  ;;  %v1249_v9 = vpop.permute.xlu1 %1248  ;;  %v4042_v63 = vld [vmem:[%s4286_s22 + $0x1d8] sm:$0xff] }
 0x579   : > { %3394 = vst [vmem:[%s5391_s6 + $0x1b0] sm:$0xff] %v3330_v57  ;;  %3395 = vst [vmem:[%s5391_s6 + $0x1b8] sm:$0xff] %v3331_v36  ;;  %v1333_v48 = vmul.f32 %v7321_v58, %v1249_v9  ;;  %v1334_v19 = vmul.f32 %v7322_v6, %v1249_v9  ;;  %v1335_v1 = vmul.f32 %v7323_v31, %v1249_v9 }
 0x57a   : > { %v1336_v2 = vmul.f32 %v7324_v39, %v1249_v9 }
 0x57b   : > { %v1397_v54 = vadd.f32 %v4039_v13, %v1333_v48  ;;  %v1398_v4 = vadd.f32 %v4040_v11, %v1334_v19  ;;  %v1399_v61 = vadd.f32 %v4041_v24, %v1335_v1  ;;  %v7327_v48 = vld [vmem:[#allocation43_spill] sm:$0xff] }
 0x57c   : > { %v1400_v18 = vadd.f32 %v4042_v63, %v1336_v2  ;;  %v1978_v19 = vmul.f32 %v7176_v56, %v7327_v48  ;;  %v1979_v1 = vmul.f32 %v7314_v59, %v7327_v48  ;;  %v1980_v2 = vmul.f32 %v7315_v26, %v7327_v48 }
 0x57d   : > { %v1680_v57 = vpop.permute.xlu1 %1679  ;;  %v1612_v36 = vadd.f32 %v1548_v53, %v1397_v54  ;;  %v1613_v9 = vadd.f32 %v1549_v40, %v1398_v4  ;;  %v1614_v55 = vadd.f32 %v1550_v29, %v1399_v61  ;;  %v1981_v53 = vmul.f32 %v7220_v49, %v7327_v48  ;;  %v6597_v40 = vpop.permute.xlu0 %2543 }
 0x57e   : > { %v1615_v20 = vadd.f32 %v1551_v21, %v1400_v18  ;;  %v1763_v22 = vmul.f32 %v7152_v14, %v1680_v57  ;;  %v1764_v42 = vmul.f32 %v7153_v62, %v1680_v57  ;;  %v1765_v52 = vmul.f32 %v7303_v46, %v1680_v57 }
 0x57f   : > { %v1766_v35 = vmul.f32 %v7326_v5, %v1680_v57  ;;  %v2408_v48 = vmul.f32 %v5232_v8, %v6511_v10 }
 0x580   : > { %v1827_v29 = vadd.f32 %v1763_v22, %v1612_v36  ;;  %v1828_v21 = vadd.f32 %v1764_v42, %v1613_v9  ;;  %v1829_v13 = vadd.f32 %v1765_v52, %v1614_v55  ;;  %v2409_v52 = vmul.f32 %v7257_v41, %v6511_v10 }
 0x581   : > { %v1830_v54 = vadd.f32 %v1766_v35, %v1615_v20  ;;  %v2410_v22 = vmul.f32 %v7258_v33, %v6511_v10  ;;  %v2411_v42 = vmul.f32 %v5244_v30, %v6511_v10  ;;  %v6611_v35 = vpop.permute.xlu0 %2973  ;;  %v2838_v10 = vmul.f32 %v5259_v47, %v6529_v50 }
 0x582   : > { %v2110_v11 = vpop.permute.xlu1 %2109  ;;  %v2042_v4 = vadd.f32 %v1978_v19, %v1827_v29  ;;  %v2043_v24 = vadd.f32 %v1979_v1, %v1828_v21  ;;  %v2044_v61 = vadd.f32 %v1980_v2, %v1829_v13 }
 0x583   : > { %v2045_v63 = vadd.f32 %v1981_v53, %v1830_v54  ;;  %v2193_v18 = vmul.f32 %v7200_v51, %v2110_v11  ;;  %v2194_v57 = vmul.f32 %v7238_v17, %v2110_v11  ;;  %v2195_v26 = vmul.f32 %v7239_v7, %v2110_v11 }
 0x584   : > { %v2196_v59 = vmul.f32 %v5256_v34, %v2110_v11 }
 0x585   : > { %v2257_v20 = vadd.f32 %v2193_v18, %v2042_v4  ;;  %v2258_v55 = vadd.f32 %v2194_v57, %v2043_v24  ;;  %v2259_v36 = vadd.f32 %v2195_v26, %v2044_v61  ;;  %v2839_v26 = vmul.f32 %v5263_v60, %v6529_v50 }
 0x586   : > { %v2260_v9 = vadd.f32 %v2196_v59, %v2045_v63  ;;  %v2840_v59 = vmul.f32 %v7227_v12, %v6529_v50  ;;  %v2841_v4 = vmul.f32 %v5269_v23, %v6529_v50  ;;  %v1337_v57 = vmul.f32 %v7321_v58, %v6543_v16 }
 0x587   : > { %v2540_v19 = vpop.permute.xlu1 %2539  ;;  %v2472_v1 = vadd.f32 %v2408_v48, %v2257_v20  ;;  %v2473_v2 = vadd.f32 %v2409_v52, %v2258_v55  ;;  %v2474_v53 = vadd.f32 %v2410_v22, %v2259_v36  ;;  %v1338_v48 = vmul.f32 %v7322_v6, %v6543_v16 }
 0x588   : > { %v2475_v29 = vadd.f32 %v2411_v42, %v2260_v9  ;;  %v2623_v21 = vmul.f32 %v5272_v38, %v2540_v19  ;;  %v2624_v13 = vmul.f32 %v7243_v43, %v2540_v19  ;;  %v2625_v54 = vmul.f32 %v7244_v3, %v2540_v19  ;;  %v3185_v42 = vpop.permute.xlu0 %3184 }
 0x589   : > { %v2626_v11 = vmul.f32 %v5288_v28, %v2540_v19  ;;  %v1339_v52 = vmul.f32 %v7323_v31, %v6543_v16  ;;  %v1340_v22 = vmul.f32 %v7324_v39, %v6543_v16  ;;  %v3268_v16 = vmul.f32 %v5303_v25, %v3185_v42 }
 0x58a   : > { %v2687_v24 = vadd.f32 %v2623_v21, %v2472_v1  ;;  %v2688_v61 = vadd.f32 %v2624_v13, %v2473_v2  ;;  %v2689_v63 = vadd.f32 %v2625_v54, %v2474_v53  ;;  %v3269_v39 = vmul.f32 %v5306_v32, %v3185_v42  ;;  %v4043_v54 = vld [vmem:[%s4286_s22 + $0x1e0] sm:$0xff] }
 0x58b   : > { %v2690_v18 = vadd.f32 %v2626_v11, %v2475_v29  ;;  %v3270_v1 = vmul.f32 %v7265_v37, %v3185_v42  ;;  %v3271_v2 = vmul.f32 %v5327_v45, %v3185_v42  ;;  %v1401_v11 = vadd.f32 %v4043_v54, %v1337_v57  ;;  %v7330_v57 = vld [vmem:[#allocation24_spill] sm:$0xff] }
 0x58c   : > { %v2970_v20 = vpop.permute.xlu1 %2969  ;;  %v2902_v55 = vadd.f32 %v2838_v10, %v2687_v24  ;;  %v2903_v50 = vadd.f32 %v2839_v26, %v2688_v61  ;;  %v2904_v36 = vadd.f32 %v2840_v59, %v2689_v63  ;;  %v4044_v10 = vld [vmem:[%s4286_s22 + $0x1e8] sm:$0xff]  ;;  %v4045_v59 = vld [vmem:[%s4286_s22 + $0x1f0] sm:$0xff]  ;;  %v4046_v24 = vld [vmem:[%s4286_s22 + $0x1f8] sm:$0xff]  ;;  %s3419_s22 = sshll.u32 %s5391_s6, 4  ;;  %s6708_s22 = int_to_ptr.vmem [resolvable:$true] %s3419_s22 }
 0x58d   : > { %v2905_v9 = vadd.f32 %v2841_v4, %v2690_v18  ;;  %v3053_v19 = vmul.f32 %v5330_v27, %v2970_v20  ;;  %v3054_v58 = vmul.f32 %v5333_v15, %v2970_v20  ;;  %v3055_v6 = vmul.f32 %v5351_v0, %v2970_v20  ;;  %s4075_s8 = scalar_lea.vmem %s6708_s22, 8192  ;;  %p4082_p5 = scmp.lt.s32.totalorder %s6708_s22, %s4080_s11 }
 0x58e   : > { %v3056_v31 = vmul.f32 %v5354_v44, %v2970_v20  ;;  %v1402_v26 = vadd.f32 %v4044_v10, %v1338_v48  ;;  %v1403_v4 = vadd.f32 %v4045_v59, %v1339_v52  ;;  %v1404_v61 = vadd.f32 %v4046_v24, %v1340_v22  ;;  %v7331_v48 = vld [vmem:[#allocation26_spill] sm:$0xff]  ;;  %v7332_v52 = vld [vmem:[#allocation44_spill] sm:$0xff]  ;;  %v7333_v59 = vld [vmem:[#allocation33_spill] sm:$0xff]  ;;  %p4076_p11 = scmp.ne.s32.totalorder %s6708_s22, %s4075_s8  ;;  %p4083_p7 = scmp.lt.s32.totalorder %s4081_s12, %s4075_s8 }
 0x58f   : > { %v3117_v53 = vadd.f32 %v3053_v19, %v2902_v55  ;;  %v3118_v29 = vadd.f32 %v3054_v58, %v2903_v50  ;;  %v3119_v21 = vadd.f32 %v3055_v6, %v2904_v36  ;;  %v7328_v50 = vld [vmem:[#allocation22_spill] sm:$0xff]  ;;  %v1768_v22 = vmul.f32 %v7153_v62, %v7332_v52 }
 0x590   : > { %v3120_v13 = vadd.f32 %v3056_v31, %v2905_v9  ;;  %v7329_v9 = vld [vmem:[#allocation23_spill] sm:$0xff]  ;;  %v1767_v31 = vmul.f32 %v7152_v14, %v7332_v52  ;;  %v7334_v24 = vld [vmem:[#allocation34_spill] sm:$0xff]  ;;  %p4077_p13 = pnand %p4076_p11, %p7336_p12  ;;  %p4084_p8 = por %p4083_p7, %p4082_p5 }
 0x591   : > { %v3332_v63 = vadd.f32 %v3268_v16, %v3117_v53  ;;  %v3333_v18 = vadd.f32 %v3269_v39, %v3118_v29  ;;  %v3334_v20 = vadd.f32 %v3270_v1, %v3119_v21  ;;  %v1469_v55 = vpop.permute.xlu1 %1468  ;;  %v1769_v16 = vmul.f32 %v7303_v46, %v7332_v52 }
 0x592   : > { %v3335_v42 = vadd.f32 %v3271_v2, %v3120_v13  ;;  %v1552_v36 = vmul.f32 %v7328_v50, %v1469_v55  ;;  %v1553_v19 = vmul.f32 %v7329_v9, %v1469_v55  ;;  %v1554_v58 = vmul.f32 %v7330_v57, %v1469_v55  ;;  %p4078_p4 = pneg %p4077_p13 }
 0x593   : > { %v1555_v6 = vmul.f32 %v7331_v48, %v1469_v55  ;;  %v1770_v39 = vmul.f32 %v7326_v5, %v7332_v52  ;;  %3396 = vst [vmem:[%s5391_s6 + $0x1c0] sm:$0xff] %v3332_v63  ;;  %3397 = vst [vmem:[%s5391_s6 + $0x1c8] sm:$0xff] %v3333_v18  ;;  %v7335_v63 = vld [vmem:[#allocation10_spill] sm:$0xff]  ;;  %v2629_v48 = vmul.f32 %v7244_v3, %v6597_v40 }
 0x594   : > { %3398 = vst [vmem:[%s5391_s6 + $0x1d0] sm:$0xff] %v3334_v20  ;;  %3399 = vst [vmem:[%s5391_s6 + $0x1d8] sm:$0xff] %v3335_v42  ;;  %v1616_v1 = vadd.f32 %v1552_v36, %v1401_v11  ;;  %v1617_v2 = vadd.f32 %v1553_v19, %v1402_v26  ;;  %v1618_v53 = vadd.f32 %v1554_v58, %v1403_v4  ;;  %p4085_p10 = pnand %p4084_p8, %p4078_p4 }
 0x595   : > { %v1619_v29 = vadd.f32 %v1555_v6, %v1404_v61  ;;  %v2197_v18 = vmul.f32 %v7200_v51, %v7335_v63  ;;  %v2198_v11 = vmul.f32 %v7238_v17, %v7335_v63  ;;  %v2199_v26 = vmul.f32 %v7239_v7, %v7335_v63 }
 0x596   : > { %v1831_v13 = vadd.f32 %v1767_v31, %v1616_v1  ;;  %v1832_v14 = vadd.f32 %v1768_v22, %v1617_v2  ;;  %v1833_v54 = vadd.f32 %v1769_v16, %v1618_v53  ;;  %v2200_v4 = vmul.f32 %v5256_v34, %v7335_v63 }
 0x597   : > { %v1899_v21 = vpop.permute.xlu1 %1898  ;;  %v1834_v10 = vadd.f32 %v1770_v39, %v1619_v29  ;;  %v2627_v34 = vmul.f32 %v5272_v38, %v6597_v40  ;;  %v2628_v58 = vmul.f32 %v7243_v43, %v6597_v40  ;;  %v2630_v6 = vmul.f32 %v5288_v28, %v6597_v40 }
 0x598   : > { %v1982_v62 = vmul.f32 %v7176_v56, %v1899_v21  ;;  %v1983_v46 = vmul.f32 %v7333_v59, %v1899_v21  ;;  %v1984_v55 = vmul.f32 %v7334_v24, %v1899_v21  ;;  %v1985_v5 = vmul.f32 %v7220_v49, %v1899_v21 }
 0x599   : > { %v3057_v28 = vmul.f32 %v5330_v27, %v6611_v35  ;;  %v3058_v40 = vmul.f32 %v5333_v15, %v6611_v35  ;;  %v3059_v2 = vmul.f32 %v5351_v0, %v6611_v35  ;;  %v3060_v53 = vmul.f32 %v5354_v44, %v6611_v35 }
 0x59a   : > { %v2046_v61 = vadd.f32 %v1982_v62, %v1831_v13  ;;  %v2047_v56 = vadd.f32 %v1983_v46, %v1832_v14  ;;  %v2048_v20 = vadd.f32 %v1984_v55, %v1833_v54  ;;  %v2049_v42 = vadd.f32 %v1985_v5, %v1834_v10 }
 0x59c   : > { %v2329_v50 = vpop.permute.xlu1 %2328  ;;  %v2261_v36 = vadd.f32 %v2197_v18, %v2046_v61  ;;  %v2262_v9 = vadd.f32 %v2198_v11, %v2047_v56  ;;  %v2263_v49 = vadd.f32 %v2199_v26, %v2048_v20  ;;  %v2264_v19 = vadd.f32 %v2200_v4, %v2049_v42 }
 0x59d   : > { %v2412_v51 = vmul.f32 %v5232_v8, %v2329_v50  ;;  %v2413_v57 = vmul.f32 %v7257_v41, %v2329_v50  ;;  %v2414_v17 = vmul.f32 %v7258_v33, %v2329_v50  ;;  %v2415_v7 = vmul.f32 %v5244_v30, %v2329_v50 }
 0x59f   : > { %v2476_v52 = vadd.f32 %v2412_v51, %v2261_v36  ;;  %v2477_v8 = vadd.f32 %v2413_v57, %v2262_v9  ;;  %v2478_v31 = vadd.f32 %v2414_v17, %v2263_v49  ;;  %v2479_v41 = vadd.f32 %v2415_v7, %v2264_v19 }
 0x5a1   : > { %v2759_v22 = vpop.permute.xlu1 %2758  ;;  %v2691_v33 = vadd.f32 %v2627_v34, %v2476_v52  ;;  %v2692_v30 = vadd.f32 %v2628_v58, %v2477_v8  ;;  %v2693_v16 = vadd.f32 %v2629_v48, %v2478_v31  ;;  %v2694_v38 = vadd.f32 %v2630_v6, %v2479_v41 }
 0x5a2   : > { %v2842_v39 = vmul.f32 %v5259_v47, %v2759_v22  ;;  %v2843_v43 = vmul.f32 %v5263_v60, %v2759_v22  ;;  %v2844_v3 = vmul.f32 %v7227_v12, %v2759_v22  ;;  %v2845_v1 = vmul.f32 %v5269_v23, %v2759_v22 }
 0x5a4   : > { %v2906_v29 = vadd.f32 %v2842_v39, %v2691_v33  ;;  %v2907_v47 = vadd.f32 %v2843_v43, %v2692_v30  ;;  %v2908_v21 = vadd.f32 %v2844_v3, %v2693_v16  ;;  %v2909_v60 = vadd.f32 %v2845_v1, %v2694_v38 }
 0x5a6   : > { %v3189_v23 = vpop.permute.xlu1 %3188  ;;  %v3121_v12 = vadd.f32 %v3057_v28, %v2906_v29  ;;  %v3122_v27 = vadd.f32 %v3058_v40, %v2907_v47  ;;  %v3123_v15 = vadd.f32 %v3059_v2, %v2908_v21  ;;  %v3124_v13 = vadd.f32 %v3060_v53, %v2909_v60 }
 0x5a7   : > { %v3272_v0 = vmul.f32 %v5303_v25, %v3189_v23  ;;  %v3273_v44 = vmul.f32 %v5306_v32, %v3189_v23  ;;  %v3274_v35 = vmul.f32 %v7265_v37, %v3189_v23  ;;  %v3275_v14 = vmul.f32 %v5327_v45, %v3189_v23 }
 0x5a9   : > { %v3336_v54 = vadd.f32 %v3272_v0, %v3121_v12  ;;  %v3337_v10 = vadd.f32 %v3273_v44, %v3122_v27  ;;  %v3338_v25 = vadd.f32 %v3274_v35, %v3123_v15  ;;  %v3339_v62 = vadd.f32 %v3275_v14, %v3124_v13 }
 0x5ab   : > { %3400 = vst [vmem:[%s5391_s6 + $0x1e0] sm:$0xff] %v3336_v54  ;;  %3401 = vst [vmem:[%s5391_s6 + $0x1e8] sm:$0xff] %v3337_v10 }
 0x5ac   : > { %3402 = vst [vmem:[%s5391_s6 + $0x1f0] sm:$0xff] %v3338_v25  ;;  %3403 = vst [vmem:[%s5391_s6 + $0x1f8] sm:$0xff] %v3339_v62 }
 0x5ad   : > { %4088 = shalt.err (!%p4085_p10)
}
 0x5ae   : > { %s4089_s23 = scalar_lea.hbm %s6706_s9, 8192  ;;  %s4093_s30 = scalar_lea.hbm %s6759_s4, 16384 }
 0x5af   : > { %p4090_p0 = scmp.ne.s32.totalorder %s6706_s9, %s4089_s23  ;;  %p4094_p1 = scmp.lt.s32.totalorder %s6706_s9, %s6759_s4 }
 0x5b0   : > { %p4095_p3 = scmp.lt.s32.totalorder %s4093_s30, %s4089_s23 }
 0x5b1   : > { %p4091_p2 = pnand %p4090_p0, %p7336_p12 }
 0x5b2   : > { %p4096_p6 = por %p4095_p3, %p4094_p1 }
 0x5b3   : > { %p4092_p9 = pneg %p4091_p2 }
 0x5b5   : > { %p4097_p11 = pnand %p4096_p6, %p4092_p9 }
 0x5b7   : > { %4100 = shalt.err (!%p4097_p11)
}
 0x5b8   : > { %s4156_s6 = smov 512   ;;  %s4157_s14 = smov 32  }
 0x5b9   : > { %3700 = dma.vmem_to_hbm [thread:$0]  (%p7336_p12), %s6708_s22, 8192, %s6706_s9, %s3405_s20, %s4156_s6, %s4156_s6, %s4157_s14  }
 0x5ba PF: > { %s3434_s19 = sand.u32 1, %s4127_s15   ;;  %p7337_p13 = scmp.ne.s32.totalorder %s7002_s28, 0 }
 0x5bb   : > { %p7338_p4 = scmp.ge.s32.totalorder %s4139_s18, 2  ;;  %s3435_s7 = scalar_lea.sflag [#allocation4], %s3434_s19 }
 0x5bd   : > { %p3707_p5 = pnand %p7338_p4, %p7337_p13 }
 0x5bf   : > { %p3708_p7 = pneg %p3707_p5 }
 0x5c1   : > { %4122 = dma.done.wait (%p3708_p7), %s3435_s7, 8192  }
 0x5c2   : > { %4124 = vsyncadd (%p3708_p7), %s3435_s7, 4294959104  ;;  %p17_p8 = scmp.ge.s32.totalorder %s4208_s21, 4   ;;  %s7339_s15 = smov %s4131_s16 }
 0x5c3   : > { %s7340_s16 = smov %s4135_s17  ;;  %s7341_s17 = smov %s4220_s24 }
 0x5c4   : > { %s7342_s18 = smov %s4208_s21  ;;  %19 = sbr.rel (!%p17_p8) target bundleno = 5 (0x5), region = 90 }
 0x5c9   :  { %3440 = vsyncpa [#allocation3], 1 }
 0x5ca   :  { %3442 = vsyncpa [#allocation3 + $0x1], 1 }
 0x5cb   :  { %3443 = vsyncpa [#allocation4], 1 }
 0x5cc   :  { %3445 = vsyncpa [#allocation4 + $0x1], 1 }

</bundles_post_ra>
